<compile_context>
chip_gen: v7x
topology: tpu7x:2x2x1
jax: 0.10.0
libtpu: 0.0.40
codegen_flags: <defaults>
</compile_context>

<pallas_src>
import functools
import numpy as np
import jax
import jax.numpy as jnp
from jax.experimental import pallas as pl
from jax.experimental.pallas import tpu as pltpu


# ----------------------------------------------------------------------------- helpers

def _round_up(x, m):
    return ((x + m - 1) // m) * m


_SQRT1_2 = 0.7071067811865476


def _erf_poly(x):
    # Abramowitz & Stegun 7.1.26 rational approximation of erf, |err| <= 1.5e-7.
    a1, a2, a3, a4, a5 = (0.254829592, -0.284496736, 1.421413741,
                          -1.453152027, 1.061405429)
    pc = 0.3275911
    ax = jnp.abs(x)
    t = 1.0 / (1.0 + pc * ax)
    poly = ((((a5 * t + a4) * t + a3) * t + a2) * t + a1) * t
    y = 1.0 - poly * jnp.exp(-(ax * ax))
    return jnp.where(x >= 0.0, y, -y)


def _gelu_exact(x):
    # erf-based GELU (nn.GELU default), within fp32 tolerance of the exact value.
    return 0.5 * x * (1.0 + _erf_poly(x * _SQRT1_2))


# ----------------------------------------------------------------------------- matmul

def _matmul_kernel(*refs, activation, has_residual, single_k):
    if single_k:
        refs_, acc_ref = refs, None
    else:
        refs_, acc_ref = refs[:-1], refs[-1]
    if has_residual:
        x_ref, w_ref, b_ref, res_ref, o_ref = refs_
    else:
        x_ref, w_ref, b_ref, o_ref = refs_
        res_ref = None

    def epilogue(acc):
        r = acc + b_ref[...]
        if activation == "gelu":
            r = _gelu_exact(r)
        if res_ref is not None:
            r = r + res_ref[...].astype(jnp.float32)
        o_ref[...] = r.astype(o_ref.dtype)

    if single_k:
        # K fits in one tile: no accumulator scratch, write epilogue directly.
        epilogue(jnp.dot(x_ref[...], w_ref[...], preferred_element_type=jnp.float32))
    else:
        k = pl.program_id(2)

        @pl.when(k == 0)
        def _():
            acc_ref[...] = jnp.zeros_like(acc_ref)

        acc_ref[...] += jnp.dot(x_ref[...], w_ref[...],
                                preferred_element_type=jnp.float32)

        @pl.when(k == pl.num_programs(2) - 1)
        def _():
            epilogue(acc_ref[...])


_VMEM_TILE_BUDGET = 22 * 1024 * 1024   # double-buffered tiles; safe under a 32 MiB limit


def _select_tiles(M, K, N, out_bytes, res_bytes):
    # Row tile: as large as possible (cuts weight re-streaming M/tm times).
    if M >= 512:
        tm = 512
    elif M >= 256:
        tm = 256
    elif M >= 128:
        tm = 128
    else:
        tm = _round_up(M, 8)
    # Collapse the K grid for ViT-sized K (<= 3072): no accumulator round trips.
    tk = _round_up(K, 128) if K <= 3072 else 1024
    # Column tile: largest 128-multiple dividing the padded N that fits the VMEM budget.
    Nr = _round_up(N, 128)
    cands = [t for t in (1024, 768, 512, 384, 256, 128) if t <= Nr and Nr % t == 0]
    cands = cands or [Nr]
    tn = cands[-1]
    for t in cands:
        vmem = (2 * (tm * tk * 2 + tk * t * 2)          # double-buffered bf16 x/w tiles
                + 2 * tm * t * out_bytes                 # double-buffered out tile
                + 2 * tm * t * res_bytes                 # double-buffered residual tile
                + tm * t * 4)                            # fp32 accumulator scratch
        if vmem <= _VMEM_TILE_BUDGET:
            tn = t
            break
    return tm, tn, tk


def pallas_linear(x, w, b, activation=None, residual=None, out_dtype=jnp.float32):
    """x: (..., K), w: (K, N) (ideally pre-cast bf16), b: (N,).
    Optional fused residual add (same shape as output) and fused exact-erf GELU."""
    *lead, K = x.shape
    M = int(np.prod(lead)) if lead else 1
    N = w.shape[1]

    x2 = x.reshape(M, K).astype(jnp.bfloat16)            # bf16 activation stream
    w2 = w.astype(jnp.bfloat16)                          # no-op if pre-cast
    b2 = b.reshape(1, N).astype(jnp.float32)

    has_res = residual is not None
    out_bytes = int(np.dtype(out_dtype).itemsize)
    tm, tn, tk = _select_tiles(M, K, N, out_bytes=out_bytes,
                               res_bytes=(4 if has_res else 0))
    Mp, Np, Kp = _round_up(M, tm), _round_up(N, tn), _round_up(K, tk)

    if (Mp, Kp) != (M, K):
        x2 = jnp.pad(x2, ((0, Mp - M), (0, Kp - K)))
    if (Kp, Np) != (K, N):
        w2 = jnp.pad(w2, ((0, Kp - K), (0, Np - N)))
    if Np != N:
        b2 = jnp.pad(b2, ((0, 0), (0, Np - N)))

    nk = Kp // tk
    single_k = (nk == 1)

    in_specs = [pl.BlockSpec((tm, tk), lambda i, j, k: (i, k)),
                pl.BlockSpec((tk, tn), lambda i, j, k: (k, j)),
                pl.BlockSpec((1, tn), lambda i, j, k: (0, j))]
    args = [x2, w2, b2]
    if has_res:
        r2 = residual.reshape(M, N).astype(jnp.float32)
        if (Mp, Np) != (M, N):
            r2 = jnp.pad(r2, ((0, Mp - M), (0, Np - N)))
        in_specs.append(pl.BlockSpec((tm, tn), lambda i, j, k: (i, j)))
        args.append(r2)

    kern = functools.partial(_matmul_kernel, activation=activation,
                             has_residual=has_res, single_k=single_k)
    flops = 2 * Mp * Np * Kp
    bytes_accessed = (Mp * Kp * 2 + Kp * Np * 2 + Mp * Np * out_bytes
                      + (Mp * Np * 4 if has_res else 0))
    out = pl.pallas_call(
        kern,
        out_shape=jax.ShapeDtypeStruct((Mp, Np), out_dtype),
        grid=(Mp // tm, Np // tn, nk),
        in_specs=in_specs,
        out_specs=pl.BlockSpec((tm, tn), lambda i, j, k: (i, j)),
        scratch_shapes=([] if single_k else [pltpu.VMEM((tm, tn), jnp.float32)]),
        compiler_params=pltpu.CompilerParams(
            dimension_semantics=("parallel", "parallel", "arbitrary"),
            vmem_limit_bytes=32 * 1024 * 1024),
        cost_estimate=pl.CostEstimate(
            flops=flops,
            transcendentals=(Mp * Np if activation == "gelu" else 0),
            bytes_accessed=bytes_accessed),
    )(*args)

    if (Mp, Np) != (M, N):
        out = out[:M, :N]
    return out.reshape(*lead, N)


# ----------------------------------------------------------------------------- layernorm

def _layernorm_kernel(x_ref, g_ref, b_ref, o_ref):
    x = x_ref[...].astype(jnp.float32)
    mean = jnp.mean(x, axis=-1, keepdims=True)
    c = x - mean
    var = jnp.mean(c * c, axis=-1, keepdims=True)        # biased variance (PyTorch LN)
    inv = jax.lax.rsqrt(var + 1e-5)                      # nn.LayerNorm default eps
    o_ref[...] = (c * inv * g_ref[...] + b_ref[...]).astype(o_ref.dtype)


def pallas_layernorm(x, g, b, out_dtype=jnp.bfloat16):
    """Fp32 row statistics; bf16 output by default (feeds a bf16 matmul next)."""
    *lead, C = x.shape
    M = int(np.prod(lead))
    x2 = x.reshape(M, C).astype(jnp.float32)

    if M >= 1024:
        tm = 1024
    elif M >= 512:
        tm = 512
    else:
        tm = _round_up(M, 8)
    Mp = _round_up(M, tm)
    if Mp != M:
        x2 = jnp.pad(x2, ((0, Mp - M), (0, 0)))          # padded rows are discarded

    out = pl.pallas_call(
        _layernorm_kernel,
        out_shape=jax.ShapeDtypeStruct((Mp, C), out_dtype),
        grid=(Mp // tm,),
        in_specs=[pl.BlockSpec((tm, C), lambda i: (i, 0)),
                  pl.BlockSpec((1, C), lambda i: (0, 0)),
                  pl.BlockSpec((1, C), lambda i: (0, 0))],
        out_specs=pl.BlockSpec((tm, C), lambda i: (i, 0)),
        compiler_params=pltpu.CompilerParams(dimension_semantics=("parallel",)),
    )(x2, g.reshape(1, C).astype(jnp.float32), b.reshape(1, C).astype(jnp.float32))

    if Mp != M:
        out = out[:M]
    return out.reshape(*lead, C)


# ----------------------------------------------------------------------------- attention

def _attn_kernel(q_ref, k_ref, v_ref, o_ref, *, scale, n_valid):
    tb, H, Np, D = q_ref.shape
    # softmax scale folded into q (H*N*Dh mults instead of H*N*N)
    q = (q_ref[...] * jnp.float32(scale)).astype(jnp.bfloat16).reshape(tb * H, Np, D)
    k = k_ref[...].reshape(tb * H, Np, D)
    v = v_ref[...].reshape(tb * H, Np, D)
    s = jnp.einsum('bnd,bmd->bnm', q, k, preferred_element_type=jnp.float32)
    if n_valid is not None:
        key_idx = jax.lax.broadcasted_iota(jnp.int32, s.shape, dimension=2)
        s = jnp.where(key_idx < n_valid, s, -1e30)       # mask padded key columns
    s = s - jnp.max(s, axis=-1, keepdims=True)
    p = jnp.exp(s)
    denom = jnp.sum(p, axis=-1, keepdims=True)
    p = p * pl.reciprocal(denom, approx=True)            # EUP slot, off the VALU path
    # TODO(synk): for long sequences switch to a flash-style K/V-tiled online softmax.
    o = jnp.einsum('bnm,bmd->bnd', p.astype(jnp.bfloat16), v,
                   preferred_element_type=jnp.float32)
    o_ref[...] = o.reshape(tb, H, Np, D).astype(o_ref.dtype)


def pallas_attention_core(q, k, v, scale):
    """q,k,v: (Bn, H, N, Dh) -> softmax(q k^T * scale) v, bf16 in/out (bandwidth)."""
    Bn, H, N, D = q.shape
    # Token-dim padding: lane-dense (128) for long sequences, sublane-dense (8) otherwise.
    Np = _round_up(N, 128) if N > 128 else _round_up(N, 8)
    qb = q.astype(jnp.bfloat16)
    kb = k.astype(jnp.bfloat16)
    vb = v.astype(jnp.bfloat16)
    if Np != N:
        pad = ((0, 0), (0, 0), (0, Np - N), (0, 0))
        qb = jnp.pad(qb, pad)
        kb = jnp.pad(kb, pad)
        vb = jnp.pad(vb, pad)
    # Batch sequences per grid step (amortize step overhead, fill the MXU); bound the
    # fp32 score-matrix scratch to ~4 MiB per step.
    tb = max(1, min(Bn, (1 << 20) // max(H * Np * Np, 1), 64))
    Bp = _round_up(Bn, tb)
    if Bp != Bn:
        padb = ((0, Bp - Bn), (0, 0), (0, 0), (0, 0))
        qb = jnp.pad(qb, padb)
        kb = jnp.pad(kb, padb)
        vb = jnp.pad(vb, padb)

    kern = functools.partial(_attn_kernel, scale=scale,
                             n_valid=(N if Np != N else None))
    spec = pl.BlockSpec((tb, H, Np, D), lambda i: (i, 0, 0, 0))
    out = pl.pallas_call(
        kern,
        out_shape=jax.ShapeDtypeStruct((Bp, H, Np, D), jnp.bfloat16),
        grid=(Bp // tb,),
        in_specs=[spec, spec, spec],
        out_specs=spec,
        compiler_params=pltpu.CompilerParams(
            dimension_semantics=("parallel",),
            vmem_limit_bytes=32 * 1024 * 1024),
        cost_estimate=pl.CostEstimate(
            flops=4 * Bp * H * Np * Np * D,
            transcendentals=Bp * H * Np * Np,
            bytes_accessed=8 * Bp * H * Np * D),
    )(qb, kb, vb)
    if (Bp, Np) != (Bn, N):
        out = out[:Bn, :, :N, :]
    return out


# ----------------------------------------------------------------------------- modules

def attention(x, p, num_heads):
    """Attention module (with_qkv=True); dropout = identity (eval)."""
    Bn, N, C = x.shape
    hd = C // num_heads
    scale = hd ** (-0.5)
    qkv = pallas_linear(x, p['qkv_w'], p['qkv_b'], out_dtype=jnp.bfloat16)   # (Bn,N,3C)
    # TODO(synk): fold the head split/merge into the qkv/proj BlockSpecs to eliminate
    # these (now bf16, half-cost) XLA transposes entirely.
    qkv = qkv.reshape(Bn, N, 3, num_heads, hd).transpose(2, 0, 3, 1, 4)      # (3,Bn,H,N,hd)
    o = pallas_attention_core(qkv[0], qkv[1], qkv[2], scale)                 # (Bn,H,N,hd) bf16
    o = o.transpose(0, 2, 1, 3).reshape(Bn, N, C)
    return pallas_linear(o, p['proj_w'], p['proj_b'], out_dtype=jnp.bfloat16)


def mlp(x, p, residual):
    # GELU (exact-erf) fused into fc1 epilogue; residual add fused into fc2 epilogue.
    h = pallas_linear(x, p['fc1_w'], p['fc1_b'], activation="gelu",
                      out_dtype=jnp.bfloat16)
    return pallas_linear(h, p['fc2_w'], p['fc2_b'], residual=residual,
                         out_dtype=jnp.float32)


def block_forward(x, p, B, T, W, num_heads):
    """Block.forward, attention_type='divided_space_time' (DropPath = identity)."""
    num_spatial = (x.shape[1] - 1) // T
    H = num_spatial // W
    M = x.shape[2]

    # --- temporal attention -------------------------------------------------
    x_spat = x[:, 1:, :]                                                  # (B, HWT, M) fp32
    xt = x_spat.reshape(B * H * W, T, M)                                  # b (h w t) m -> (b h w) t m
    rt = attention(pallas_layernorm(xt, p['tnorm_g'], p['tnorm_b']), p['tattn'], num_heads)
    rt = rt.reshape(B, H * W * T, M)                                      # (b h w) t m -> b (h w t) m
    # temporal_fc with the residual add (x[:,1:,:] + .) fused into the epilogue
    xt = pallas_linear(rt, p['tfc_w'], p['tfc_b'],
                       residual=x_spat, out_dtype=jnp.float32)            # (B, HWT, M) fp32

    # --- spatial attention --------------------------------------------------
    init_cls = x[:, 0:1, :]                                               # (B,1,M) fp32
    cls_tok = jnp.repeat(init_cls, T, axis=1).reshape(B * T, 1, M)        # (BT,1,M)
    xs = xt.reshape(B, H, W, T, M).transpose(0, 3, 1, 2, 4).reshape(B * T, H * W, M)
    xs = jnp.concatenate([cls_tok, xs], axis=1)                           # (BT, 1+HW, M)
    rs = attention(pallas_layernorm(xs, p['norm1_g'], p['norm1_b']), p['attn'], num_heads)
    cls_out = rs[:, 0, :].astype(jnp.float32).reshape(B, T, M).mean(axis=1, keepdims=True)
    rs = rs[:, 1:, :].reshape(B, T, H, W, M).transpose(0, 2, 3, 1, 4).reshape(B, H * W * T, M)

    x_new = (jnp.concatenate([init_cls, xt], axis=1)
             + jnp.concatenate([cls_out.astype(rs.dtype), rs], axis=1))   # fp32 residual stream
    # MLP with the residual add fused into the fc2 epilogue
    x_new = mlp(pallas_layernorm(x_new, p['norm2_g'], p['norm2_b']), p['mlp'],
                residual=x_new)
    return x_new


def patch_embed(x, p, patch_size):
    """Conv2d(k=stride=patch) lowered to unfold + tiled Pallas matmul."""
    B, C, T, H, W = x.shape
    ps = patch_size
    Hn, Wn = H // ps, W // ps
    x = x.transpose(0, 2, 1, 3, 4).reshape(B * T, C, H, W)                # b c t h w -> (b t) c h w
    patches = (x.reshape(B * T, C, Hn, ps, Wn, ps)
                 .transpose(0, 2, 4, 1, 3, 5)                             # (bt, Hn, Wn, C, ps, ps)
                 .reshape(B * T * Hn * Wn, C * ps * ps))
    out = pallas_linear(patches, p['proj_w'], p['proj_b'])                # fp32, joins residual stream
    E = out.shape[-1]
    return out.reshape(B * T, Hn * Wn, E), T, Wn


def forward_features(x, params, cfg):
    B = x.shape[0]
    x, T, W = patch_embed(x, params['patch_embed'], cfg['patch_size'])
    BT, Np, E = x.shape
    cls = jnp.broadcast_to(params['cls_token'], (BT, 1, E))
    x = jnp.concatenate([cls, x], axis=1)
    x = x + params['pos_embed']                                           # seq lengths match
    # TODO(synk): F.interpolate pos/time-embed resize branch not implemented (not taken here).

    # divided_space_time: time embedding
    cls_tokens = x[:B, 0:1, :]                                            # (B,1,E)
    x = x[:, 1:]
    x = x.reshape(B, T, Np, E).transpose(0, 2, 1, 3).reshape(B * Np, T, E)  # (b t) n m -> (b n) t m
    x = x + params['time_embed']
    x = x.reshape(B, Np, T, E).reshape(B, Np * T, E)                      # (b n) t m -> b (n t) m
    x = jnp.concatenate([cls_tokens, x], axis=1)

    for blk in params['blocks']:
        x = block_forward(x, blk, B, T, W, cfg['num_heads'])

    x = pallas_layernorm(x, params['norm_g'], params['norm_b'])
    return x[:, 0]                                                        # cls token


def vit_forward(x, params, cfg):
    feats = forward_features(x, params, cfg)                              # (B, E)
    h = pallas_linear(feats, params['head_w'], params['head_b'])          # (B, lang_dim) fp32
    h = h / jnp.maximum(jnp.linalg.norm(h, axis=1, keepdims=True), 1e-12)
    logits = pallas_linear(h, params['head_cls_w'], params['head_cls_b']) / cfg['temp']
    return jax.nn.softmax(logits, axis=1)                                 # eval-mode softmax(dim=1)


# ----------------------------------------------------------------------------- params

def init_params(key, cfg):
    E = cfg['embed_dim']
    C = cfg['in_chans']
    ps = cfg['patch_size']
    num_patches = (cfg['img_size'] // ps) ** 2
    hidden = int(E * cfg['mlp_ratio'])

    keys = iter(jax.random.split(key, 256))

    def nrm(shape, std=0.02):
        return std * jax.random.normal(next(keys), shape, jnp.float32)

    params = {
        'patch_embed': {'proj_w': nrm((C * ps * ps, E)), 'proj_b': nrm((E,))},
        'cls_token': nrm((1, 1, E)),
        'pos_embed': nrm((1, num_patches + 1, E)),
        'time_embed': nrm((1, cfg['num_frames'], E)),
        'norm_g': jnp.ones((E,), jnp.float32), 'norm_b': jnp.zeros((E,), jnp.float32),
        'head_w': nrm((E, cfg['lang_dim'])), 'head_b': jnp.zeros((cfg['lang_dim'],), jnp.float32),
        'head_cls_w': nrm((cfg['lang_dim'], cfg['num_classes'])),
        'head_cls_b': jnp.zeros((cfg['num_classes'],), jnp.float32),
    }
    blocks = []
    for i in range(cfg['depth']):
        blk = {
            'tnorm_g': jnp.ones((E,), jnp.float32), 'tnorm_b': jnp.zeros((E,), jnp.float32),
            'tattn': {'qkv_w': nrm((E, 3 * E)), 'qkv_b': jnp.zeros((3 * E,), jnp.float32),  # qkv_bias=False
                      'proj_w': nrm((E, E)), 'proj_b': jnp.zeros((E,), jnp.float32)},
            # module init zeroes temporal_fc for blocks i > 0
            'tfc_w': nrm((E, E)) if i == 0 else jnp.zeros((E, E), jnp.float32),
            'tfc_b': jnp.zeros((E,), jnp.float32),
            'norm1_g': jnp.ones((E,), jnp.float32), 'norm1_b': jnp.zeros((E,), jnp.float32),
            'attn': {'qkv_w': nrm((E, 3 * E)), 'qkv_b': jnp.zeros((3 * E,), jnp.float32),
                     'proj_w': nrm((E, E)), 'proj_b': jnp.zeros((E,), jnp.float32)},
            'norm2_g': jnp.ones((E,), jnp.float32), 'norm2_b': jnp.zeros((E,), jnp.float32),
            'mlp': {'fc1_w': nrm((E, hidden)), 'fc1_b': jnp.zeros((hidden,), jnp.float32),
                    'fc2_w': nrm((hidden, E)), 'fc2_b': jnp.zeros((E,), jnp.float32)},
        }
        blocks.append(blk)
    params['blocks'] = blocks
    return params


def prepare_params(params):
    """One-time (outside jit) cast of all 2-D weight matrices to bf16 for the MXU.
    LayerNorm scale/shift, biases and embeddings stay fp32 (elementwise math in fp32)."""
    def rec(obj):
        if isinstance(obj, dict):
            return {k: (v.astype(jnp.bfloat16)
                        if (k.endswith('_w') and hasattr(v, 'ndim') and v.ndim == 2)
                        else rec(v))
                    for k, v in obj.items()}
        if isinstance(obj, list):
            return [rec(e) for e in obj]
        return obj
    return rec(params)


# ----------------------------------------------------------------------------- main

if __name__ == "__main__":
    cfg = dict(img_size=16, patch_size=8, in_chans=3, embed_dim=32, depth=2,
               num_heads=4, mlp_ratio=4.0, num_frames=2, num_classes=10,
               lang_dim=16, temp=0.07)

    key = jax.random.PRNGKey(0)
    kp, kx = jax.random.split(key)
    params = prepare_params(init_params(kp, cfg))            # bf16 weights, once, outside jit

    # x: (B, C, T, H, W) = (2, 3, 2, 16, 16)   # layout: NCTHW, matches PyTorch input
    x = jax.random.normal(kx, (2, cfg['in_chans'], cfg['num_frames'],
                               cfg['img_size'], cfg['img_size']), jnp.float32)

    fwd = jax.jit(lambda inp: vit_forward(inp, params, cfg))
    out = jax.block_until_ready(fwd(x))

    assert out.shape == (2, cfg['num_classes'])
    assert bool(jnp.all(jnp.isfinite(out)))
    # softmax rows sum to 1
    assert bool(jnp.allclose(jnp.sum(out, axis=1), 1.0, atol=1e-5))
    print("KERNEL_OK")
</pallas_src>

<mosaic_0001>
module attributes {stable_mosaic.version = 11 : i64} {
  func.func @_layernorm_kernel(%arg0: i32, %arg1: memref<16x32xf32, #tpu.memory_space<vmem>>, %arg2: memref<1x32xf32, #tpu.memory_space<vmem>>, %arg3: memref<1x32xf32, #tpu.memory_space<vmem>>, %arg4: memref<16x32xbf16, #tpu.memory_space<vmem>>) attributes {dimension_semantics = [#tpu.dimension_semantics<parallel>], iteration_bounds = array<i64: 1>, scalar_prefetch = 0 : i64, scratch_operands = 0 : i64, tpu.core_type = #tpu.core_type<tc>, window_params = [{transform_indices = @transform_0, window_bounds = array<i64: 16, 32>}, {pipeline_mode = #tpu.pipeline_mode<synchronous>, transform_indices = @transform_1, window_bounds = array<i64: 1, 32>}, {pipeline_mode = #tpu.pipeline_mode<synchronous>, transform_indices = @transform_2, window_bounds = array<i64: 1, 32>}, {transform_indices = @transform_3, window_bounds = array<i64: 16, 32>}]} {
    %c0 = arith.constant 0 : index
    %c0_0 = arith.constant 0 : index
    %0 = vector.load %arg1[%c0, %c0_0] : memref<16x32xf32, #tpu.memory_space<vmem>>, vector<16x32xf32>
    %cst = arith.constant dense<0.000000e+00> : vector<16xf32>
    %1 = vector.multi_reduction <add>, %0, %cst [1] : vector<16x32xf32> to vector<16xf32>
    %2 = vector.shape_cast %1 : vector<16xf32> to vector<16x1xf32>
    %cst_1 = arith.constant 3.200000e+01 : f32
    %3 = vector.broadcast %cst_1 : f32 to vector<16x1xf32>
    %4 = arith.divf %2, %3 : vector<16x1xf32>
    %5 = vector.broadcast %4 : vector<16x1xf32> to vector<16x32xf32>
    %6 = arith.subf %0, %5 : vector<16x32xf32>
    %7 = arith.mulf %6, %6 : vector<16x32xf32>
    %cst_2 = arith.constant dense<0.000000e+00> : vector<16xf32>
    %8 = vector.multi_reduction <add>, %7, %cst_2 [1] : vector<16x32xf32> to vector<16xf32>
    %9 = vector.shape_cast %8 : vector<16xf32> to vector<16x1xf32>
    %cst_3 = arith.constant 3.200000e+01 : f32
    %10 = vector.broadcast %cst_3 : f32 to vector<16x1xf32>
    %11 = arith.divf %9, %10 : vector<16x1xf32>
    %cst_4 = arith.constant 9.99999974E-6 : f32
    %12 = vector.broadcast %cst_4 : f32 to vector<16x1xf32>
    %13 = arith.addf %11, %12 : vector<16x1xf32>
    %14 = math.rsqrt %13 : vector<16x1xf32>
    %15 = vector.broadcast %14 : vector<16x1xf32> to vector<16x32xf32>
    %16 = arith.mulf %6, %15 : vector<16x32xf32>
    %c0_5 = arith.constant 0 : index
    %c0_6 = arith.constant 0 : index
    %17 = vector.load %arg2[%c0_5, %c0_6] : memref<1x32xf32, #tpu.memory_space<vmem>>, vector<1x32xf32>
    %18 = vector.broadcast %17 : vector<1x32xf32> to vector<16x32xf32>
    %19 = arith.mulf %16, %18 : vector<16x32xf32>
    %c0_7 = arith.constant 0 : index
    %c0_8 = arith.constant 0 : index
    %20 = vector.load %arg3[%c0_7, %c0_8] : memref<1x32xf32, #tpu.memory_space<vmem>>, vector<1x32xf32>
    %21 = vector.broadcast %20 : vector<1x32xf32> to vector<16x32xf32>
    %22 = arith.addf %19, %21 : vector<16x32xf32>
    %23 = arith.truncf %22 : vector<16x32xf32> to vector<16x32xbf16>
    %c0_9 = arith.constant 0 : index
    %c0_10 = arith.constant 0 : index
    %24 = vector.load %arg4[%c0_9, %c0_10] : memref<16x32xbf16, #tpu.memory_space<vmem>>, vector<16x32xbf16>
    tpu.vector_store %arg4[%c0_9, %c0_10], %23 {strides = array<i32>} : memref<16x32xbf16, #tpu.memory_space<vmem>>, vector<16x32xbf16>,
    return
  }
  func.func @transform_0(%arg0: i32) -> (i32, i32) {
    %c0_i32 = arith.constant 0 : i32
    %c0_i32_0 = arith.constant 0 : i32
    return %arg0, %c0_i32 : i32, i32
  }
  func.func @transform_1(%arg0: i32) -> (i32, i32) {
    %c0_i32 = arith.constant 0 : i32
    %c0_i32_0 = arith.constant 0 : i32
    %c0_i32_1 = arith.constant 0 : i32
    return %c0_i32, %c0_i32_0 : i32, i32
  }
  func.func @transform_2(%arg0: i32) -> (i32, i32) {
    %c0_i32 = arith.constant 0 : i32
    %c0_i32_0 = arith.constant 0 : i32
    %c0_i32_1 = arith.constant 0 : i32
    return %c0_i32, %c0_i32_0 : i32, i32
  }
  func.func @transform_3(%arg0: i32) -> (i32, i32) {
    %c0_i32 = arith.constant 0 : i32
    %c0_i32_0 = arith.constant 0 : i32
    return %arg0, %c0_i32 : i32, i32
  }
}

module attributes {stable_mosaic.version = 11 : i64} {
  func.func @_matmul_kernel(%arg0: i32, %arg1: i32, %arg2: i32, %arg3: memref<16x256xbf16, #tpu.memory_space<vmem>>, %arg4: memref<256x128xbf16, #tpu.memory_space<vmem>>, %arg5: memref<1x128xf32, #tpu.memory_space<vmem>>, %arg6: memref<16x128xf32, #tpu.memory_space<vmem>>) attributes {dimension_semantics = [#tpu.dimension_semantics<parallel>, #tpu.dimension_semantics<parallel>, #tpu.dimension_semantics<arbitrary>], iteration_bounds = array<i64: 1, 1, 1>, scalar_prefetch = 0 : i64, scratch_operands = 0 : i64, tpu.core_type = #tpu.core_type<tc>, window_params = [{transform_indices = @transform_0, window_bounds = array<i64: 16, 256>}, {transform_indices = @transform_1, window_bounds = array<i64: 256, 128>}, {transform_indices = @transform_2, window_bounds = array<i64: 1, 128>}, {transform_indices = @transform_3, window_bounds = array<i64: 16, 128>}]} {
    %c0 = arith.constant 0 : index
    %c0_0 = arith.constant 0 : index
    %0 = vector.load %arg3[%c0, %c0_0] : memref<16x256xbf16, #tpu.memory_space<vmem>>, vector<16x256xbf16>
    %c0_1 = arith.constant 0 : index
    %c0_2 = arith.constant 0 : index
    %1 = vector.load %arg4[%c0_1, %c0_2] : memref<256x128xbf16, #tpu.memory_space<vmem>>, vector<256x128xbf16>
    %cst = arith.constant dense<0.000000e+00> : vector<16x128xf32>
    %2 = tpu.matmul %0, %1, %cst {dimension_numbers = #tpu.dot_dimension_numbers<[1], [0], [0], [1], [0, 0, 1, 1], [], []>} : vector<16x256xbf16>, vector<256x128xbf16>, vector<16x128xf32> -> vector<16x128xf32>
    %c0_3 = arith.constant 0 : index
    %c0_4 = arith.constant 0 : index
    %3 = vector.load %arg5[%c0_3, %c0_4] : memref<1x128xf32, #tpu.memory_space<vmem>>, vector<1x128xf32>
    %4 = vector.broadcast %3 : vector<1x128xf32> to vector<16x128xf32>
    %5 = arith.addf %2, %4 : vector<16x128xf32>
    %c0_5 = arith.constant 0 : index
    %c0_6 = arith.constant 0 : index
    %6 = vector.load %arg6[%c0_5, %c0_6] : memref<16x128xf32, #tpu.memory_space<vmem>>, vector<16x128xf32>
    tpu.vector_store %arg6[%c0_5, %c0_6], %5 {strides = array<i32>} : memref<16x128xf32, #tpu.memory_space<vmem>>, vector<16x128xf32>,
    return
  }
  func.func @transform_0(%arg0: i32, %arg1: i32, %arg2: i32) -> (i32, i32) {
    %c0_i32 = arith.constant 0 : i32
    return %arg0, %arg2 : i32, i32
  }
  func.func @transform_1(%arg0: i32, %arg1: i32, %arg2: i32) -> (i32, i32) {
    %c0_i32 = arith.constant 0 : i32
    return %arg2, %arg1 : i32, i32
  }
  func.func @transform_2(%arg0: i32, %arg1: i32, %arg2: i32) -> (i32, i32) {
    %c0_i32 = arith.constant 0 : i32
    %c0_i32_0 = arith.constant 0 : i32
    return %c0_i32, %arg1 : i32, i32
  }
  func.func @transform_3(%arg0: i32, %arg1: i32, %arg2: i32) -> (i32, i32) {
    %c0_i32 = arith.constant 0 : i32
    return %arg0, %arg1 : i32, i32
  }
}

module attributes {stable_mosaic.version = 11 : i64} {
  func.func @_matmul_kernel(%arg0: i32, %arg1: i32, %arg2: i32, %arg3: memref<16x128xbf16, #tpu.memory_space<vmem>>, %arg4: memref<128x128xbf16, #tpu.memory_space<vmem>>, %arg5: memref<1x128xf32, #tpu.memory_space<vmem>>, %arg6: memref<16x128xbf16, #tpu.memory_space<vmem>>) attributes {dimension_semantics = [#tpu.dimension_semantics<parallel>, #tpu.dimension_semantics<parallel>, #tpu.dimension_semantics<arbitrary>], iteration_bounds = array<i64: 1, 1, 1>, scalar_prefetch = 0 : i64, scratch_operands = 0 : i64, tpu.core_type = #tpu.core_type<tc>, window_params = [{transform_indices = @transform_0, window_bounds = array<i64: 16, 128>}, {transform_indices = @transform_1, window_bounds = array<i64: 128, 128>}, {transform_indices = @transform_2, window_bounds = array<i64: 1, 128>}, {transform_indices = @transform_3, window_bounds = array<i64: 16, 128>}]} {
    %c0 = arith.constant 0 : index
    %c0_0 = arith.constant 0 : index
    %0 = vector.load %arg3[%c0, %c0_0] : memref<16x128xbf16, #tpu.memory_space<vmem>>, vector<16x128xbf16>
    %c0_1 = arith.constant 0 : index
    %c0_2 = arith.constant 0 : index
    %1 = vector.load %arg4[%c0_1, %c0_2] : memref<128x128xbf16, #tpu.memory_space<vmem>>, vector<128x128xbf16>
    %cst = arith.constant dense<0.000000e+00> : vector<16x128xf32>
    %2 = tpu.matmul %0, %1, %cst {dimension_numbers = #tpu.dot_dimension_numbers<[1], [0], [0], [1], [0, 0, 1, 1], [], []>} : vector<16x128xbf16>, vector<128x128xbf16>, vector<16x128xf32> -> vector<16x128xf32>
    %c0_3 = arith.constant 0 : index
    %c0_4 = arith.constant 0 : index
    %3 = vector.load %arg5[%c0_3, %c0_4] : memref<1x128xf32, #tpu.memory_space<vmem>>, vector<1x128xf32>
    %4 = vector.broadcast %3 : vector<1x128xf32> to vector<16x128xf32>
    %5 = arith.addf %2, %4 : vector<16x128xf32>
    %6 = arith.truncf %5 : vector<16x128xf32> to vector<16x128xbf16>
    %c0_5 = arith.constant 0 : index
    %c0_6 = arith.constant 0 : index
    %7 = vector.load %arg6[%c0_5, %c0_6] : memref<16x128xbf16, #tpu.memory_space<vmem>>, vector<16x128xbf16>
    tpu.vector_store %arg6[%c0_5, %c0_6], %6 {strides = array<i32>} : memref<16x128xbf16, #tpu.memory_space<vmem>>, vector<16x128xbf16>,
    return
  }
  func.func @transform_0(%arg0: i32, %arg1: i32, %arg2: i32) -> (i32, i32) {
    %c0_i32 = arith.constant 0 : i32
    return %arg0, %arg2 : i32, i32
  }
  func.func @transform_1(%arg0: i32, %arg1: i32, %arg2: i32) -> (i32, i32) {
    %c0_i32 = arith.constant 0 : i32
    return %arg2, %arg1 : i32, i32
  }
  func.func @transform_2(%arg0: i32, %arg1: i32, %arg2: i32) -> (i32, i32) {
    %c0_i32 = arith.constant 0 : i32
    %c0_i32_0 = arith.constant 0 : i32
    return %c0_i32, %arg1 : i32, i32
  }
  func.func @transform_3(%arg0: i32, %arg1: i32, %arg2: i32) -> (i32, i32) {
    %c0_i32 = arith.constant 0 : i32
    return %arg0, %arg1 : i32, i32
  }
}

module attributes {stable_mosaic.version = 11 : i64} {
  func.func @_attn_kernel(%arg0: i32, %arg1: memref<8x4x8x8xbf16, #tpu.memory_space<vmem>>, %arg2: memref<8x4x8x8xbf16, #tpu.memory_space<vmem>>, %arg3: memref<8x4x8x8xbf16, #tpu.memory_space<vmem>>, %arg4: memref<8x4x8x8xbf16, #tpu.memory_space<vmem>>) attributes {dimension_semantics = [#tpu.dimension_semantics<parallel>], iteration_bounds = array<i64: 1>, scalar_prefetch = 0 : i64, scratch_operands = 0 : i64, tpu.core_type = #tpu.core_type<tc>, window_params = [{transform_indices = @transform_0, window_bounds = array<i64: 8, 4, 8, 8>}, {transform_indices = @transform_1, window_bounds = array<i64: 8, 4, 8, 8>}, {transform_indices = @transform_2, window_bounds = array<i64: 8, 4, 8, 8>}, {transform_indices = @transform_3, window_bounds = array<i64: 8, 4, 8, 8>}]} {
    %c0 = arith.constant 0 : index
    %c0_0 = arith.constant 0 : index
    %c0_1 = arith.constant 0 : index
    %c0_2 = arith.constant 0 : index
    %0 = vector.load %arg1[%c0, %c0_0, %c0_1, %c0_2] : memref<8x4x8x8xbf16, #tpu.memory_space<vmem>>, vector<8x4x8x8xbf16>
    %1 = arith.extf %0 : vector<8x4x8x8xbf16> to vector<8x4x8x8xf32>
    %cst = arith.constant 0.353553385 : f32
    %2 = vector.broadcast %cst : f32 to vector<8x4x8x8xf32>
    %3 = arith.mulf %1, %2 : vector<8x4x8x8xf32>
    %4 = arith.truncf %3 : vector<8x4x8x8xf32> to vector<8x4x8x8xbf16>
    %5 = vector.shape_cast %4 : vector<8x4x8x8xbf16> to vector<32x8x8xbf16>
    %c0_3 = arith.constant 0 : index
    %c0_4 = arith.constant 0 : index
    %c0_5 = arith.constant 0 : index
    %c0_6 = arith.constant 0 : index
    %6 = vector.load %arg2[%c0_3, %c0_4, %c0_5, %c0_6] : memref<8x4x8x8xbf16, #tpu.memory_space<vmem>>, vector<8x4x8x8xbf16>
    %7 = vector.shape_cast %6 : vector<8x4x8x8xbf16> to vector<32x8x8xbf16>
    %c0_7 = arith.constant 0 : index
    %c0_8 = arith.constant 0 : index
    %c0_9 = arith.constant 0 : index
    %c0_10 = arith.constant 0 : index
    %8 = vector.load %arg3[%c0_7, %c0_8, %c0_9, %c0_10] : memref<8x4x8x8xbf16, #tpu.memory_space<vmem>>, vector<8x4x8x8xbf16>
    %9 = vector.shape_cast %8 : vector<8x4x8x8xbf16> to vector<32x8x8xbf16>
    "tpu.trace_start"() <{level = 10 : i32, message = "bnd,bmd->bnm"}> : () -> ()
    %cst_11 = arith.constant dense<0.000000e+00> : vector<32x8x8xf32>
    %10 = tpu.matmul %5, %7, %cst_11 {dimension_numbers = #tpu.dot_dimension_numbers<[2], [2], [1], [1], [0, 0, 0, 1, 1, 1], [0], [0]>} : vector<32x8x8xbf16>, vector<32x8x8xbf16>, vector<32x8x8xf32> -> vector<32x8x8xf32>
    "tpu.trace_stop"() : () -> ()
    %11 = tpu.iota {dimensions = array<i32: 2>} : vector<32x8x8xi32>
    %c2_i32 = arith.constant 2 : i32
    %12 = vector.broadcast %c2_i32 : i32 to vector<32x8x8xi32>
    %13 = arith.cmpi slt, %11, %12 : vector<32x8x8xi32>
    %cst_12 = arith.constant -1.000000e+30 : f32
    %14 = vector.broadcast %cst_12 : f32 to vector<32x8x8xf32>
    %15 = arith.select %13, %10, %14 : vector<32x8x8xi1>, vector<32x8x8xf32>
    %cst_13 = arith.constant dense<0xFF800000> : vector<32x8xf32>
    %16 = vector.multi_reduction <maximumf>, %15, %cst_13 [2] : vector<32x8x8xf32> to vector<32x8xf32>
    %17 = vector.shape_cast %16 : vector<32x8xf32> to vector<32x8x1xf32>
    %18 = vector.broadcast %17 : vector<32x8x1xf32> to vector<32x8x8xf32>
    %19 = arith.subf %15, %18 : vector<32x8x8xf32>
    %20 = math.exp %19 : vector<32x8x8xf32>
    %cst_14 = arith.constant dense<0.000000e+00> : vector<32x8xf32>
    %21 = vector.multi_reduction <add>, %20, %cst_14 [2] : vector<32x8x8xf32> to vector<32x8xf32>
    %22 = vector.shape_cast %21 : vector<32x8xf32> to vector<32x8x1xf32>
    %23 = tpu.reciprocal %22 {approx = true} : vector<32x8x1xf32> -> vector<32x8x1xf32>
    %24 = vector.broadcast %23 : vector<32x8x1xf32> to vector<32x8x8xf32>
    %25 = arith.mulf %20, %24 : vector<32x8x8xf32>
    %26 = arith.truncf %25 : vector<32x8x8xf32> to vector<32x8x8xbf16>
    "tpu.trace_start"() <{level = 10 : i32, message = "bnm,bmd->bnd"}> : () -> ()
    %cst_15 = arith.constant dense<0.000000e+00> : vector<32x8x8xf32>
    %27 = tpu.matmul %26, %9, %cst_15 {dimension_numbers = #tpu.dot_dimension_numbers<[2], [1], [1], [2], [0, 0, 0, 1, 1, 2], [0], [0]>} : vector<32x8x8xbf16>, vector<32x8x8xbf16>, vector<32x8x8xf32> -> vector<32x8x8xf32>
    "tpu.trace_stop"() : () -> ()
    %28 = vector.shape_cast %27 : vector<32x8x8xf32> to vector<8x4x8x8xf32>
    %29 = arith.truncf %28 : vector<8x4x8x8xf32> to vector<8x4x8x8xbf16>
    %c0_16 = arith.constant 0 : index
    %c0_17 = arith.constant 0 : index
    %c0_18 = arith.constant 0 : index
    %c0_19 = arith.constant 0 : index
    %30 = vector.load %arg4[%c0_16, %c0_17, %c0_18, %c0_19] : memref<8x4x8x8xbf16, #tpu.memory_space<vmem>>, vector<8x4x8x8xbf16>
    tpu.vector_store %arg4[%c0_16, %c0_17, %c0_18, %c0_19], %29 {strides = array<i32>} : memref<8x4x8x8xbf16, #tpu.memory_space<vmem>>, vector<8x4x8x8xbf16>,
    return
  }
  func.func @transform_0(%arg0: i32) -> (i32, i32, i32, i32) {
    %c0_i32 = arith.constant 0 : i32
    %c0_i32_0 = arith.constant 0 : i32
    %c0_i32_1 = arith.constant 0 : i32
    %c0_i32_2 = arith.constant 0 : i32
    return %arg0, %c0_i32, %c0_i32_0, %c0_i32_1 : i32, i32, i32, i32
  }
  func.func @transform_1(%arg0: i32) -> (i32, i32, i32, i32) {
    %c0_i32 = arith.constant 0 : i32
    %c0_i32_0 = arith.constant 0 : i32
    %c0_i32_1 = arith.constant 0 : i32
    %c0_i32_2 = arith.constant 0 : i32
    return %arg0, %c0_i32, %c0_i32_0, %c0_i32_1 : i32, i32, i32, i32
  }
  func.func @transform_2(%arg0: i32) -> (i32, i32, i32, i32) {
    %c0_i32 = arith.constant 0 : i32
    %c0_i32_0 = arith.constant 0 : i32
    %c0_i32_1 = arith.constant 0 : i32
    %c0_i32_2 = arith.constant 0 : i32
    return %arg0, %c0_i32, %c0_i32_0, %c0_i32_1 : i32, i32, i32, i32
  }
  func.func @transform_3(%arg0: i32) -> (i32, i32, i32, i32) {
    %c0_i32 = arith.constant 0 : i32
    %c0_i32_0 = arith.constant 0 : i32
    %c0_i32_1 = arith.constant 0 : i32
    %c0_i32_2 = arith.constant 0 : i32
    return %arg0, %c0_i32, %c0_i32_0, %c0_i32_1 : i32, i32, i32, i32
  }
}

module attributes {stable_mosaic.version = 11 : i64} {
  func.func @_matmul_kernel(%arg0: i32, %arg1: i32, %arg2: i32, %arg3: memref<16x128xbf16, #tpu.memory_space<vmem>>, %arg4: memref<128x128xbf16, #tpu.memory_space<vmem>>, %arg5: memref<1x128xf32, #tpu.memory_space<vmem>>, %arg6: memref<16x128xf32, #tpu.memory_space<vmem>>, %arg7: memref<16x128xf32, #tpu.memory_space<vmem>>) attributes {dimension_semantics = [#tpu.dimension_semantics<parallel>, #tpu.dimension_semantics<parallel>, #tpu.dimension_semantics<arbitrary>], iteration_bounds = array<i64: 1, 1, 1>, scalar_prefetch = 0 : i64, scratch_operands = 0 : i64, tpu.core_type = #tpu.core_type<tc>, window_params = [{transform_indices = @transform_0, window_bounds = array<i64: 16, 128>}, {transform_indices = @transform_1, window_bounds = array<i64: 128, 128>}, {transform_indices = @transform_2, window_bounds = array<i64: 1, 128>}, {transform_indices = @transform_3, window_bounds = array<i64: 16, 128>}, {transform_indices = @transform_4, window_bounds = array<i64: 16, 128>}]} {
    %c0 = arith.constant 0 : index
    %c0_0 = arith.constant 0 : index
    %0 = vector.load %arg3[%c0, %c0_0] : memref<16x128xbf16, #tpu.memory_space<vmem>>, vector<16x128xbf16>
    %c0_1 = arith.constant 0 : index
    %c0_2 = arith.constant 0 : index
    %1 = vector.load %arg4[%c0_1, %c0_2] : memref<128x128xbf16, #tpu.memory_space<vmem>>, vector<128x128xbf16>
    %cst = arith.constant dense<0.000000e+00> : vector<16x128xf32>
    %2 = tpu.matmul %0, %1, %cst {dimension_numbers = #tpu.dot_dimension_numbers<[1], [0], [0], [1], [0, 0, 1, 1], [], []>} : vector<16x128xbf16>, vector<128x128xbf16>, vector<16x128xf32> -> vector<16x128xf32>
    %c0_3 = arith.constant 0 : index
    %c0_4 = arith.constant 0 : index
    %3 = vector.load %arg5[%c0_3, %c0_4] : memref<1x128xf32, #tpu.memory_space<vmem>>, vector<1x128xf32>
    %4 = vector.broadcast %3 : vector<1x128xf32> to vector<16x128xf32>
    %5 = arith.addf %2, %4 : vector<16x128xf32>
    %c0_5 = arith.constant 0 : index
    %c0_6 = arith.constant 0 : index
    %6 = vector.load %arg6[%c0_5, %c0_6] : memref<16x128xf32, #tpu.memory_space<vmem>>, vector<16x128xf32>
    %7 = arith.addf %5, %6 : vector<16x128xf32>
    %c0_7 = arith.constant 0 : index
    %c0_8 = arith.constant 0 : index
    %8 = vector.load %arg7[%c0_7, %c0_8] : memref<16x128xf32, #tpu.memory_space<vmem>>, vector<16x128xf32>
    tpu.vector_store %arg7[%c0_7, %c0_8], %7 {strides = array<i32>} : memref<16x128xf32, #tpu.memory_space<vmem>>, vector<16x128xf32>,
    return
  }
  func.func @transform_0(%arg0: i32, %arg1: i32, %arg2: i32) -> (i32, i32) {
    %c0_i32 = arith.constant 0 : i32
    return %arg0, %arg2 : i32, i32
  }
  func.func @transform_1(%arg0: i32, %arg1: i32, %arg2: i32) -> (i32, i32) {
    %c0_i32 = arith.constant 0 : i32
    return %arg2, %arg1 : i32, i32
  }
  func.func @transform_2(%arg0: i32, %arg1: i32, %arg2: i32) -> (i32, i32) {
    %c0_i32 = arith.constant 0 : i32
    %c0_i32_0 = arith.constant 0 : i32
    return %c0_i32, %arg1 : i32, i32
  }
  func.func @transform_3(%arg0: i32, %arg1: i32, %arg2: i32) -> (i32, i32) {
    %c0_i32 = arith.constant 0 : i32
    return %arg0, %arg1 : i32, i32
  }
  func.func @transform_4(%arg0: i32, %arg1: i32, %arg2: i32) -> (i32, i32) {
    %c0_i32 = arith.constant 0 : i32
    return %arg0, %arg1 : i32, i32
  }
}

module attributes {stable_mosaic.version = 11 : i64} {
  func.func @_layernorm_kernel(%arg0: i32, %arg1: memref<24x32xf32, #tpu.memory_space<vmem>>, %arg2: memref<1x32xf32, #tpu.memory_space<vmem>>, %arg3: memref<1x32xf32, #tpu.memory_space<vmem>>, %arg4: memref<24x32xbf16, #tpu.memory_space<vmem>>) attributes {dimension_semantics = [#tpu.dimension_semantics<parallel>], iteration_bounds = array<i64: 1>, scalar_prefetch = 0 : i64, scratch_operands = 0 : i64, tpu.core_type = #tpu.core_type<tc>, window_params = [{transform_indices = @transform_0, window_bounds = array<i64: 24, 32>}, {pipeline_mode = #tpu.pipeline_mode<synchronous>, transform_indices = @transform_1, window_bounds = array<i64: 1, 32>}, {pipeline_mode = #tpu.pipeline_mode<synchronous>, transform_indices = @transform_2, window_bounds = array<i64: 1, 32>}, {transform_indices = @transform_3, window_bounds = array<i64: 24, 32>}]} {
    %c0 = arith.constant 0 : index
    %c0_0 = arith.constant 0 : index
    %0 = vector.load %arg1[%c0, %c0_0] : memref<24x32xf32, #tpu.memory_space<vmem>>, vector<24x32xf32>
    %cst = arith.constant dense<0.000000e+00> : vector<24xf32>
    %1 = vector.multi_reduction <add>, %0, %cst [1] : vector<24x32xf32> to vector<24xf32>
    %2 = vector.shape_cast %1 : vector<24xf32> to vector<24x1xf32>
    %cst_1 = arith.constant 3.200000e+01 : f32
    %3 = vector.broadcast %cst_1 : f32 to vector<24x1xf32>
    %4 = arith.divf %2, %3 : vector<24x1xf32>
    %5 = vector.broadcast %4 : vector<24x1xf32> to vector<24x32xf32>
    %6 = arith.subf %0, %5 : vector<24x32xf32>
    %7 = arith.mulf %6, %6 : vector<24x32xf32>
    %cst_2 = arith.constant dense<0.000000e+00> : vector<24xf32>
    %8 = vector.multi_reduction <add>, %7, %cst_2 [1] : vector<24x32xf32> to vector<24xf32>
    %9 = vector.shape_cast %8 : vector<24xf32> to vector<24x1xf32>
    %cst_3 = arith.constant 3.200000e+01 : f32
    %10 = vector.broadcast %cst_3 : f32 to vector<24x1xf32>
    %11 = arith.divf %9, %10 : vector<24x1xf32>
    %cst_4 = arith.constant 9.99999974E-6 : f32
    %12 = vector.broadcast %cst_4 : f32 to vector<24x1xf32>
    %13 = arith.addf %11, %12 : vector<24x1xf32>
    %14 = math.rsqrt %13 : vector<24x1xf32>
    %15 = vector.broadcast %14 : vector<24x1xf32> to vector<24x32xf32>
    %16 = arith.mulf %6, %15 : vector<24x32xf32>
    %c0_5 = arith.constant 0 : index
    %c0_6 = arith.constant 0 : index
    %17 = vector.load %arg2[%c0_5, %c0_6] : memref<1x32xf32, #tpu.memory_space<vmem>>, vector<1x32xf32>
    %18 = vector.broadcast %17 : vector<1x32xf32> to vector<24x32xf32>
    %19 = arith.mulf %16, %18 : vector<24x32xf32>
    %c0_7 = arith.constant 0 : index
    %c0_8 = arith.constant 0 : index
    %20 = vector.load %arg3[%c0_7, %c0_8] : memref<1x32xf32, #tpu.memory_space<vmem>>, vector<1x32xf32>
    %21 = vector.broadcast %20 : vector<1x32xf32> to vector<24x32xf32>
    %22 = arith.addf %19, %21 : vector<24x32xf32>
    %23 = arith.truncf %22 : vector<24x32xf32> to vector<24x32xbf16>
    %c0_9 = arith.constant 0 : index
    %c0_10 = arith.constant 0 : index
    %24 = vector.load %arg4[%c0_9, %c0_10] : memref<24x32xbf16, #tpu.memory_space<vmem>>, vector<24x32xbf16>
    tpu.vector_store %arg4[%c0_9, %c0_10], %23 {strides = array<i32>} : memref<24x32xbf16, #tpu.memory_space<vmem>>, vector<24x32xbf16>,
    return
  }
  func.func @transform_0(%arg0: i32) -> (i32, i32) {
    %c0_i32 = arith.constant 0 : i32
    %c0_i32_0 = arith.constant 0 : i32
    return %arg0, %c0_i32 : i32, i32
  }
  func.func @transform_1(%arg0: i32) -> (i32, i32) {
    %c0_i32 = arith.constant 0 : i32
    %c0_i32_0 = arith.constant 0 : i32
    %c0_i32_1 = arith.constant 0 : i32
    return %c0_i32, %c0_i32_0 : i32, i32
  }
  func.func @transform_2(%arg0: i32) -> (i32, i32) {
    %c0_i32 = arith.constant 0 : i32
    %c0_i32_0 = arith.constant 0 : i32
    %c0_i32_1 = arith.constant 0 : i32
    return %c0_i32, %c0_i32_0 : i32, i32
  }
  func.func @transform_3(%arg0: i32) -> (i32, i32) {
    %c0_i32 = arith.constant 0 : i32
    %c0_i32_0 = arith.constant 0 : i32
    return %arg0, %c0_i32 : i32, i32
  }
}

module attributes {stable_mosaic.version = 11 : i64} {
  func.func @_matmul_kernel(%arg0: i32, %arg1: i32, %arg2: i32, %arg3: memref<24x128xbf16, #tpu.memory_space<vmem>>, %arg4: memref<128x128xbf16, #tpu.memory_space<vmem>>, %arg5: memref<1x128xf32, #tpu.memory_space<vmem>>, %arg6: memref<24x128xbf16, #tpu.memory_space<vmem>>) attributes {dimension_semantics = [#tpu.dimension_semantics<parallel>, #tpu.dimension_semantics<parallel>, #tpu.dimension_semantics<arbitrary>], iteration_bounds = array<i64: 1, 1, 1>, scalar_prefetch = 0 : i64, scratch_operands = 0 : i64, tpu.core_type = #tpu.core_type<tc>, window_params = [{transform_indices = @transform_0, window_bounds = array<i64: 24, 128>}, {transform_indices = @transform_1, window_bounds = array<i64: 128, 128>}, {transform_indices = @transform_2, window_bounds = array<i64: 1, 128>}, {transform_indices = @transform_3, window_bounds = array<i64: 24, 128>}]} {
    %c0 = arith.constant 0 : index
    %c0_0 = arith.constant 0 : index
    %0 = vector.load %arg3[%c0, %c0_0] : memref<24x128xbf16, #tpu.memory_space<vmem>>, vector<24x128xbf16>
    %c0_1 = arith.constant 0 : index
    %c0_2 = arith.constant 0 : index
    %1 = vector.load %arg4[%c0_1, %c0_2] : memref<128x128xbf16, #tpu.memory_space<vmem>>, vector<128x128xbf16>
    %cst = arith.constant dense<0.000000e+00> : vector<24x128xf32>
    %2 = tpu.matmul %0, %1, %cst {dimension_numbers = #tpu.dot_dimension_numbers<[1], [0], [0], [1], [0, 0, 1, 1], [], []>} : vector<24x128xbf16>, vector<128x128xbf16>, vector<24x128xf32> -> vector<24x128xf32>
    %c0_3 = arith.constant 0 : index
    %c0_4 = arith.constant 0 : index
    %3 = vector.load %arg5[%c0_3, %c0_4] : memref<1x128xf32, #tpu.memory_space<vmem>>, vector<1x128xf32>
    %4 = vector.broadcast %3 : vector<1x128xf32> to vector<24x128xf32>
    %5 = arith.addf %2, %4 : vector<24x128xf32>
    %6 = arith.truncf %5 : vector<24x128xf32> to vector<24x128xbf16>
    %c0_5 = arith.constant 0 : index
    %c0_6 = arith.constant 0 : index
    %7 = vector.load %arg6[%c0_5, %c0_6] : memref<24x128xbf16, #tpu.memory_space<vmem>>, vector<24x128xbf16>
    tpu.vector_store %arg6[%c0_5, %c0_6], %6 {strides = array<i32>} : memref<24x128xbf16, #tpu.memory_space<vmem>>, vector<24x128xbf16>,
    return
  }
  func.func @transform_0(%arg0: i32, %arg1: i32, %arg2: i32) -> (i32, i32) {
    %c0_i32 = arith.constant 0 : i32
    return %arg0, %arg2 : i32, i32
  }
  func.func @transform_1(%arg0: i32, %arg1: i32, %arg2: i32) -> (i32, i32) {
    %c0_i32 = arith.constant 0 : i32
    return %arg2, %arg1 : i32, i32
  }
  func.func @transform_2(%arg0: i32, %arg1: i32, %arg2: i32) -> (i32, i32) {
    %c0_i32 = arith.constant 0 : i32
    %c0_i32_0 = arith.constant 0 : i32
    return %c0_i32, %arg1 : i32, i32
  }
  func.func @transform_3(%arg0: i32, %arg1: i32, %arg2: i32) -> (i32, i32) {
    %c0_i32 = arith.constant 0 : i32
    return %arg0, %arg1 : i32, i32
  }
}

module attributes {stable_mosaic.version = 11 : i64} {
  func.func @_attn_kernel(%arg0: i32, %arg1: memref<4x4x8x8xbf16, #tpu.memory_space<vmem>>, %arg2: memref<4x4x8x8xbf16, #tpu.memory_space<vmem>>, %arg3: memref<4x4x8x8xbf16, #tpu.memory_space<vmem>>, %arg4: memref<4x4x8x8xbf16, #tpu.memory_space<vmem>>) attributes {dimension_semantics = [#tpu.dimension_semantics<parallel>], iteration_bounds = array<i64: 1>, scalar_prefetch = 0 : i64, scratch_operands = 0 : i64, tpu.core_type = #tpu.core_type<tc>, window_params = [{transform_indices = @transform_0, window_bounds = array<i64: 4, 4, 8, 8>}, {transform_indices = @transform_1, window_bounds = array<i64: 4, 4, 8, 8>}, {transform_indices = @transform_2, window_bounds = array<i64: 4, 4, 8, 8>}, {transform_indices = @transform_3, window_bounds = array<i64: 4, 4, 8, 8>}]} {
    %c0 = arith.constant 0 : index
    %c0_0 = arith.constant 0 : index
    %c0_1 = arith.constant 0 : index
    %c0_2 = arith.constant 0 : index
    %0 = vector.load %arg1[%c0, %c0_0, %c0_1, %c0_2] : memref<4x4x8x8xbf16, #tpu.memory_space<vmem>>, vector<4x4x8x8xbf16>
    %1 = arith.extf %0 : vector<4x4x8x8xbf16> to vector<4x4x8x8xf32>
    %cst = arith.constant 0.353553385 : f32
    %2 = vector.broadcast %cst : f32 to vector<4x4x8x8xf32>
    %3 = arith.mulf %1, %2 : vector<4x4x8x8xf32>
    %4 = arith.truncf %3 : vector<4x4x8x8xf32> to vector<4x4x8x8xbf16>
    %5 = vector.shape_cast %4 : vector<4x4x8x8xbf16> to vector<16x8x8xbf16>
    %c0_3 = arith.constant 0 : index
    %c0_4 = arith.constant 0 : index
    %c0_5 = arith.constant 0 : index
    %c0_6 = arith.constant 0 : index
    %6 = vector.load %arg2[%c0_3, %c0_4, %c0_5, %c0_6] : memref<4x4x8x8xbf16, #tpu.memory_space<vmem>>, vector<4x4x8x8xbf16>
    %7 = vector.shape_cast %6 : vector<4x4x8x8xbf16> to vector<16x8x8xbf16>
    %c0_7 = arith.constant 0 : index
    %c0_8 = arith.constant 0 : index
    %c0_9 = arith.constant 0 : index
    %c0_10 = arith.constant 0 : index
    %8 = vector.load %arg3[%c0_7, %c0_8, %c0_9, %c0_10] : memref<4x4x8x8xbf16, #tpu.memory_space<vmem>>, vector<4x4x8x8xbf16>
    %9 = vector.shape_cast %8 : vector<4x4x8x8xbf16> to vector<16x8x8xbf16>
    "tpu.trace_start"() <{level = 10 : i32, message = "bnd,bmd->bnm"}> : () -> ()
    %cst_11 = arith.constant dense<0.000000e+00> : vector<16x8x8xf32>
    %10 = tpu.matmul %5, %7, %cst_11 {dimension_numbers = #tpu.dot_dimension_numbers<[2], [2], [1], [1], [0, 0, 0, 1, 1, 1], [0], [0]>} : vector<16x8x8xbf16>, vector<16x8x8xbf16>, vector<16x8x8xf32> -> vector<16x8x8xf32>
    "tpu.trace_stop"() : () -> ()
    %11 = tpu.iota {dimensions = array<i32: 2>} : vector<16x8x8xi32>
    %c5_i32 = arith.constant 5 : i32
    %12 = vector.broadcast %c5_i32 : i32 to vector<16x8x8xi32>
    %13 = arith.cmpi slt, %11, %12 : vector<16x8x8xi32>
    %cst_12 = arith.constant -1.000000e+30 : f32
    %14 = vector.broadcast %cst_12 : f32 to vector<16x8x8xf32>
    %15 = arith.select %13, %10, %14 : vector<16x8x8xi1>, vector<16x8x8xf32>
    %cst_13 = arith.constant dense<0xFF800000> : vector<16x8xf32>
    %16 = vector.multi_reduction <maximumf>, %15, %cst_13 [2] : vector<16x8x8xf32> to vector<16x8xf32>
    %17 = vector.shape_cast %16 : vector<16x8xf32> to vector<16x8x1xf32>
    %18 = vector.broadcast %17 : vector<16x8x1xf32> to vector<16x8x8xf32>
    %19 = arith.subf %15, %18 : vector<16x8x8xf32>
    %20 = math.exp %19 : vector<16x8x8xf32>
    %cst_14 = arith.constant dense<0.000000e+00> : vector<16x8xf32>
    %21 = vector.multi_reduction <add>, %20, %cst_14 [2] : vector<16x8x8xf32> to vector<16x8xf32>
    %22 = vector.shape_cast %21 : vector<16x8xf32> to vector<16x8x1xf32>
    %23 = tpu.reciprocal %22 {approx = true} : vector<16x8x1xf32> -> vector<16x8x1xf32>
    %24 = vector.broadcast %23 : vector<16x8x1xf32> to vector<16x8x8xf32>
    %25 = arith.mulf %20, %24 : vector<16x8x8xf32>
    %26 = arith.truncf %25 : vector<16x8x8xf32> to vector<16x8x8xbf16>
    "tpu.trace_start"() <{level = 10 : i32, message = "bnm,bmd->bnd"}> : () -> ()
    %cst_15 = arith.constant dense<0.000000e+00> : vector<16x8x8xf32>
    %27 = tpu.matmul %26, %9, %cst_15 {dimension_numbers = #tpu.dot_dimension_numbers<[2], [1], [1], [2], [0, 0, 0, 1, 1, 2], [0], [0]>} : vector<16x8x8xbf16>, vector<16x8x8xbf16>, vector<16x8x8xf32> -> vector<16x8x8xf32>
    "tpu.trace_stop"() : () -> ()
    %28 = vector.shape_cast %27 : vector<16x8x8xf32> to vector<4x4x8x8xf32>
    %29 = arith.truncf %28 : vector<4x4x8x8xf32> to vector<4x4x8x8xbf16>
    %c0_16 = arith.constant 0 : index
    %c0_17 = arith.constant 0 : index
    %c0_18 = arith.constant 0 : index
    %c0_19 = arith.constant 0 : index
    %30 = vector.load %arg4[%c0_16, %c0_17, %c0_18, %c0_19] : memref<4x4x8x8xbf16, #tpu.memory_space<vmem>>, vector<4x4x8x8xbf16>
    tpu.vector_store %arg4[%c0_16, %c0_17, %c0_18, %c0_19], %29 {strides = array<i32>} : memref<4x4x8x8xbf16, #tpu.memory_space<vmem>>, vector<4x4x8x8xbf16>,
    return
  }
  func.func @transform_0(%arg0: i32) -> (i32, i32, i32, i32) {
    %c0_i32 = arith.constant 0 : i32
    %c0_i32_0 = arith.constant 0 : i32
    %c0_i32_1 = arith.constant 0 : i32
    %c0_i32_2 = arith.constant 0 : i32
    return %arg0, %c0_i32, %c0_i32_0, %c0_i32_1 : i32, i32, i32, i32
  }
  func.func @transform_1(%arg0: i32) -> (i32, i32, i32, i32) {
    %c0_i32 = arith.constant 0 : i32
    %c0_i32_0 = arith.constant 0 : i32
    %c0_i32_1 = arith.constant 0 : i32
    %c0_i32_2 = arith.constant 0 : i32
    return %arg0, %c0_i32, %c0_i32_0, %c0_i32_1 : i32, i32, i32, i32
  }
  func.func @transform_2(%arg0: i32) -> (i32, i32, i32, i32) {
    %c0_i32 = arith.constant 0 : i32
    %c0_i32_0 = arith.constant 0 : i32
    %c0_i32_1 = arith.constant 0 : i32
    %c0_i32_2 = arith.constant 0 : i32
    return %arg0, %c0_i32, %c0_i32_0, %c0_i32_1 : i32, i32, i32, i32
  }
  func.func @transform_3(%arg0: i32) -> (i32, i32, i32, i32) {
    %c0_i32 = arith.constant 0 : i32
    %c0_i32_0 = arith.constant 0 : i32
    %c0_i32_1 = arith.constant 0 : i32
    %c0_i32_2 = arith.constant 0 : i32
    return %arg0, %c0_i32, %c0_i32_0, %c0_i32_1 : i32, i32, i32, i32
  }
}

module attributes {stable_mosaic.version = 11 : i64} {
  func.func @_matmul_kernel(%arg0: i32, %arg1: i32, %arg2: i32, %arg3: memref<24x128xbf16, #tpu.memory_space<vmem>>, %arg4: memref<128x128xbf16, #tpu.memory_space<vmem>>, %arg5: memref<1x128xf32, #tpu.memory_space<vmem>>, %arg6: memref<24x128xbf16, #tpu.memory_space<vmem>>) attributes {dimension_semantics = [#tpu.dimension_semantics<parallel>, #tpu.dimension_semantics<parallel>, #tpu.dimension_semantics<arbitrary>], iteration_bounds = array<i64: 1, 1, 1>, scalar_prefetch = 0 : i64, scratch_operands = 0 : i64, tpu.core_type = #tpu.core_type<tc>, window_params = [{transform_indices = @transform_0, window_bounds = array<i64: 24, 128>}, {transform_indices = @transform_1, window_bounds = array<i64: 128, 128>}, {transform_indices = @transform_2, window_bounds = array<i64: 1, 128>}, {transform_indices = @transform_3, window_bounds = array<i64: 24, 128>}]} {
    %c0 = arith.constant 0 : index
    %c0_0 = arith.constant 0 : index
    %0 = vector.load %arg3[%c0, %c0_0] : memref<24x128xbf16, #tpu.memory_space<vmem>>, vector<24x128xbf16>
    %c0_1 = arith.constant 0 : index
    %c0_2 = arith.constant 0 : index
    %1 = vector.load %arg4[%c0_1, %c0_2] : memref<128x128xbf16, #tpu.memory_space<vmem>>, vector<128x128xbf16>
    %cst = arith.constant dense<0.000000e+00> : vector<24x128xf32>
    %2 = tpu.matmul %0, %1, %cst {dimension_numbers = #tpu.dot_dimension_numbers<[1], [0], [0], [1], [0, 0, 1, 1], [], []>} : vector<24x128xbf16>, vector<128x128xbf16>, vector<24x128xf32> -> vector<24x128xf32>
    %c0_3 = arith.constant 0 : index
    %c0_4 = arith.constant 0 : index
    %3 = vector.load %arg5[%c0_3, %c0_4] : memref<1x128xf32, #tpu.memory_space<vmem>>, vector<1x128xf32>
    %4 = vector.broadcast %3 : vector<1x128xf32> to vector<24x128xf32>
    %5 = arith.addf %2, %4 : vector<24x128xf32>
    %cst_5 = arith.constant 5.000000e-01 : f32
    %6 = vector.broadcast %cst_5 : f32 to vector<24x128xf32>
    %7 = arith.mulf %6, %5 : vector<24x128xf32>
    %cst_6 = arith.constant 0.707106769 : f32
    %8 = vector.broadcast %cst_6 : f32 to vector<24x128xf32>
    %9 = arith.mulf %5, %8 : vector<24x128xf32>
    %10 = math.absf %9 : vector<24x128xf32>
    %cst_7 = arith.constant 0.327591091 : f32
    %11 = vector.broadcast %cst_7 : f32 to vector<24x128xf32>
    %12 = arith.mulf %11, %10 : vector<24x128xf32>
    %cst_8 = arith.constant 1.000000e+00 : f32
    %13 = vector.broadcast %cst_8 : f32 to vector<24x128xf32>
    %14 = arith.addf %13, %12 : vector<24x128xf32>
    %cst_9 = arith.constant 1.000000e+00 : f32
    %15 = vector.broadcast %cst_9 : f32 to vector<24x128xf32>
    %16 = arith.divf %15, %14 : vector<24x128xf32>
    %cst_10 = arith.constant 1.06140542 : f32
    %17 = vector.broadcast %cst_10 : f32 to vector<24x128xf32>
    %18 = arith.mulf %17, %16 : vector<24x128xf32>
    %cst_11 = arith.constant -1.45315206 : f32
    %19 = vector.broadcast %cst_11 : f32 to vector<24x128xf32>
    %20 = arith.addf %18, %19 : vector<24x128xf32>
    %21 = arith.mulf %20, %16 : vector<24x128xf32>
    %cst_12 = arith.constant 1.42141378 : f32
    %22 = vector.broadcast %cst_12 : f32 to vector<24x128xf32>
    %23 = arith.addf %21, %22 : vector<24x128xf32>
    %24 = arith.mulf %23, %16 : vector<24x128xf32>
    %cst_13 = arith.constant -0.284496725 : f32
    %25 = vector.broadcast %cst_13 : f32 to vector<24x128xf32>
    %26 = arith.addf %24, %25 : vector<24x128xf32>
    %27 = arith.mulf %26, %16 : vector<24x128xf32>
    %cst_14 = arith.constant 0.254829586 : f32
    %28 = vector.broadcast %cst_14 : f32 to vector<24x128xf32>
    %29 = arith.addf %27, %28 : vector<24x128xf32>
    %30 = arith.mulf %29, %16 : vector<24x128xf32>
    %31 = arith.mulf %10, %10 : vector<24x128xf32>
    %cst_15 = arith.constant 0.000000e+00 : f32
    %32 = vector.broadcast %cst_15 : f32 to vector<24x128xf32>
    %33 = arith.subf %32, %31 : vector<24x128xf32>
    %34 = math.exp %33 : vector<24x128xf32>
    %35 = arith.mulf %30, %34 : vector<24x128xf32>
    %cst_16 = arith.constant 1.000000e+00 : f32
    %36 = vector.broadcast %cst_16 : f32 to vector<24x128xf32>
    %37 = arith.subf %36, %35 : vector<24x128xf32>
    %cst_17 = arith.constant 0.000000e+00 : f32
    %38 = vector.broadcast %cst_17 : f32 to vector<24x128xf32>
    %39 = arith.cmpf oge, %9, %38 : vector<24x128xf32>
    %cst_18 = arith.constant 0.000000e+00 : f32
    %40 = vector.broadcast %cst_18 : f32 to vector<24x128xf32>
    %41 = arith.subf %40, %37 : vector<24x128xf32>
    %42 = arith.select %39, %37, %41 : vector<24x128xi1>, vector<24x128xf32>
    %cst_19 = arith.constant 1.000000e+00 : f32
    %43 = vector.broadcast %cst_19 : f32 to vector<24x128xf32>
    %44 = arith.addf %43, %42 : vector<24x128xf32>
    %45 = arith.mulf %7, %44 : vector<24x128xf32>
    %46 = arith.truncf %45 : vector<24x128xf32> to vector<24x128xbf16>
    %c0_20 = arith.constant 0 : index
    %c0_21 = arith.constant 0 : index
    %47 = vector.load %arg6[%c0_20, %c0_21] : memref<24x128xbf16, #tpu.memory_space<vmem>>, vector<24x128xbf16>
    tpu.vector_store %arg6[%c0_20, %c0_21], %46 {strides = array<i32>} : memref<24x128xbf16, #tpu.memory_space<vmem>>, vector<24x128xbf16>,
    return
  }
  func.func @transform_0(%arg0: i32, %arg1: i32, %arg2: i32) -> (i32, i32) {
    %c0_i32 = arith.constant 0 : i32
    return %arg0, %arg2 : i32, i32
  }
  func.func @transform_1(%arg0: i32, %arg1: i32, %arg2: i32) -> (i32, i32) {
    %c0_i32 = arith.constant 0 : i32
    return %arg2, %arg1 : i32, i32
  }
  func.func @transform_2(%arg0: i32, %arg1: i32, %arg2: i32) -> (i32, i32) {
    %c0_i32 = arith.constant 0 : i32
    %c0_i32_0 = arith.constant 0 : i32
    return %c0_i32, %arg1 : i32, i32
  }
  func.func @transform_3(%arg0: i32, %arg1: i32, %arg2: i32) -> (i32, i32) {
    %c0_i32 = arith.constant 0 : i32
    return %arg0, %arg1 : i32, i32
  }
}

module attributes {stable_mosaic.version = 11 : i64} {
  func.func @_matmul_kernel(%arg0: i32, %arg1: i32, %arg2: i32, %arg3: memref<24x128xbf16, #tpu.memory_space<vmem>>, %arg4: memref<128x128xbf16, #tpu.memory_space<vmem>>, %arg5: memref<1x128xf32, #tpu.memory_space<vmem>>, %arg6: memref<24x128xf32, #tpu.memory_space<vmem>>, %arg7: memref<24x128xf32, #tpu.memory_space<vmem>>) attributes {dimension_semantics = [#tpu.dimension_semantics<parallel>, #tpu.dimension_semantics<parallel>, #tpu.dimension_semantics<arbitrary>], iteration_bounds = array<i64: 1, 1, 1>, scalar_prefetch = 0 : i64, scratch_operands = 0 : i64, tpu.core_type = #tpu.core_type<tc>, window_params = [{transform_indices = @transform_0, window_bounds = array<i64: 24, 128>}, {transform_indices = @transform_1, window_bounds = array<i64: 128, 128>}, {transform_indices = @transform_2, window_bounds = array<i64: 1, 128>}, {transform_indices = @transform_3, window_bounds = array<i64: 24, 128>}, {transform_indices = @transform_4, window_bounds = array<i64: 24, 128>}]} {
    %c0 = arith.constant 0 : index
    %c0_0 = arith.constant 0 : index
    %0 = vector.load %arg3[%c0, %c0_0] : memref<24x128xbf16, #tpu.memory_space<vmem>>, vector<24x128xbf16>
    %c0_1 = arith.constant 0 : index
    %c0_2 = arith.constant 0 : index
    %1 = vector.load %arg4[%c0_1, %c0_2] : memref<128x128xbf16, #tpu.memory_space<vmem>>, vector<128x128xbf16>
    %cst = arith.constant dense<0.000000e+00> : vector<24x128xf32>
    %2 = tpu.matmul %0, %1, %cst {dimension_numbers = #tpu.dot_dimension_numbers<[1], [0], [0], [1], [0, 0, 1, 1], [], []>} : vector<24x128xbf16>, vector<128x128xbf16>, vector<24x128xf32> -> vector<24x128xf32>
    %c0_3 = arith.constant 0 : index
    %c0_4 = arith.constant 0 : index
    %3 = vector.load %arg5[%c0_3, %c0_4] : memref<1x128xf32, #tpu.memory_space<vmem>>, vector<1x128xf32>
    %4 = vector.broadcast %3 : vector<1x128xf32> to vector<24x128xf32>
    %5 = arith.addf %2, %4 : vector<24x128xf32>
    %c0_5 = arith.constant 0 : index
    %c0_6 = arith.constant 0 : index
    %6 = vector.load %arg6[%c0_5, %c0_6] : memref<24x128xf32, #tpu.memory_space<vmem>>, vector<24x128xf32>
    %7 = arith.addf %5, %6 : vector<24x128xf32>
    %c0_7 = arith.constant 0 : index
    %c0_8 = arith.constant 0 : index
    %8 = vector.load %arg7[%c0_7, %c0_8] : memref<24x128xf32, #tpu.memory_space<vmem>>, vector<24x128xf32>
    tpu.vector_store %arg7[%c0_7, %c0_8], %7 {strides = array<i32>} : memref<24x128xf32, #tpu.memory_space<vmem>>, vector<24x128xf32>,
    return
  }
  func.func @transform_0(%arg0: i32, %arg1: i32, %arg2: i32) -> (i32, i32) {
    %c0_i32 = arith.constant 0 : i32
    return %arg0, %arg2 : i32, i32
  }
  func.func @transform_1(%arg0: i32, %arg1: i32, %arg2: i32) -> (i32, i32) {
    %c0_i32 = arith.constant 0 : i32
    return %arg2, %arg1 : i32, i32
  }
  func.func @transform_2(%arg0: i32, %arg1: i32, %arg2: i32) -> (i32, i32) {
    %c0_i32 = arith.constant 0 : i32
    %c0_i32_0 = arith.constant 0 : i32
    return %c0_i32, %arg1 : i32, i32
  }
  func.func @transform_3(%arg0: i32, %arg1: i32, %arg2: i32) -> (i32, i32) {
    %c0_i32 = arith.constant 0 : i32
    return %arg0, %arg1 : i32, i32
  }
  func.func @transform_4(%arg0: i32, %arg1: i32, %arg2: i32) -> (i32, i32) {
    %c0_i32 = arith.constant 0 : i32
    return %arg0, %arg1 : i32, i32
  }
}

module attributes {stable_mosaic.version = 11 : i64} {
  func.func @_matmul_kernel(%arg0: i32, %arg1: i32, %arg2: i32, %arg3: memref<8x128xbf16, #tpu.memory_space<vmem>>, %arg4: memref<128x128xbf16, #tpu.memory_space<vmem>>, %arg5: memref<1x128xf32, #tpu.memory_space<vmem>>, %arg6: memref<8x128xf32, #tpu.memory_space<vmem>>) attributes {dimension_semantics = [#tpu.dimension_semantics<parallel>, #tpu.dimension_semantics<parallel>, #tpu.dimension_semantics<arbitrary>], iteration_bounds = array<i64: 1, 1, 1>, scalar_prefetch = 0 : i64, scratch_operands = 0 : i64, tpu.core_type = #tpu.core_type<tc>, window_params = [{transform_indices = @transform_0, window_bounds = array<i64: 8, 128>}, {transform_indices = @transform_1, window_bounds = array<i64: 128, 128>}, {transform_indices = @transform_2, window_bounds = array<i64: 1, 128>}, {transform_indices = @transform_3, window_bounds = array<i64: 8, 128>}]} {
    %c0 = arith.constant 0 : index
    %c0_0 = arith.constant 0 : index
    %0 = vector.load %arg3[%c0, %c0_0] : memref<8x128xbf16, #tpu.memory_space<vmem>>, vector<8x128xbf16>
    %c0_1 = arith.constant 0 : index
    %c0_2 = arith.constant 0 : index
    %1 = vector.load %arg4[%c0_1, %c0_2] : memref<128x128xbf16, #tpu.memory_space<vmem>>, vector<128x128xbf16>
    %cst = arith.constant dense<0.000000e+00> : vector<8x128xf32>
    %2 = tpu.matmul %0, %1, %cst {dimension_numbers = #tpu.dot_dimension_numbers<[1], [0], [0], [1], [0, 0, 1, 1], [], []>} : vector<8x128xbf16>, vector<128x128xbf16>, vector<8x128xf32> -> vector<8x128xf32>
    %c0_3 = arith.constant 0 : index
    %c0_4 = arith.constant 0 : index
    %3 = vector.load %arg5[%c0_3, %c0_4] : memref<1x128xf32, #tpu.memory_space<vmem>>, vector<1x128xf32>
    %4 = vector.broadcast %3 : vector<1x128xf32> to vector<8x128xf32>
    %5 = arith.addf %2, %4 : vector<8x128xf32>
    %c0_5 = arith.constant 0 : index
    %c0_6 = arith.constant 0 : index
    %6 = vector.load %arg6[%c0_5, %c0_6] : memref<8x128xf32, #tpu.memory_space<vmem>>, vector<8x128xf32>
    tpu.vector_store %arg6[%c0_5, %c0_6], %5 {strides = array<i32>} : memref<8x128xf32, #tpu.memory_space<vmem>>, vector<8x128xf32>,
    return
  }
  func.func @transform_0(%arg0: i32, %arg1: i32, %arg2: i32) -> (i32, i32) {
    %c0_i32 = arith.constant 0 : i32
    return %arg0, %arg2 : i32, i32
  }
  func.func @transform_1(%arg0: i32, %arg1: i32, %arg2: i32) -> (i32, i32) {
    %c0_i32 = arith.constant 0 : i32
    return %arg2, %arg1 : i32, i32
  }
  func.func @transform_2(%arg0: i32, %arg1: i32, %arg2: i32) -> (i32, i32) {
    %c0_i32 = arith.constant 0 : i32
    %c0_i32_0 = arith.constant 0 : i32
    return %c0_i32, %arg1 : i32, i32
  }
  func.func @transform_3(%arg0: i32, %arg1: i32, %arg2: i32) -> (i32, i32) {
    %c0_i32 = arith.constant 0 : i32
    return %arg0, %arg1 : i32, i32
  }
}

</mosaic_0001>

<bundles_post_ra>
// kernel: _lambda_.29
= control target key start
LH: loop header
LB: loop body
LE: loop exit
PB: predicated region body
PF: predicated region fallthrough
CT: control target
= control target key end

     0   :  { %vm16_vm0 = vcmask 261120   ;;  %vm70_vm1 = vcmask 257024   ;;  %s129_s0 = inlined_call_operand.vmem [shape: f32[16,32], index: 0, kind: input, shape index: {}]   ;;  %s130_s1 = inlined_call_operand.vmem [shape: f32[1,32], index: 1, kind: input, shape index: {}]   ;;  %s131_s2 = inlined_call_operand.vmem [shape: f32[1,32], index: 2, kind: input, shape index: {}]   ;;  %s132_s3 = inlined_call_operand.vmem [shape: bf16[16,32], index: 3, kind: output, shape index: {}]  }
   0x1   :  { %v14_v0 = vld [vmem:[%s129_s0] sm:$0xff]  ;;  %v15_v1 = vld [vmem:[%s129_s0 + $0x8] sm:$0xff] }
   0x2   :  { %v17_v2 = vsel %vm16_vm0, %v14_v0, 0.0  ;;  %v20_v3 = vsel %vm16_vm0, %v15_v1, 0.0  ;;  %v77_v21 = vld [vmem:[%s130_s1] ss:$0 sm:$0xff] }
   0x3   :  { %18 = vadd.xlane.f32.xlu0 %v17_v2  ;;  %v78_v23 = vld [vmem:[%s131_s2] ss:$0 sm:$0xff] }
   0x7   :  { %21 = vadd.xlane.f32.xlu0 %v20_v3 }
  0x90   :  { %v19_v4 = vpop.xlane.xlu0 %18 }
  0x91   :  { %v24_v5 = vmul.f32 0.03125, %v19_v4 }
  0x93   :  { %v26_v6 = vsub.f32 %v14_v0, %v24_v5 }
  0x94   :  { %v22_v7 = vpop.xlane.xlu0 %21 }
  0x95   :  { %v25_v8 = vmul.f32 0.03125, %v22_v7  ;;  %v28_v9 = vmul.f32 %v26_v6, %v26_v6 }
  0x97   :  { %v27_v10 = vsub.f32 %v15_v1, %v25_v8  ;;  %v30_v11 = vsel %vm16_vm0, %v28_v9, 0.0 }
  0x98   :  { %31 = vadd.xlane.f32.xlu1 %v30_v11 }
  0x99   :  { %v29_v12 = vmul.f32 %v27_v10, %v27_v10 }
  0x9b   :  { %v33_v13 = vsel %vm16_vm0, %v29_v12, 0.0 }
  0x9c   :  { %34 = vadd.xlane.f32.xlu1 %v33_v13 }
 0x125   :  { %v32_v14 = vpop.xlane.xlu1 %31 }
 0x126   :  { %v36_v15 = vmul.f32 0.03125, %v32_v14 }
 0x128   :  { %v38_v16 = vadd.f32 1e-05, %v36_v15 }
 0x129   :  { %v35_v17 = vpop.xlane.xlu1 %34 }
 0x12a   :  { %83 = vrsqrt.f32 %v38_v16  ;;  %v37_v18 = vmul.f32 0.03125, %v35_v17 }
 0x12c   :  { %v39_v19 = vadd.f32 1e-05, %v37_v18 }
 0x12e   :  { %85 = vrsqrt.f32 %v39_v19 }
 0x134   :  { %v84_v20 = vpop.eup %83 }
 0x135   :  { %v42_v22 = vmul.f32 %v84_v20, %v26_v6 }
 0x137   :  { %v51_v24 = vmul.f32 %v77_v21, %v42_v22 }
 0x138   :  { %v86_v25 = vpop.eup %85 }
 0x139   :  { %v60_v26 = vadd.f32 %v78_v23, %v51_v24  ;;  %v43_v27 = vmul.f32 %v86_v25, %v27_v10 }
 0x13b   :  { %v81_v28 = vpack.c.bf16 %v60_v26, %v60_v26  ;;  %v52_v29 = vmul.f32 %v77_v21, %v43_v27 }
 0x13d   :  { %71 = vst.msk [vmem:[%s132_s3] sm:$0xf] %vm70_vm1, %v81_v28  ;;  %v61_v30 = vadd.f32 %v78_v23, %v52_v29 }
 0x13f   :  { %v82_v31 = vpack.c.bf16 %v61_v30, %v61_v30 }
 0x141   :  { %72 = vst.msk [vmem:[%s132_s3 + $0x4] sm:$0xf] %vm70_vm1, %v82_v31 }

// kernel: _lambda_.28
= control target key start
LH: loop header
LB: loop body
LE: loop exit
PB: predicated region body
PF: predicated region fallthrough
CT: control target
= control target key end

     0   :  { %s352_s1 = inlined_call_operand.vmem [shape: bf16[256,128], index: 1, kind: input, shape index: {}]   ;;  %s353_s0 = inlined_call_operand.vmem [shape: bf16[16,256], index: 0, kind: input, shape index: {}]   ;;  %s354_s2 = inlined_call_operand.vmem [shape: f32[1,128], index: 2, kind: input, shape index: {}]   ;;  %s355_s3 = inlined_call_operand.vmem [shape: f32[16,128], index: 3, kind: output, shape index: {}]  }
   0x1   :  { %v250_v0 = vld [vmem:[%s352_s1 + $0x40] sm:$0xff]   ;;  %v252_v2 = vld [vmem:[%s352_s1 + $0x48] sm:$0xff]   ;;  %v254_v4 = vld [vmem:[%s352_s1 + $0x50] sm:$0xff]  }
   0x2   :  { %v251_v1 = vld [vmem:[%s352_s1] sm:$0xff]   ;;  %228 = vmatprep.subr.bf16.mxu0 %v250_v0  ;;  %v253_v3 = vld [vmem:[%s352_s1 + $0x8] sm:$0xff]   ;;  %v255_v5 = vld [vmem:[%s352_s1 + $0x10] sm:$0xff]  }
   0x3   :  { %229 = vmatpush3.bf16.msra.mxu0 %v251_v1  ;;  %v256_v6 = vld [vmem:[%s352_s1 + $0x58] sm:$0xff]   ;;  %v258_v8 = vld [vmem:[%s352_s1 + $0x60] sm:$0xff]   ;;  %v260_v10 = vld [vmem:[%s352_s1 + $0x68] sm:$0xff]  }
   0x4   :  { %230 = vmatprep.subr.bf16.mxu0 %v252_v2  ;;  %v257_v7 = vld [vmem:[%s352_s1 + $0x18] sm:$0xff]   ;;  %v259_v9 = vld [vmem:[%s352_s1 + $0x20] sm:$0xff]   ;;  %v261_v12 = vld [vmem:[%s352_s1 + $0x28] sm:$0xff]  }
   0x5   :  { %v268_v11 = vld [vmem:[%s353_s0 + $0x4] ss:$8 sps:$4 sm:$0xff]   ;;  %v262_v13 = vld [vmem:[%s352_s1 + $0x70] sm:$0xff]   ;;  %v264_v15 = vld [vmem:[%s352_s1 + $0x78] sm:$0xff]  }
   0x6   :  { %194 = vmatprep.mubr.bf16.mxu0 %v268_v11  ;;  %v263_v14 = vld [vmem:[%s352_s1 + $0x30] sm:$0xff]   ;;  %v265_v16 = vld [vmem:[%s352_s1 + $0x38] sm:$0xff]   ;;  %v266_v17 = vld [vmem:[%s353_s0] ss:$8 sps:$4 sm:$0xff]  }
   0x7   :  { %231 = vmatpush3.bf16.msra.mxu0 %v253_v3  ;;  %v209_v19 = vld [vmem:[%s354_s2] ss:$0 sm:$0xff] }
   0x8   :  { %232 = vmatprep.subr.bf16.mxu0 %v254_v4 }
   0xb   :  { %233 = vmatpush3.bf16.msra.mxu0 %v255_v5 }
   0xc   :  { %234 = vmatprep.subr.bf16.mxu0 %v256_v6 }
   0xf   :  { %235 = vmatpush3.bf16.msra.mxu0 %v257_v7 }
  0x10   :  { %236 = vmatprep.subr.bf16.mxu0 %v258_v8 }
  0x13   :  { %237 = vmatpush3.bf16.msra.mxu0 %v259_v9 }
  0x14   :  { %238 = vmatprep.subr.bf16.mxu0 %v260_v10 }
  0x17   :  { %239 = vmatpush3.bf16.msra.mxu0 %v261_v12 }
  0x18   :  { %240 = vmatprep.subr.bf16.mxu0 %v262_v13 }
  0x1b   :  { %241 = vmatpush3.bf16.msra.mxu0 %v263_v14 }
  0x1c   :  { %242 = vmatprep.subr.bf16.mxu0 %v264_v15 }
  0x1f   :  { %243 = vmatpush3.bf16.msra.mxu0 %v265_v16 }
  0x22   :  { %195 = vmatmul.mubr.bf16.vlgmr.msra.gmra.mrb[0].mxu0 %v266_v17 }
  0xf5   :  { %v244_v18 = vpop.f32.mrb[0].mxu0 }
  0xf6   :  { %v245_v20 = vpop.f32.mrb[1].mxu0 }
  0xf7   :  { %v246_v21 = vadd.f32 %v245_v20, %v244_v18  ;;  %v247_v22 = vpop.f32.mrb[2].mxu0 }
  0xf8   :  { %v248_v23 = vpop.f32.mrb[3].mxu0 }
  0xf9   :  { %v197_v24 = vadd.f32 %v246_v21, %v209_v19  ;;  %v249_v25 = vadd.f32 %v248_v23, %v247_v22 }
  0xfb   :  { %203 = vst [vmem:[%s355_s3] sm:$0xff] %v197_v24  ;;  %v200_v26 = vadd.f32 %v249_v25, %v209_v19 }
  0xfd   :  { %204 = vst [vmem:[%s355_s3 + $0x8] sm:$0xff] %v200_v26 }

// kernel: _lambda_.30
= control target key start
LH: loop header
LB: loop body
LE: loop exit
PB: predicated region body
PF: predicated region fallthrough
CT: control target
= control target key end

     0   :  { %v208_v0 = vmov 0.0   ;;  %vm209_vm0 = vmmov 0   ;;  %s263_s1 = inlined_call_operand.vmem [shape: bf16[128,128], index: 1, kind: input, shape index: {}]   ;;  %s264_s0 = inlined_call_operand.vmem [shape: bf16[16,128], index: 0, kind: input, shape index: {}]   ;;  %s265_s2 = inlined_call_operand.vmem [shape: f32[1,128], index: 2, kind: input, shape index: {}]   ;;  %s266_s3 = inlined_call_operand.vmem [shape: bf16[16,128], index: 3, kind: output, shape index: {}]  }
   0x1   :  { %177 = vmatprep.subr.bf16.mxu0 %v208_v0  ;;  %v199_v1 = vld [vmem:[%s263_s1] sm:$0xff]   ;;  %193 = vmatprep.mubr.msk.bf16.mxu0 %vm209_vm0, %v208_v0  ;;  %v200_v2 = vld [vmem:[%s263_s1 + $0x8] sm:$0xff]   ;;  %v201_v3 = vld [vmem:[%s263_s1 + $0x10] sm:$0xff]  }
   0x2   :  { %178 = vmatpush3.bf16.msra.mxu0 %v199_v1  ;;  %v202_v4 = vld [vmem:[%s263_s1 + $0x18] sm:$0xff]   ;;  %v203_v5 = vld [vmem:[%s263_s1 + $0x20] sm:$0xff]   ;;  %v204_v6 = vld [vmem:[%s263_s1 + $0x28] sm:$0xff]  }
   0x3   :  { %179 = vmatprep.subr.bf16.mxu0 %v208_v0  ;;  %v205_v7 = vld [vmem:[%s263_s1 + $0x30] sm:$0xff]   ;;  %v206_v8 = vld [vmem:[%s263_s1 + $0x38] sm:$0xff]   ;;  %v207_v9 = vld [vmem:[%s264_s0] sm:$0xff]  }
   0x4   :  { %v149_v10 = vld [vmem:[%s265_s2] ss:$0 sm:$0xff] }
   0x6   :  { %180 = vmatpush3.bf16.msra.mxu0 %v200_v2 }
   0x7   :  { %181 = vmatprep.subr.bf16.mxu0 %v208_v0 }
   0xa   :  { %182 = vmatpush3.bf16.msra.mxu0 %v201_v3 }
   0xb   :  { %183 = vmatprep.subr.bf16.mxu0 %v208_v0 }
   0xe   :  { %184 = vmatpush3.bf16.msra.mxu0 %v202_v4 }
   0xf   :  { %185 = vmatprep.subr.bf16.mxu0 %v208_v0 }
  0x12   :  { %186 = vmatpush3.bf16.msra.mxu0 %v203_v5 }
  0x13   :  { %187 = vmatprep.subr.bf16.mxu0 %v208_v0 }
  0x16   :  { %188 = vmatpush3.bf16.msra.mxu0 %v204_v6 }
  0x17   :  { %189 = vmatprep.subr.bf16.mxu0 %v208_v0 }
  0x1a   :  { %190 = vmatpush3.bf16.msra.mxu0 %v205_v7 }
  0x1b   :  { %191 = vmatprep.subr.bf16.mxu0 %v208_v0 }
  0x1e   :  { %192 = vmatpush3.bf16.msra.mxu0 %v206_v8 }
  0x21   :  { %194 = vmatmul.mubr.bf16.vlgmr.msra.gmra.mrb[0].mxu0 %v207_v9 }
  0xf4   :  { %v128_v11 = vpop.f32.mrb[0].mxu0 }
  0xf5   :  { %v195_v12 = vpop.f32.mrb[1].mxu0  ;;  %v129_v14 = vadd.f32 %v149_v10, %v128_v11 }
  0xf6   :  { %v131_v13 = vpop.f32.mrb[2].mxu0 }
  0xf7   :  { %v132_v15 = vadd.f32 %v149_v10, %v131_v13  ;;  %v196_v16 = vpop.f32.mrb[3].mxu0 }
  0xf9   :  { %v166_v17 = vpack.c.bf16 %v132_v15, %v129_v14 }
  0xfb   :  { %167 = vst [vmem:[%s266_s3] sm:$0xff] %v166_v17  }

// kernel: _lambda_.33
= control target key start
LH: loop header
LB: loop body
LE: loop exit
PB: predicated region body
PF: predicated region fallthrough
CT: control target
= control target key end

     0   :  { %v198_v0 = vmov 0.0   ;;  %vm199_vm0 = vmmov 0   ;;  %s267_s1 = inlined_call_operand.vmem [shape: bf16[128,128], index: 1, kind: input, shape index: {}]   ;;  %s268_s0 = inlined_call_operand.vmem [shape: bf16[16,128], index: 0, kind: input, shape index: {}]   ;;  %s269_s2 = inlined_call_operand.vmem [shape: f32[1,128], index: 2, kind: input, shape index: {}]   ;;  %s270_s3 = inlined_call_operand.vmem [shape: f32[16,128], index: 3, kind: input, shape index: {}]   ;;  %s271_s4 = inlined_call_operand.vmem [shape: f32[16,128], index: 4, kind: output, shape index: {}]  }
   0x1   :  { %167 = vmatprep.subr.bf16.mxu0 %v198_v0  ;;  %v189_v1 = vld [vmem:[%s267_s1] sm:$0xff]   ;;  %183 = vmatprep.mubr.msk.bf16.mxu0 %vm199_vm0, %v198_v0  ;;  %v190_v2 = vld [vmem:[%s267_s1 + $0x8] sm:$0xff]   ;;  %v191_v3 = vld [vmem:[%s267_s1 + $0x10] sm:$0xff]  }
   0x2   :  { %168 = vmatpush3.bf16.msra.mxu0 %v189_v1  ;;  %v192_v4 = vld [vmem:[%s267_s1 + $0x18] sm:$0xff]   ;;  %v193_v5 = vld [vmem:[%s267_s1 + $0x20] sm:$0xff]   ;;  %v194_v6 = vld [vmem:[%s267_s1 + $0x28] sm:$0xff]  }
   0x3   :  { %169 = vmatprep.subr.bf16.mxu0 %v198_v0  ;;  %v195_v7 = vld [vmem:[%s267_s1 + $0x30] sm:$0xff]   ;;  %v196_v8 = vld [vmem:[%s267_s1 + $0x38] sm:$0xff]   ;;  %v197_v9 = vld [vmem:[%s268_s0] sm:$0xff]  }
   0x4   :  { %v148_v10 = vld [vmem:[%s269_s2] ss:$0 sm:$0xff]  ;;  %v139_v16 = vld [vmem:[%s270_s3 + $0x8] sm:$0xff] }
   0x5   :  { %v138_v12 = vld [vmem:[%s270_s3] sm:$0xff] }
   0x6   :  { %170 = vmatpush3.bf16.msra.mxu0 %v190_v2 }
   0x7   :  { %171 = vmatprep.subr.bf16.mxu0 %v198_v0 }
   0xa   :  { %172 = vmatpush3.bf16.msra.mxu0 %v191_v3 }
   0xb   :  { %173 = vmatprep.subr.bf16.mxu0 %v198_v0 }
   0xe   :  { %174 = vmatpush3.bf16.msra.mxu0 %v192_v4 }
   0xf   :  { %175 = vmatprep.subr.bf16.mxu0 %v198_v0 }
  0x12   :  { %176 = vmatpush3.bf16.msra.mxu0 %v193_v5 }
  0x13   :  { %177 = vmatprep.subr.bf16.mxu0 %v198_v0 }
  0x16   :  { %178 = vmatpush3.bf16.msra.mxu0 %v194_v6 }
  0x17   :  { %179 = vmatprep.subr.bf16.mxu0 %v198_v0 }
  0x1a   :  { %180 = vmatpush3.bf16.msra.mxu0 %v195_v7 }
  0x1b   :  { %181 = vmatprep.subr.bf16.mxu0 %v198_v0 }
  0x1e   :  { %182 = vmatpush3.bf16.msra.mxu0 %v196_v8 }
  0x21   :  { %184 = vmatmul.mubr.bf16.vlgmr.msra.gmra.mrb[0].mxu0 %v197_v9 }
  0xf4   :  { %v131_v11 = vpop.f32.mrb[0].mxu0 }
  0xf5   :  { %v132_v13 = vadd.f32 %v148_v10, %v131_v11  ;;  %v185_v14 = vpop.f32.mrb[1].mxu0 }
  0xf6   :  { %v134_v15 = vpop.f32.mrb[2].mxu0 }
  0xf7   :  { %v140_v17 = vadd.f32 %v138_v12, %v132_v13  ;;  %v135_v18 = vadd.f32 %v148_v10, %v134_v15  ;;  %v186_v19 = vpop.f32.mrb[3].mxu0 }
  0xf9   :  { %142 = vst [vmem:[%s271_s4] sm:$0xff] %v140_v17  ;;  %v141_v20 = vadd.f32 %v139_v16, %v135_v18 }
  0xfb   :  { %143 = vst [vmem:[%s271_s4 + $0x8] sm:$0xff] %v141_v20 }

// kernel: _lambda_.34
= control target key start
LH: loop header
LB: loop body
LE: loop exit
PB: predicated region body
PF: predicated region fallthrough
CT: control target
= control target key end

     0   :  { %vm17_vm0 = vcmask 261120   ;;  %vm91_vm1 = vcmask 257024   ;;  %s163_s0 = inlined_call_operand.vmem [shape: f32[24,32], index: 0, kind: input, shape index: {}]   ;;  %s164_s1 = inlined_call_operand.vmem [shape: f32[1,32], index: 1, kind: input, shape index: {}]   ;;  %s165_s2 = inlined_call_operand.vmem [shape: f32[1,32], index: 2, kind: input, shape index: {}]   ;;  %s166_s3 = inlined_call_operand.vmem [shape: bf16[24,32], index: 3, kind: output, shape index: {}]  }
   0x1   :  { %v14_v0 = vld [vmem:[%s163_s0] sm:$0xff]  ;;  %v16_v1 = vld [vmem:[%s163_s0 + $0x10] sm:$0xff]  ;;  %v15_v2 = vld [vmem:[%s163_s0 + $0x8] sm:$0xff] }
   0x2   :  { %v18_v3 = vsel %vm17_vm0, %v14_v0, 0.0  ;;  %v24_v4 = vsel %vm17_vm0, %v16_v1, 0.0  ;;  %v21_v5 = vsel %vm17_vm0, %v15_v2, 0.0  ;;  %v99_v31 = vld [vmem:[%s164_s1] ss:$0 sm:$0xff] }
   0x3   :  { %19 = vadd.xlane.f32.xlu0 %v18_v3  ;;  %25 = vadd.xlane.f32.xlu1 %v24_v4  ;;  %v100_v33 = vld [vmem:[%s165_s2] ss:$0 sm:$0xff] }
   0x7   :  { %22 = vadd.xlane.f32.xlu0 %v21_v5 }
  0x90   :  { %v20_v6 = vpop.xlane.xlu0 %19  ;;  %v26_v7 = vpop.xlane.xlu1 %25 }
  0x91   :  { %v28_v8 = vmul.f32 0.03125, %v20_v6  ;;  %v30_v9 = vmul.f32 0.03125, %v26_v7 }
  0x93   :  { %v31_v10 = vsub.f32 %v14_v0, %v28_v8  ;;  %v33_v11 = vsub.f32 %v16_v1, %v30_v9 }
  0x94   :  { %v23_v12 = vpop.xlane.xlu0 %22 }
  0x95   :  { %v29_v13 = vmul.f32 0.03125, %v23_v12  ;;  %v34_v14 = vmul.f32 %v31_v10, %v31_v10  ;;  %v36_v15 = vmul.f32 %v33_v11, %v33_v11 }
  0x97   :  { %v32_v16 = vsub.f32 %v15_v2, %v29_v13  ;;  %v37_v17 = vsel %vm17_vm0, %v34_v14, 0.0  ;;  %v43_v18 = vsel %vm17_vm0, %v36_v15, 0.0 }
  0x98   :  { %38 = vadd.xlane.f32.xlu1 %v37_v17 }
  0x99   :  { %v35_v19 = vmul.f32 %v32_v16, %v32_v16 }
  0x9b   :  { %v40_v20 = vsel %vm17_vm0, %v35_v19, 0.0 }
  0x9c   :  { %44 = vadd.xlane.f32.xlu1 %v43_v18  ;;  %41 = vadd.xlane.f32.xlu0 %v40_v20 }
 0x125   :  { %v39_v21 = vpop.xlane.xlu1 %38 }
 0x126   :  { %v46_v22 = vmul.f32 0.03125, %v39_v21 }
 0x128   :  { %v49_v23 = vadd.f32 1e-05, %v46_v22 }
 0x129   :  { %v45_v24 = vpop.xlane.xlu1 %44  ;;  %v42_v25 = vpop.xlane.xlu0 %41 }
 0x12a   :  { %107 = vrsqrt.f32 %v49_v23  ;;  %v48_v26 = vmul.f32 0.03125, %v45_v24  ;;  %v47_v27 = vmul.f32 0.03125, %v42_v25 }
 0x12c   :  { %v51_v28 = vadd.f32 1e-05, %v48_v26  ;;  %v50_v29 = vadd.f32 1e-05, %v47_v27 }
 0x12e   :  { %109 = vrsqrt.f32 %v51_v28 }
 0x12f   :  { %111 = vrsqrt.f32 %v50_v29 }
 0x134   :  { %v108_v30 = vpop.eup %107 }
 0x135   :  { %v55_v32 = vmul.f32 %v108_v30, %v31_v10 }
 0x137   :  { %v65_v34 = vmul.f32 %v99_v31, %v55_v32 }
 0x138   :  { %v110_v35 = vpop.eup %109 }
 0x139   :  { %v112_v36 = vpop.eup %111  ;;  %v75_v37 = vadd.f32 %v100_v33, %v65_v34  ;;  %v57_v38 = vmul.f32 %v110_v35, %v33_v11 }
 0x13a   :  { %v56_v39 = vmul.f32 %v112_v36, %v32_v16 }
 0x13b   :  { %v104_v40 = vpack.c.bf16 %v75_v37, %v75_v37  ;;  %v67_v41 = vmul.f32 %v99_v31, %v57_v38 }
 0x13c   :  { %v66_v42 = vmul.f32 %v99_v31, %v56_v39 }
 0x13d   :  { %92 = vst.msk [vmem:[%s166_s3] sm:$0xf] %vm91_vm1, %v104_v40  ;;  %v77_v43 = vadd.f32 %v100_v33, %v67_v41 }
 0x13e   :  { %v76_v44 = vadd.f32 %v100_v33, %v66_v42 }
 0x13f   :  { %v106_v45 = vpack.c.bf16 %v77_v43, %v77_v43 }
 0x140   :  { %v105_v46 = vpack.c.bf16 %v76_v44, %v76_v44 }
 0x141   :  { %94 = vst.msk [vmem:[%s166_s3 + $0x8] sm:$0xf] %vm91_vm1, %v106_v45 }
 0x142   :  { %93 = vst.msk [vmem:[%s166_s3 + $0x4] sm:$0xf] %vm91_vm1, %v105_v46 }

// kernel: _lambda_.35
= control target key start
LH: loop header
LB: loop body
LE: loop exit
PB: predicated region body
PF: predicated region fallthrough
CT: control target
= control target key end

     0   :  { %s288_s1 = inlined_call_operand.vmem [shape: bf16[128,128], index: 1, kind: input, shape index: {}]   ;;  %s289_s0 = inlined_call_operand.vmem [shape: bf16[24,128], index: 0, kind: input, shape index: {}]   ;;  %s290_s2 = inlined_call_operand.vmem [shape: f32[1,128], index: 2, kind: input, shape index: {}]   ;;  %s291_s3 = inlined_call_operand.vmem [shape: bf16[24,128], index: 3, kind: output, shape index: {}]  }
   0x1   :  { %v219_v0 = vld [vmem:[%s288_s1] sm:$0xff]   ;;  %v220_v1 = vld [vmem:[%s288_s1 + $0x8] sm:$0xff]   ;;  %v221_v2 = vld [vmem:[%s288_s1 + $0x10] sm:$0xff]  }
   0x2   :  { %199 = vmatprep.subr.bf16.mxu0 %v219_v0  ;;  %v222_v3 = vld [vmem:[%s288_s1 + $0x18] sm:$0xff]   ;;  %v227_v4 = vld [vmem:[%s289_s0] sm:$0xff]   ;;  %v224_v6 = vld [vmem:[%s288_s1 + $0x28] sm:$0xff]  }
   0x3   :  { %200 = vmatpush3.bf16.msra.mxu0 %v219_v0  ;;  %215 = vmatprep.mubr.bf16.mxu0 %v227_v4  ;;  %v223_v5 = vld [vmem:[%s288_s1 + $0x20] sm:$0xff]   ;;  %v225_v7 = vld [vmem:[%s288_s1 + $0x30] sm:$0xff]   ;;  %v226_v8 = vld [vmem:[%s288_s1 + $0x38] sm:$0xff]  }
   0x4   :  { %201 = vmatprep.subr.bf16.mxu0 %v220_v1  ;;  %v228_v9 = vld [vmem:[%s289_s0 + $0x8] ss:$0 sps:$4 sm:$0xff]   ;;  %v167_v10 = vld [vmem:[%s290_s2] ss:$0 sm:$0xff] }
   0x7   :  { %202 = vmatpush3.bf16.msra.mxu0 %v220_v1 }
   0x8   :  { %203 = vmatprep.subr.bf16.mxu0 %v221_v2 }
   0xb   :  { %204 = vmatpush3.bf16.msra.mxu0 %v221_v2 }
   0xc   :  { %205 = vmatprep.subr.bf16.mxu0 %v222_v3 }
   0xf   :  { %206 = vmatpush3.bf16.msra.mxu0 %v222_v3 }
  0x10   :  { %207 = vmatprep.subr.bf16.mxu0 %v223_v5 }
  0x13   :  { %208 = vmatpush3.bf16.msra.mxu0 %v223_v5 }
  0x14   :  { %209 = vmatprep.subr.bf16.mxu0 %v224_v6 }
  0x17   :  { %210 = vmatpush3.bf16.msra.mxu0 %v224_v6 }
  0x18   :  { %211 = vmatprep.subr.bf16.mxu0 %v225_v7 }
  0x1b   :  { %212 = vmatpush3.bf16.msra.mxu0 %v225_v7 }
  0x1c   :  { %213 = vmatprep.subr.bf16.mxu0 %v226_v8 }
  0x1f   :  { %214 = vmatpush3.bf16.msra.mxu0 %v226_v8 }
  0x22   :  { %216 = vmatmul.mubr.bf16.vlgmr.msra.gmra.mrb[0].mxu0 %v228_v9 }
  0xf5   :  { %v217_v11 = vpop.f32.mrb[0].mxu0 }
  0xf6   :  { %v142_v12 = vadd.f32 %v217_v11, %v167_v10  ;;  %v133_v13 = vpop.f32.mrb[1].mxu0 }
  0xf7   :  { %v218_v14 = vpop.f32.mrb[2].mxu0  ;;  %v134_v17 = vadd.f32 %v167_v10, %v133_v13 }
  0xf8   :  { %v183_v15 = vpack.c.bf16 %v142_v12, %v142_v12  ;;  %v136_v16 = vpop.f32.mrb[3].mxu0 }
  0xf9   :  { %v137_v18 = vadd.f32 %v167_v10, %v136_v16 }
  0xfa   :  { %162 = vst [vmem:[%s291_s3 + $0x8] sm:$0xf] %v183_v15 }
  0xfb   :  { %v187_v19 = vpack.c.bf16 %v137_v18, %v134_v17 }
  0xfd   :  { %188 = vst [vmem:[%s291_s3] sm:$0xff] %v187_v19  }

// kernel: _lambda_.39
= control target key start
LH: loop header
LB: loop body
LE: loop exit
PB: predicated region body
PF: predicated region fallthrough
CT: control target
= control target key end

     0   :  { %s405_s1 = inlined_call_operand.vmem [shape: bf16[128,128], index: 1, kind: input, shape index: {}]   ;;  %s406_s0 = inlined_call_operand.vmem [shape: bf16[24,128], index: 0, kind: input, shape index: {}]   ;;  %s407_s2 = inlined_call_operand.vmem [shape: f32[1,128], index: 2, kind: input, shape index: {}]   ;;  %s408_s3 = inlined_call_operand.vmem [shape: bf16[24,128], index: 3, kind: output, shape index: {}]  }
   0x1   :  { %v300_v0 = vld [vmem:[%s405_s1] sm:$0xff]   ;;  %v301_v1 = vld [vmem:[%s405_s1 + $0x8] sm:$0xff]   ;;  %v302_v2 = vld [vmem:[%s405_s1 + $0x10] sm:$0xff]  }
   0x2   :  { %280 = vmatprep.subr.bf16.mxu0 %v300_v0  ;;  %v303_v3 = vld [vmem:[%s405_s1 + $0x18] sm:$0xff]   ;;  %v308_v4 = vld [vmem:[%s406_s0] sm:$0xff]   ;;  %v305_v6 = vld [vmem:[%s405_s1 + $0x28] sm:$0xff]  }
   0x3   :  { %281 = vmatpush3.bf16.msra.mxu0 %v300_v0  ;;  %296 = vmatprep.mubr.bf16.mxu0 %v308_v4  ;;  %v304_v5 = vld [vmem:[%s405_s1 + $0x20] sm:$0xff]   ;;  %v306_v7 = vld [vmem:[%s405_s1 + $0x30] sm:$0xff]   ;;  %v307_v8 = vld [vmem:[%s405_s1 + $0x38] sm:$0xff]  }
   0x4   :  { %282 = vmatprep.subr.bf16.mxu0 %v301_v1  ;;  %v309_v9 = vld [vmem:[%s406_s0 + $0x8] ss:$0 sps:$4 sm:$0xff]   ;;  %v248_v10 = vld [vmem:[%s407_s2] ss:$0 sm:$0xff] }
   0x7   :  { %283 = vmatpush3.bf16.msra.mxu0 %v301_v1 }
   0x8   :  { %284 = vmatprep.subr.bf16.mxu0 %v302_v2 }
   0xb   :  { %285 = vmatpush3.bf16.msra.mxu0 %v302_v2 }
   0xc   :  { %286 = vmatprep.subr.bf16.mxu0 %v303_v3 }
   0xf   :  { %287 = vmatpush3.bf16.msra.mxu0 %v303_v3 }
  0x10   :  { %288 = vmatprep.subr.bf16.mxu0 %v304_v5 }
  0x13   :  { %289 = vmatpush3.bf16.msra.mxu0 %v304_v5 }
  0x14   :  { %290 = vmatprep.subr.bf16.mxu0 %v305_v6 }
  0x17   :  { %291 = vmatpush3.bf16.msra.mxu0 %v305_v6 }
  0x18   :  { %292 = vmatprep.subr.bf16.mxu0 %v306_v7 }
  0x1b   :  { %293 = vmatpush3.bf16.msra.mxu0 %v306_v7 }
  0x1c   :  { %294 = vmatprep.subr.bf16.mxu0 %v307_v8 }
  0x1f   :  { %295 = vmatpush3.bf16.msra.mxu0 %v307_v8 }
  0x22   :  { %297 = vmatmul.mubr.bf16.vlgmr.msra.gmra.mrb[0].mxu0 %v309_v9 }
  0xf5   :  { %v298_v11 = vpop.f32.mrb[0].mxu0 }
  0xf6   :  { %v375_v12 = vadd.f32 %v298_v11, %v248_v10  ;;  %v133_v13 = vpop.f32.mrb[1].mxu0 }
  0xf7   :  { %v377_v14 = vadd.f32 %v248_v10, %v133_v13  ;;  %v299_v15 = vpop.f32.mrb[2].mxu0 }
  0xf8   :  { %v380_v16 = vmul.f32 0.70710677, %v375_v12  ;;  %v136_v17 = vpop.f32.mrb[3].mxu0 }
  0xf9   :  { %v383_v18 = vmul.f32 0.70710677, %v377_v14  ;;  %v385_v19 = vadd.f32 %v248_v10, %v136_v17 }
  0xfa   :  { %v155_v20 = vand.u32 2147483647, %v380_v16  ;;  %vm215_vm0 = vcmp.ge.f32.partialorder %v380_v16, 0.0 }
  0xfb   :  { %v153_v21 = vand.u32 2147483647, %v383_v18  ;;  %v390_v22 = vmul.f32 0.70710677, %v385_v19  ;;  %vm213_vm1 = vcmp.ge.f32.partialorder %v383_v18, 0.0  ;;  %v148_v16 = vmul.f32 0.5, %v385_v19 }
  0xfc   :  { %v158_v23 = vmul.f32 0.3275911, %v155_v20  ;;  %v197_v30 = vmul.f32 %v155_v20, %v155_v20 }
  0xfd   :  { %v156_v24 = vmul.f32 0.3275911, %v153_v21  ;;  %v154_v25 = vand.u32 2147483647, %v390_v22  ;;  %v195_v31 = vmul.f32 %v153_v21, %v153_v21  ;;  %vm214_vm2 = vcmp.ge.f32.partialorder %v390_v22, 0.0 }
  0xfe   :  { %v161_v26 = vadd.f32 1.0, %v158_v23  ;;  %v200_v33 = vsub.f32 0.0, %v197_v30  ;;  %v149_v23 = vmul.f32 0.5, %v375_v12 }
  0xff   :  { %v159_v27 = vadd.f32 1.0, %v156_v24  ;;  %v157_v28 = vmul.f32 0.3275911, %v154_v25  ;;  %v196_v34 = vmul.f32 %v154_v25, %v154_v25  ;;  %v198_v37 = vsub.f32 0.0, %v195_v31 }
 0x100   :  { %310 = vrcp.f32 %v161_v26  ;;  %v205_v41 = vmul.f32 1.442695, %v200_v33  ;;  %v147_v31 = vmul.f32 0.5, %v377_v14 }
 0x101   :  { %312 = vrcp.f32 %v159_v27  ;;  %v160_v29 = vadd.f32 1.0, %v157_v28  ;;  %v199_v43 = vsub.f32 0.0, %v196_v34  ;;  %v201_v45 = vmul.f32 1.442695, %v198_v37 }
 0x103   :  { %314 = vrcp.f32 %v160_v29  ;;  %v203_v51 = vmul.f32 1.442695, %v199_v43 }
 0x104   :  { %316 = vpow2.f32 %v205_v41 }
 0x105   :  { %318 = vpow2.f32 %v201_v45 }
 0x106   :  { %320 = vpow2.f32 %v203_v51 }
 0x10a   :  { %v311_v32 = vpop.eup %310 }
 0x10b   :  { %v313_v35 = vpop.eup %312  ;;  %v170_v36 = vmul.f32 1.0614054, %v311_v32 }
 0x10c   :  { %v168_v38 = vmul.f32 1.0614054, %v313_v35 }
 0x10d   :  { %v173_v39 = vadd.f32 -1.4531521, %v170_v36  ;;  %v315_v40 = vpop.eup %314 }
 0x10e   :  { %v171_v42 = vadd.f32 -1.4531521, %v168_v38  ;;  %v169_v46 = vmul.f32 1.0614054, %v315_v40  ;;  %v317_v2 = vpop.eup %316 }
 0x10f   :  { %v176_v44 = vmul.f32 %v311_v32, %v173_v39  ;;  %v319_v4 = vpop.eup %318 }
 0x110   :  { %v174_v47 = vmul.f32 %v313_v35, %v171_v42  ;;  %v172_v49 = vadd.f32 -1.4531521, %v169_v46  ;;  %v321_v10 = vpop.eup %320 }
 0x111   :  { %v179_v48 = vadd.f32 1.4214138, %v176_v44 }
 0x112   :  { %v177_v50 = vadd.f32 1.4214138, %v174_v47  ;;  %v175_v53 = vmul.f32 %v315_v40, %v172_v49 }
 0x113   :  { %v182_v52 = vmul.f32 %v311_v32, %v179_v48 }
 0x114   :  { %v180_v54 = vmul.f32 %v313_v35, %v177_v50  ;;  %v178_v56 = vadd.f32 1.4214138, %v175_v53 }
 0x115   :  { %v185_v55 = vadd.f32 -0.28449672, %v182_v52 }
 0x116   :  { %v183_v57 = vadd.f32 -0.28449672, %v180_v54  ;;  %v181_v59 = vmul.f32 %v315_v40, %v178_v56 }
 0x117   :  { %v188_v58 = vmul.f32 %v311_v32, %v185_v55 }
 0x118   :  { %v186_v60 = vmul.f32 %v313_v35, %v183_v57  ;;  %v184_v62 = vadd.f32 -0.28449672, %v181_v59 }
 0x119   :  { %v191_v61 = vadd.f32 0.2548296, %v188_v58 }
 0x11a   :  { %v189_v63 = vadd.f32 0.2548296, %v186_v60  ;;  %v187_v1 = vmul.f32 %v315_v40, %v184_v62 }
 0x11b   :  { %v194_v0 = vmul.f32 %v311_v32, %v191_v61 }
 0x11c   :  { %v192_v3 = vmul.f32 %v313_v35, %v189_v63  ;;  %v190_v6 = vadd.f32 0.2548296, %v187_v1 }
 0x11d   :  { %v209_v5 = vmul.f32 %v317_v2, %v194_v0 }
 0x11e   :  { %v207_v7 = vmul.f32 %v319_v4, %v192_v3  ;;  %v193_v9 = vmul.f32 %v315_v40, %v190_v6 }
 0x11f   :  { %v212_v8 = vsub.f32 1.0, %v209_v5 }
 0x120   :  { %v210_v11 = vsub.f32 1.0, %v207_v7  ;;  %v208_v15 = vmul.f32 %v321_v10, %v193_v9 }
 0x121   :  { %v218_v13 = vsub.f32 0.0, %v212_v8 }
 0x122   :  { %v216_v17 = vsub.f32 0.0, %v210_v11  ;;  %v211_v21 = vsub.f32 1.0, %v208_v15 }
 0x123   :  { %v221_v20 = vsel %vm215_vm0, %v212_v8, %v218_v13 }
 0x124   :  { %v224_v24 = vadd.f32 1.0, %v221_v20  ;;  %v219_v25 = vsel %vm213_vm1, %v210_v11, %v216_v17  ;;  %v217_v26 = vsub.f32 0.0, %v211_v21 }
 0x125   :  { %v222_v28 = vadd.f32 1.0, %v219_v25 }
 0x126   :  { %v227_v27 = vmul.f32 %v224_v24, %v149_v23  ;;  %v220_v29 = vsel %vm214_vm2, %v211_v21, %v217_v26 }
 0x127   :  { %v223_v32 = vadd.f32 1.0, %v220_v29  ;;  %v225_v18 = vmul.f32 %v222_v28, %v147_v31 }
 0x128   :  { %v264_v30 = vpack.c.bf16 %v227_v27, %v227_v27 }
 0x129   :  { %v226_v12 = vmul.f32 %v223_v32, %v148_v16 }
 0x12a   :  { %243 = vst [vmem:[%s408_s3 + $0x8] sm:$0xf] %v264_v30 }
 0x12b   :  { %v268_v33 = vpack.c.bf16 %v226_v12, %v225_v18 }
 0x12d   :  { %269 = vst [vmem:[%s408_s3] sm:$0xff] %v268_v33  }

// kernel: _lambda_.31
= control target key start
LH: loop header
LB: loop body
LE: loop exit
PB: predicated region body
PF: predicated region fallthrough
CT: control target
= control target key end

     0   :  { %vm207_vm0 = vcmask 64512   ;;  %v4426_v0 = vmov 0.0   ;;  %vm4427_vm1 = vmmov 0   ;;  %vm2102_vm3 = vcmask 1043456   ;;  %s5538_s1 = inlined_call_operand.vmem [shape: bf16[8,4,8,8], index: 1, kind: input, shape index: {}]   ;;  %s5539_s0 = inlined_call_operand.vmem [shape: bf16[8,4,8,8], index: 0, kind: input, shape index: {}]   ;;  %s5540_s2 = inlined_call_operand.vmem [shape: bf16[8,4,8,8], index: 2, kind: input, shape index: {}]   ;;  %s5541_s3 = inlined_call_operand.vmem [shape: bf16[8,4,8,8], index: 3, kind: output, shape index: {}]  }
   0x1   :  { %3912 = vmatprep.subr.bf16.mxu0 %v4426_v0  ;;  %3918 = vmatprep.subr.bf16.mxu1 %v4426_v0  ;;  %v143_v1 = vld [vmem:[%s5538_s1] sm:$0xf]  ;;  %v144_v2 = vld [vmem:[%s5538_s1 + $0x4] sm:$0xf]  ;;  %v3769_v8 = vld [vmem:[%s5539_s0 + $0x8] sm:$0xff]   ;;  %vm3604_vm4 = vcmask 60416  }
   0x2   :  { %v3706_v3 = vld [vmem:[%s5539_s0] sm:$0xff]   ;;  %v212_v4 = vsel %vm207_vm0, %v143_v1, 0  ;;  %v258_v5 = vsel %vm207_vm0, %v144_v2, 0  ;;  %3914 = vmatprep.mubr.msk.bf16.mxu0 %vm4427_vm1, %v4426_v0  ;;  %3920 = vmatprep.mubr.msk.bf16.mxu1 %vm4427_vm1, %v4426_v0  ;;  %v145_v11 = vld [vmem:[%s5538_s1 + $0x8] sm:$0xf]  ;;  %v3711_v15 = vunpack.c.l.bf16 %v3769_v8  ;;  %v3712_v16 = vunpack.c.h.bf16 %v3769_v8  ;;  %v3770_v21 = vld [vmem:[%s5539_s0 + $0x10] sm:$0xff]  }
   0x3   :  { %v3707_v6 = vunpack.c.l.bf16 %v3706_v3  ;;  %v3708_v7 = vunpack.c.h.bf16 %v3706_v3  ;;  %3913 = vmatpush3.bf16.xpose.msra.mxu0 %v212_v4  ;;  %3919 = vmatpush3.bf16.xpose.msra.mxu1 %v258_v5  ;;  %v146_v12 = vld [vmem:[%s5538_s1 + $0xc] sm:$0xf]  ;;  %v304_v17 = vsel %vm207_vm0, %v145_v11, 0  ;;  %v147_v22 = vld [vmem:[%s5538_s1 + $0x10] sm:$0xf]  ;;  %v3715_v26 = vunpack.c.l.bf16 %v3770_v21  ;;  %v3771_v32 = vld [vmem:[%s5539_s0 + $0x18] sm:$0xff]  }
   0x4   :  { %3924 = vmatprep.subr.bf16.mxu0 %v4426_v0  ;;  %3930 = vmatprep.subr.bf16.mxu1 %v4426_v0  ;;  %v350_v18 = vsel %vm207_vm0, %v146_v12, 0  ;;  %v81_v19 = vmul.f32 0.35355338, %v3711_v15  ;;  %v82_v20 = vmul.f32 0.35355338, %v3712_v16  ;;  %v3716_v27 = vunpack.c.h.bf16 %v3770_v21  ;;  %v3772_v43 = vld [vmem:[%s5539_s0 + $0x20] sm:$0xff]  }
   0x5   :  { %v79_v9 = vmul.f32 0.35355338, %v3707_v6  ;;  %v80_v10 = vmul.f32 0.35355338, %v3708_v7  ;;  %v148_v23 = vld [vmem:[%s5538_s1 + $0x14] sm:$0xf]  ;;  %v3719_v37 = vunpack.c.l.bf16 %v3771_v32  ;;  %v3720_v38 = vunpack.c.h.bf16 %v3771_v32 }
   0x6   :  { %v113_v24 = vpack.c.bf16 %v81_v19, %v81_v19  ;;  %v114_v25 = vpack.c.bf16 %v82_v20, %v82_v20  ;;  %v396_v28 = vsel %vm207_vm0, %v147_v22, 0  ;;  %v442_v29 = vsel %vm207_vm0, %v148_v23, 0  ;;  %v149_v33 = vld [vmem:[%s5538_s1 + $0x18] sm:$0xf]  ;;  %v150_v34 = vld [vmem:[%s5538_s1 + $0x1c] sm:$0xf] }
   0x7   :  { %v111_v13 = vpack.c.bf16 %v79_v9, %v79_v9  ;;  %v112_v14 = vpack.c.bf16 %v80_v10, %v80_v10  ;;  %v83_v30 = vmul.f32 0.35355338, %v3715_v26  ;;  %v84_v31 = vmul.f32 0.35355338, %v3716_v27  ;;  %v151_v44 = vld [vmem:[%s5538_s1 + $0x20] sm:$0xf] }
   0x8   :  { %v488_v39 = vsel %vm207_vm0, %v149_v33, 0  ;;  %v534_v40 = vsel %vm207_vm0, %v150_v34, 0  ;;  %v85_v41 = vmul.f32 0.35355338, %v3719_v37  ;;  %v86_v42 = vmul.f32 0.35355338, %v3720_v38 }
   0x9   :  { %v115_v35 = vpack.c.bf16 %v83_v30, %v83_v30  ;;  %v116_v36 = vpack.c.bf16 %v84_v31, %v84_v31  ;;  %v152_v45 = vld [vmem:[%s5538_s1 + $0x24] sm:$0xf]  ;;  %v3723_v48 = vunpack.c.l.bf16 %v3772_v43  ;;  %v3724_v49 = vunpack.c.h.bf16 %v3772_v43  ;;  %v3773_v54 = vld [vmem:[%s5539_s0 + $0x28] sm:$0xff]   ;;  %v3774_v2 = vld [vmem:[%s5539_s0 + $0x30] sm:$0xff]  }
   0xa   :  { %3915 = vmatmul.mubr.msk.bf16.vlgmr.msra.gmra.mrb[0].mxu0 %vm207_vm0, %v111_v13  ;;  %3921 = vmatmul.mubr.msk.bf16.vlgmr.msra.gmra.mrb[0].mxu1 %vm207_vm0, %v112_v14  ;;  %v117_v46 = vpack.c.bf16 %v85_v41, %v85_v41  ;;  %v118_v47 = vpack.c.bf16 %v86_v42, %v86_v42  ;;  %v580_v50 = vsel %vm207_vm0, %v151_v44, 0  ;;  %v626_v51 = vsel %vm207_vm0, %v152_v45, 0  ;;  %v153_v55 = vld [vmem:[%s5538_s1 + $0x28] sm:$0xf]  ;;  %v154_v56 = vld [vmem:[%s5538_s1 + $0x2c] sm:$0xf] }
   0xb   :  { %3925 = vmatpush3.bf16.xpose.msra.mxu0 %v304_v17  ;;  %3931 = vmatpush3.bf16.xpose.msra.mxu1 %v350_v18  ;;  %v87_v52 = vmul.f32 0.35355338, %v3723_v48  ;;  %v88_v53 = vmul.f32 0.35355338, %v3724_v49  ;;  %v3727_v59 = vunpack.c.l.bf16 %v3773_v54  ;;  %v3728_v60 = vunpack.c.h.bf16 %v3773_v54  ;;  %v155_v3 = vld [vmem:[%s5538_s1 + $0x30] sm:$0xf] }
   0xc   :  { %3926 = vmatprep.mubr.msk.bf16.mxu0 %vm4427_vm1, %v4426_v0  ;;  %3932 = vmatprep.mubr.msk.bf16.mxu1 %vm4427_vm1, %v4426_v0  ;;  %v672_v61 = vsel %vm207_vm0, %v153_v55, 0  ;;  %v718_v62 = vsel %vm207_vm0, %v154_v56, 0  ;;  %v156_v4 = vld [vmem:[%s5538_s1 + $0x34] sm:$0xf]  ;;  %v3731_v7 = vunpack.c.l.bf16 %v3774_v2  ;;  %v3732_v8 = vunpack.c.h.bf16 %v3774_v2  ;;  %v3775_v13 = vld [vmem:[%s5539_s0 + $0x38] sm:$0xff]  }
   0xd   :  { %3936 = vmatprep.subr.bf16.mxu0 %v4426_v0  ;;  %3942 = vmatprep.subr.bf16.mxu1 %v4426_v0  ;;  %v119_v57 = vpack.c.bf16 %v87_v52, %v87_v52  ;;  %v120_v58 = vpack.c.bf16 %v88_v53, %v88_v53  ;;  %v89_v63 = vmul.f32 0.35355338, %v3727_v59  ;;  %v90_v1 = vmul.f32 0.35355338, %v3728_v60  ;;  %v157_v14 = vld [vmem:[%s5538_s1 + $0x38] sm:$0xf] }
   0xe   :  { %v764_v9 = vsel %vm207_vm0, %v155_v3, 0  ;;  %v810_v10 = vsel %vm207_vm0, %v156_v4, 0  ;;  %v91_v11 = vmul.f32 0.35355338, %v3731_v7  ;;  %v92_v12 = vmul.f32 0.35355338, %v3732_v8 }
   0xf   :  { %v121_v5 = vpack.c.bf16 %v89_v63, %v89_v63  ;;  %v122_v6 = vpack.c.bf16 %v90_v1, %v90_v1  ;;  %v158_v15 = vld [vmem:[%s5538_s1 + $0x3c] sm:$0xf]  ;;  %v3735_v18 = vunpack.c.l.bf16 %v3775_v13  ;;  %v3736_v19 = vunpack.c.h.bf16 %v3775_v13  ;;  %v160_v26 = vld [vmem:[%s5538_s1 + $0x44] sm:$0xf]  ;;  %v162_v37 = vld [vmem:[%s5538_s1 + $0x4c] sm:$0xf] }
  0x10   :  { %v123_v16 = vpack.c.bf16 %v91_v11, %v91_v11  ;;  %v124_v17 = vpack.c.bf16 %v92_v12, %v92_v12  ;;  %v856_v20 = vsel %vm207_vm0, %v157_v14, 0  ;;  %v902_v21 = vsel %vm207_vm0, %v158_v15, 0  ;;  %v164_v48 = vld [vmem:[%s5538_s1 + $0x54] sm:$0xf]  ;;  %v166_v59 = vld [vmem:[%s5538_s1 + $0x5c] sm:$0xf] }
  0x11   :  { %v93_v22 = vmul.f32 0.35355338, %v3735_v18  ;;  %v94_v23 = vmul.f32 0.35355338, %v3736_v19  ;;  %v994_v32 = vsel %vm207_vm0, %v160_v26, 0  ;;  %v1086_v43 = vsel %vm207_vm0, %v162_v37, 0 }
  0x12   :  { %3927 = vmatmul.mubr.msk.bf16.vlgmr.msra.gmra.mrb[4].mxu0 %vm207_vm0, %v113_v24  ;;  %3933 = vmatmul.mubr.msk.bf16.vlgmr.msra.gmra.mrb[4].mxu1 %vm207_vm0, %v114_v25  ;;  %v3776_v24 = vld [vmem:[%s5539_s0 + $0x40] sm:$0xff]   ;;  %v1178_v54 = vsel %vm207_vm0, %v164_v48, 0  ;;  %v1270_v2 = vsel %vm207_vm0, %v166_v59, 0  ;;  %v170_v18 = vld [vmem:[%s5538_s1 + $0x6c] sm:$0xf] }
  0x13   :  { %3937 = vmatpush3.bf16.xpose.msra.mxu0 %v396_v28  ;;  %3943 = vmatpush3.bf16.xpose.msra.mxu1 %v442_v29  ;;  %v159_v25 = vld [vmem:[%s5538_s1 + $0x40] sm:$0xf]  ;;  %v125_v27 = vpack.c.bf16 %v93_v22, %v93_v22  ;;  %v126_v28 = vpack.c.bf16 %v94_v23, %v94_v23  ;;  %v3739_v29 = vunpack.c.l.bf16 %v3776_v24  ;;  %v3740_v30 = vunpack.c.h.bf16 %v3776_v24  ;;  %v168_v7 = vld [vmem:[%s5538_s1 + $0x64] sm:$0xf] }
  0x14   :  { %3938 = vmatprep.mubr.msk.bf16.mxu0 %vm4427_vm1, %v4426_v0  ;;  %3944 = vmatprep.mubr.msk.bf16.mxu1 %vm4427_vm1, %v4426_v0  ;;  %v948_v31 = vsel %vm207_vm0, %v159_v25, 0  ;;  %v1362_v13 = vsel %vm207_vm0, %v168_v7, 0  ;;  %v1454_v24 = vsel %vm207_vm0, %v170_v18, 0 }
  0x15   :  { %3948 = vmatprep.subr.bf16.mxu0 %v4426_v0  ;;  %3954 = vmatprep.subr.bf16.mxu1 %v4426_v0  ;;  %v95_v33 = vmul.f32 0.35355338, %v3739_v29  ;;  %v96_v34 = vmul.f32 0.35355338, %v3740_v30  ;;  %v172_v29 = vld [vmem:[%s5538_s1 + $0x74] sm:$0xf] }
  0x17   :  { %v127_v38 = vpack.c.bf16 %v95_v33, %v95_v33 }
  0x1a   :  { %3939 = vmatmul.mubr.msk.bf16.vlgmr.msra.gmra.mrb[8].mxu0 %vm207_vm0, %v115_v35  ;;  %3945 = vmatmul.mubr.msk.bf16.vlgmr.msra.gmra.mrb[8].mxu1 %vm207_vm0, %v116_v36  ;;  %v3777_v35 = vld [vmem:[%s5539_s0 + $0x48] sm:$0xff]  }
  0x1b   :  { %3949 = vmatpush3.bf16.xpose.msra.mxu0 %v488_v39  ;;  %3955 = vmatpush3.bf16.xpose.msra.mxu1 %v534_v40  ;;  %v161_v36 = vld [vmem:[%s5538_s1 + $0x48] sm:$0xf]  ;;  %v128_v39 = vpack.c.bf16 %v96_v34, %v96_v34  ;;  %v3743_v40 = vunpack.c.l.bf16 %v3777_v35  ;;  %v3744_v41 = vunpack.c.h.bf16 %v3777_v35  ;;  %v1546_v35 = vsel %vm207_vm0, %v172_v29, 0 }
  0x1c   :  { %3950 = vmatprep.mubr.msk.bf16.mxu0 %vm4427_vm1, %v4426_v0  ;;  %3956 = vmatprep.mubr.msk.bf16.mxu1 %vm4427_vm1, %v4426_v0  ;;  %v1040_v42 = vsel %vm207_vm0, %v161_v36, 0 }
  0x1d   :  { %3960 = vmatprep.subr.bf16.mxu0 %v4426_v0  ;;  %3966 = vmatprep.subr.bf16.mxu1 %v4426_v0  ;;  %v97_v44 = vmul.f32 0.35355338, %v3743_v40  ;;  %v98_v45 = vmul.f32 0.35355338, %v3744_v41  ;;  %v174_v40 = vld [vmem:[%s5538_s1 + $0x7c] sm:$0xf] }
  0x1f   :  { %v129_v49 = vpack.c.bf16 %v97_v44, %v97_v44 }
  0x22   :  { %3951 = vmatmul.mubr.msk.bf16.vlgmr.msra.gmra.mrb[12].mxu0 %vm207_vm0, %v117_v46  ;;  %3957 = vmatmul.mubr.msk.bf16.vlgmr.msra.gmra.mrb[12].mxu1 %vm207_vm0, %v118_v47  ;;  %v3778_v46 = vld [vmem:[%s5539_s0 + $0x50] sm:$0xff]  }
  0x23   :  { %3961 = vmatpush3.bf16.xpose.msra.mxu0 %v580_v50  ;;  %3967 = vmatpush3.bf16.xpose.msra.mxu1 %v626_v51  ;;  %v163_v47 = vld [vmem:[%s5538_s1 + $0x50] sm:$0xf]  ;;  %v130_v50 = vpack.c.bf16 %v98_v45, %v98_v45  ;;  %v3747_v51 = vunpack.c.l.bf16 %v3778_v46  ;;  %v3748_v52 = vunpack.c.h.bf16 %v3778_v46  ;;  %v1638_v46 = vsel %vm207_vm0, %v174_v40, 0 }
  0x24   :  { %3962 = vmatprep.mubr.msk.bf16.mxu0 %vm4427_vm1, %v4426_v0  ;;  %3968 = vmatprep.mubr.msk.bf16.mxu1 %vm4427_vm1, %v4426_v0  ;;  %v1132_v53 = vsel %vm207_vm0, %v163_v47, 0 }
  0x25   :  { %3972 = vmatprep.subr.bf16.mxu0 %v4426_v0  ;;  %3978 = vmatprep.subr.bf16.mxu1 %v4426_v0  ;;  %v99_v55 = vmul.f32 0.35355338, %v3747_v51  ;;  %v100_v56 = vmul.f32 0.35355338, %v3748_v52  ;;  %v1680_v51 = vlaneseq }
  0x27   :  { %v131_v60 = vpack.c.bf16 %v99_v55, %v99_v55  ;;  %v4758_v52 = vand.u32 127, %v1680_v51 }
  0x29   :  { %vm1682_vm2 = vcmp.lt.s32.totalorder %v4758_v52, 2 }
  0x2a   :  { %3963 = vmatmul.mubr.msk.bf16.vlgmr.msra.gmra.mrb[16].mxu0 %vm207_vm0, %v119_v57  ;;  %3969 = vmatmul.mubr.msk.bf16.vlgmr.msra.gmra.mrb[16].mxu1 %vm207_vm0, %v120_v58  ;;  %v3779_v57 = vld [vmem:[%s5539_s0 + $0x58] sm:$0xff]  }
  0x2b   :  { %3973 = vmatpush3.bf16.xpose.msra.mxu0 %v672_v61  ;;  %3979 = vmatpush3.bf16.xpose.msra.mxu1 %v718_v62  ;;  %v165_v58 = vld [vmem:[%s5538_s1 + $0x58] sm:$0xf]  ;;  %v132_v61 = vpack.c.bf16 %v100_v56, %v100_v56  ;;  %v3751_v62 = vunpack.c.l.bf16 %v3779_v57  ;;  %v3752_v63 = vunpack.c.h.bf16 %v3779_v57 }
  0x2c   :  { %3974 = vmatprep.mubr.msk.bf16.mxu0 %vm4427_vm1, %v4426_v0  ;;  %3980 = vmatprep.mubr.msk.bf16.mxu1 %vm4427_vm1, %v4426_v0  ;;  %v1224_v1 = vsel %vm207_vm0, %v165_v58, 0 }
  0x2d   :  { %3984 = vmatprep.subr.bf16.mxu0 %v4426_v0  ;;  %3990 = vmatprep.subr.bf16.mxu1 %v4426_v0  ;;  %v101_v3 = vmul.f32 0.35355338, %v3751_v62  ;;  %v102_v4 = vmul.f32 0.35355338, %v3752_v63 }
  0x2f   :  { %v133_v8 = vpack.c.bf16 %v101_v3, %v101_v3 }
  0x32   :  { %3975 = vmatmul.mubr.msk.bf16.vlgmr.msra.gmra.mrb[20].mxu0 %vm207_vm0, %v121_v5  ;;  %3981 = vmatmul.mubr.msk.bf16.vlgmr.msra.gmra.mrb[20].mxu1 %vm207_vm0, %v122_v6  ;;  %v3780_v5 = vld [vmem:[%s5539_s0 + $0x60] sm:$0xff]  }
  0x33   :  { %3985 = vmatpush3.bf16.xpose.msra.mxu0 %v764_v9  ;;  %3991 = vmatpush3.bf16.xpose.msra.mxu1 %v810_v10  ;;  %v167_v6 = vld [vmem:[%s5538_s1 + $0x60] sm:$0xf]  ;;  %v134_v9 = vpack.c.bf16 %v102_v4, %v102_v4  ;;  %v3755_v10 = vunpack.c.l.bf16 %v3780_v5  ;;  %v3756_v11 = vunpack.c.h.bf16 %v3780_v5 }
  0x34   :  { %3986 = vmatprep.mubr.msk.bf16.mxu0 %vm4427_vm1, %v4426_v0  ;;  %3992 = vmatprep.mubr.msk.bf16.mxu1 %vm4427_vm1, %v4426_v0  ;;  %v1316_v12 = vsel %vm207_vm0, %v167_v6, 0 }
  0x35   :  { %3996 = vmatprep.subr.bf16.mxu0 %v4426_v0  ;;  %4002 = vmatprep.subr.bf16.mxu1 %v4426_v0  ;;  %v103_v14 = vmul.f32 0.35355338, %v3755_v10  ;;  %v104_v15 = vmul.f32 0.35355338, %v3756_v11 }
  0x37   :  { %v135_v19 = vpack.c.bf16 %v103_v14, %v103_v14 }
  0x3a   :  { %3987 = vmatmul.mubr.msk.bf16.vlgmr.msra.gmra.mrb[24].mxu0 %vm207_vm0, %v123_v16  ;;  %3993 = vmatmul.mubr.msk.bf16.vlgmr.msra.gmra.mrb[24].mxu1 %vm207_vm0, %v124_v17  ;;  %v3781_v16 = vld [vmem:[%s5539_s0 + $0x68] sm:$0xff]  }
  0x3b   :  { %3997 = vmatpush3.bf16.xpose.msra.mxu0 %v856_v20  ;;  %4003 = vmatpush3.bf16.xpose.msra.mxu1 %v902_v21  ;;  %v169_v17 = vld [vmem:[%s5538_s1 + $0x68] sm:$0xf]  ;;  %v136_v20 = vpack.c.bf16 %v104_v15, %v104_v15  ;;  %v3759_v21 = vunpack.c.l.bf16 %v3781_v16  ;;  %v3760_v22 = vunpack.c.h.bf16 %v3781_v16 }
  0x3c   :  { %3998 = vmatprep.mubr.msk.bf16.mxu0 %vm4427_vm1, %v4426_v0  ;;  %4004 = vmatprep.mubr.msk.bf16.mxu1 %vm4427_vm1, %v4426_v0  ;;  %v1408_v23 = vsel %vm207_vm0, %v169_v17, 0 }
  0x3d   :  { %4008 = vmatprep.subr.bf16.mxu0 %v4426_v0  ;;  %4014 = vmatprep.subr.bf16.mxu1 %v4426_v0  ;;  %v105_v25 = vmul.f32 0.35355338, %v3759_v21  ;;  %v106_v26 = vmul.f32 0.35355338, %v3760_v22 }
  0x3f   :  { %v137_v30 = vpack.c.bf16 %v105_v25, %v105_v25 }
  0x42   :  { %3999 = vmatmul.mubr.msk.bf16.vlgmr.msra.gmra.mrb[28].mxu0 %vm207_vm0, %v125_v27  ;;  %4005 = vmatmul.mubr.msk.bf16.vlgmr.msra.gmra.mrb[28].mxu1 %vm207_vm0, %v126_v28  ;;  %v3782_v27 = vld [vmem:[%s5539_s0 + $0x70] sm:$0xff]  }
  0x43   :  { %4009 = vmatpush3.bf16.xpose.msra.mxu0 %v948_v31  ;;  %4015 = vmatpush3.bf16.xpose.msra.mxu1 %v994_v32  ;;  %v171_v28 = vld [vmem:[%s5538_s1 + $0x70] sm:$0xf]  ;;  %v138_v31 = vpack.c.bf16 %v106_v26, %v106_v26  ;;  %v3763_v32 = vunpack.c.l.bf16 %v3782_v27  ;;  %v3764_v33 = vunpack.c.h.bf16 %v3782_v27 }
  0x44   :  { %4010 = vmatprep.mubr.msk.bf16.mxu0 %vm4427_vm1, %v4426_v0  ;;  %4016 = vmatprep.mubr.msk.bf16.mxu1 %vm4427_vm1, %v4426_v0  ;;  %v1500_v34 = vsel %vm207_vm0, %v171_v28, 0 }
  0x45   :  { %4020 = vmatprep.subr.bf16.mxu0 %v4426_v0  ;;  %4026 = vmatprep.subr.bf16.mxu1 %v4426_v0  ;;  %v107_v36 = vmul.f32 0.35355338, %v3763_v32  ;;  %v108_v37 = vmul.f32 0.35355338, %v3764_v33 }
  0x47   :  { %v139_v41 = vpack.c.bf16 %v107_v36, %v107_v36 }
  0x4a   :  { %4011 = vmatmul.mubr.msk.bf16.vlgmr.msra.gmra.mrb[32].mxu0 %vm207_vm0, %v127_v38  ;;  %4017 = vmatmul.mubr.msk.bf16.vlgmr.msra.gmra.mrb[32].mxu1 %vm207_vm0, %v128_v39  ;;  %v3783_v38 = vld [vmem:[%s5539_s0 + $0x78] sm:$0xff]  }
  0x4b   :  { %4021 = vmatpush3.bf16.xpose.msra.mxu0 %v1040_v42  ;;  %4027 = vmatpush3.bf16.xpose.msra.mxu1 %v1086_v43  ;;  %v173_v39 = vld [vmem:[%s5538_s1 + $0x78] sm:$0xf]  ;;  %v140_v42 = vpack.c.bf16 %v108_v37, %v108_v37  ;;  %v3767_v43 = vunpack.c.l.bf16 %v3783_v38  ;;  %v3768_v44 = vunpack.c.h.bf16 %v3783_v38 }
  0x4c   :  { %4022 = vmatprep.mubr.msk.bf16.mxu0 %vm4427_vm1, %v4426_v0  ;;  %4028 = vmatprep.mubr.msk.bf16.mxu1 %vm4427_vm1, %v4426_v0  ;;  %v1592_v45 = vsel %vm207_vm0, %v173_v39, 0 }
  0x4d   :  { %4032 = vmatprep.subr.bf16.mxu0 %v4426_v0  ;;  %4038 = vmatprep.subr.bf16.mxu1 %v4426_v0  ;;  %v109_v47 = vmul.f32 0.35355338, %v3767_v43  ;;  %v110_v48 = vmul.f32 0.35355338, %v3768_v44 }
  0x52   :  { %4023 = vmatmul.mubr.msk.bf16.vlgmr.msra.gmra.mrb[36].mxu0 %vm207_vm0, %v129_v49  ;;  %4029 = vmatmul.mubr.msk.bf16.vlgmr.msra.gmra.mrb[36].mxu1 %vm207_vm0, %v130_v50  ;;  %v141_v49 = vpack.c.bf16 %v109_v47, %v109_v47  ;;  %v142_v50 = vpack.c.bf16 %v110_v48, %v110_v48 }
  0x53   :  { %4033 = vmatpush3.bf16.xpose.msra.mxu0 %v1132_v53  ;;  %4039 = vmatpush3.bf16.xpose.msra.mxu1 %v1178_v54 }
  0x54   :  { %4034 = vmatprep.mubr.msk.bf16.mxu0 %vm4427_vm1, %v4426_v0  ;;  %4040 = vmatprep.mubr.msk.bf16.mxu1 %vm4427_vm1, %v4426_v0 }
  0x55   :  { %4044 = vmatprep.subr.bf16.mxu0 %v4426_v0  ;;  %4050 = vmatprep.subr.bf16.mxu1 %v4426_v0 }
  0x5a   :  { %4035 = vmatmul.mubr.msk.bf16.vlgmr.msra.gmra.mrb[40].mxu0 %vm207_vm0, %v131_v60  ;;  %4041 = vmatmul.mubr.msk.bf16.vlgmr.msra.gmra.mrb[40].mxu1 %vm207_vm0, %v132_v61 }
  0x5b   :  { %4045 = vmatpush3.bf16.xpose.msra.mxu0 %v1224_v1  ;;  %4051 = vmatpush3.bf16.xpose.msra.mxu1 %v1270_v2 }
  0x5c   :  { %4046 = vmatprep.mubr.msk.bf16.mxu0 %vm4427_vm1, %v4426_v0  ;;  %4052 = vmatprep.mubr.msk.bf16.mxu1 %vm4427_vm1, %v4426_v0 }
  0x5d   :  { %4056 = vmatprep.subr.bf16.mxu0 %v4426_v0  ;;  %4062 = vmatprep.subr.bf16.mxu1 %v4426_v0 }
  0x62   :  { %4047 = vmatmul.mubr.msk.bf16.vlgmr.msra.gmra.mrb[44].mxu0 %vm207_vm0, %v133_v8  ;;  %4053 = vmatmul.mubr.msk.bf16.vlgmr.msra.gmra.mrb[44].mxu1 %vm207_vm0, %v134_v9 }
  0x63   :  { %4057 = vmatpush3.bf16.xpose.msra.mxu0 %v1316_v12  ;;  %4063 = vmatpush3.bf16.xpose.msra.mxu1 %v1362_v13 }
  0x64   :  { %4058 = vmatprep.mubr.msk.bf16.mxu0 %vm4427_vm1, %v4426_v0  ;;  %4068 = vmatprep.subr.bf16.mxu0 %v4426_v0 }
  0x65   :  { %4064 = vmatprep.mubr.msk.bf16.mxu1 %vm4427_vm1, %v4426_v0  ;;  %4074 = vmatprep.subr.bf16.mxu1 %v4426_v0 }
  0x6a   :  { %4059 = vmatmul.mubr.msk.bf16.vlgmr.msra.gmra.mrb[48].mxu0 %vm207_vm0, %v135_v19  ;;  %4065 = vmatmul.mubr.msk.bf16.vlgmr.msra.gmra.mrb[48].mxu1 %vm207_vm0, %v136_v20 }
  0x6b   :  { %4069 = vmatpush3.bf16.xpose.msra.mxu0 %v1408_v23  ;;  %4075 = vmatpush3.bf16.xpose.msra.mxu1 %v1454_v24 }
  0x6c   :  { %4070 = vmatprep.mubr.msk.bf16.mxu0 %vm4427_vm1, %v4426_v0  ;;  %4080 = vmatprep.subr.bf16.mxu0 %v4426_v0 }
  0x6d   :  { %4076 = vmatprep.mubr.msk.bf16.mxu1 %vm4427_vm1, %v4426_v0  ;;  %4086 = vmatprep.subr.bf16.mxu1 %v4426_v0 }
  0x72   :  { %4071 = vmatmul.mubr.msk.bf16.vlgmr.msra.gmra.mrb[52].mxu0 %vm207_vm0, %v137_v30  ;;  %4077 = vmatmul.mubr.msk.bf16.vlgmr.msra.gmra.mrb[52].mxu1 %vm207_vm0, %v138_v31 }
  0x73   :  { %4081 = vmatpush3.bf16.xpose.msra.mxu0 %v1500_v34  ;;  %4087 = vmatpush3.bf16.xpose.msra.mxu1 %v1546_v35 }
  0x74   :  { %4082 = vmatprep.mubr.msk.bf16.mxu0 %vm4427_vm1, %v4426_v0  ;;  %4092 = vmatprep.subr.bf16.mxu0 %v4426_v0 }
  0x75   :  { %4088 = vmatprep.mubr.msk.bf16.mxu1 %vm4427_vm1, %v4426_v0  ;;  %4098 = vmatprep.subr.bf16.mxu1 %v4426_v0 }
  0x7a   :  { %4083 = vmatmul.mubr.msk.bf16.vlgmr.msra.gmra.mrb[56].mxu0 %vm207_vm0, %v139_v41  ;;  %4089 = vmatmul.mubr.msk.bf16.vlgmr.msra.gmra.mrb[56].mxu1 %vm207_vm0, %v140_v42 }
  0x7b   :  { %4093 = vmatpush3.bf16.xpose.msra.mxu0 %v1592_v45  ;;  %4099 = vmatpush3.bf16.xpose.msra.mxu1 %v1638_v46 }
  0x7c   :  { %4094 = vmatprep.mubr.msk.bf16.mxu0 %vm4427_vm1, %v4426_v0  ;;  %4100 = vmatprep.mubr.msk.bf16.mxu1 %vm4427_vm1, %v4426_v0 }
  0x7d   :  { %4104 = vmatprep.subr.bf16.mxu0 %v4426_v0  ;;  %4110 = vmatprep.subr.bf16.mxu1 %v4426_v0 }
  0x82   :  { %4095 = vmatmul.mubr.msk.bf16.vlgmr.msra.gmra.mrb[60].mxu0 %vm207_vm0, %v141_v49  ;;  %4101 = vmatmul.mubr.msk.bf16.vlgmr.msra.gmra.mrb[60].mxu1 %vm207_vm0, %v142_v50 }
  0x83   :  { %4106 = vmatprep.mubr.msk.bf16.mxu0 %vm4427_vm1, %v4426_v0  ;;  %4112 = vmatprep.mubr.msk.bf16.mxu1 %vm4427_vm1, %v4426_v0 }
  0xdd   :  { %v248_v53 = vpop.f32.mrb[0].mxu0  ;;  %v294_v54 = vpop.f32.mrb[0].mxu1 }
  0xde   :  { %v4763_v55 = vsel %vm1682_vm2, %v248_v53, -1e+30  ;;  %v3916_v56 = vpop.f32.mrb[1].mxu0  ;;  %v4767_v57 = vsel %vm1682_vm2, %v294_v54, -1e+30  ;;  %v3922_v58 = vpop.f32.mrb[1].mxu1 }
  0xdf   :  { %v251_v59 = vpop.f32.mrb[2].mxu0  ;;  %v1715_v60 = vsel %vm207_vm0, %v4763_v55, -inf  ;;  %v297_v61 = vpop.f32.mrb[2].mxu1  ;;  %v1718_v1 = vsel %vm207_vm0, %v4767_v57, -inf }
  0xe0   :  { %1716 = vmax.xlane.f32.xlu0 %v1715_v60  ;;  %v3917_v62 = vpop.f32.mrb[3].mxu0  ;;  %v3923_v63 = vpop.f32.mrb[3].mxu1 }
  0xe4   :  { %1719 = vmax.xlane.f32.xlu0 %v1718_v1 }
  0xe5   :  { %v340_v2 = vpop.f32.mrb[4].mxu0  ;;  %v386_v3 = vpop.f32.mrb[4].mxu1 }
  0xe6   :  { %v4775_v4 = vsel %vm1682_vm2, %v340_v2, -1e+30  ;;  %v3928_v5 = vpop.f32.mrb[5].mxu0  ;;  %v4779_v6 = vsel %vm1682_vm2, %v386_v3, -1e+30  ;;  %v3934_v7 = vpop.f32.mrb[5].mxu1 }
  0xe7   :  { %v343_v8 = vpop.f32.mrb[6].mxu0  ;;  %v1721_v9 = vsel %vm207_vm0, %v4775_v4, -inf  ;;  %v389_v10 = vpop.f32.mrb[6].mxu1  ;;  %v1724_v13 = vsel %vm207_vm0, %v4779_v6, -inf }
  0xe8   :  { %1722 = vmax.xlane.f32.xlu1 %v1721_v9  ;;  %v3929_v11 = vpop.f32.mrb[7].mxu0  ;;  %v3935_v12 = vpop.f32.mrb[7].mxu1 }
  0xec   :  { %1725 = vmax.xlane.f32.xlu1 %v1724_v13 }
  0xed   :  { %v432_v14 = vpop.f32.mrb[8].mxu0  ;;  %v478_v15 = vpop.f32.mrb[8].mxu1 }
  0xee   :  { %v4787_v16 = vsel %vm1682_vm2, %v432_v14, -1e+30  ;;  %v4791_v17 = vsel %vm1682_vm2, %v478_v15, -1e+30  ;;  %v3946_v18 = vpop.f32.mrb[9].mxu1  ;;  %v3940_v19 = vpop.f32.mrb[9].mxu0 }
  0xef   :  { %v1730_v20 = vsel %vm207_vm0, %v4791_v17, -inf  ;;  %v1727_v21 = vsel %vm207_vm0, %v4787_v16, -inf  ;;  %v435_v22 = vpop.f32.mrb[10].mxu0  ;;  %v481_v23 = vpop.f32.mrb[10].mxu1 }
  0xf0   :  { %1731 = vmax.xlane.f32.xlu1 %v1730_v20  ;;  %1728 = vmax.xlane.f32.xlu0 %v1727_v21  ;;  %v3941_v24 = vpop.f32.mrb[11].mxu0  ;;  %v3947_v25 = vpop.f32.mrb[11].mxu1 }
  0xf5   :  { %v524_v26 = vpop.f32.mrb[12].mxu0  ;;  %v570_v27 = vpop.f32.mrb[12].mxu1 }
  0xf6   :  { %v4799_v28 = vsel %vm1682_vm2, %v524_v26, -1e+30  ;;  %v4803_v29 = vsel %vm1682_vm2, %v570_v27, -1e+30  ;;  %v3958_v30 = vpop.f32.mrb[13].mxu1  ;;  %v3952_v31 = vpop.f32.mrb[13].mxu0 }
  0xf7   :  { %v1736_v32 = vsel %vm207_vm0, %v4803_v29, -inf  ;;  %v1733_v33 = vsel %vm207_vm0, %v4799_v28, -inf  ;;  %v527_v34 = vpop.f32.mrb[14].mxu0  ;;  %v573_v35 = vpop.f32.mrb[14].mxu1 }
  0xf8   :  { %1737 = vmax.xlane.f32.xlu1 %v1736_v32  ;;  %1734 = vmax.xlane.f32.xlu0 %v1733_v33  ;;  %v3953_v36 = vpop.f32.mrb[15].mxu0  ;;  %v3959_v37 = vpop.f32.mrb[15].mxu1 }
  0xfd   :  { %v616_v38 = vpop.f32.mrb[16].mxu0  ;;  %v662_v39 = vpop.f32.mrb[16].mxu1 }
  0xfe   :  { %v4811_v40 = vsel %vm1682_vm2, %v616_v38, -1e+30  ;;  %v4815_v41 = vsel %vm1682_vm2, %v662_v39, -1e+30  ;;  %v3964_v42 = vpop.f32.mrb[17].mxu0  ;;  %v3970_v43 = vpop.f32.mrb[17].mxu1 }
  0xff   :  { %v1742_v44 = vsel %vm207_vm0, %v4815_v41, -inf  ;;  %v1739_v45 = vsel %vm207_vm0, %v4811_v40, -inf  ;;  %v619_v46 = vpop.f32.mrb[18].mxu0  ;;  %v665_v47 = vpop.f32.mrb[18].mxu1 }
 0x100   :  { %1743 = vmax.xlane.f32.xlu1 %v1742_v44  ;;  %1740 = vmax.xlane.f32.xlu0 %v1739_v45  ;;  %v3965_v48 = vpop.f32.mrb[19].mxu0  ;;  %v3971_v49 = vpop.f32.mrb[19].mxu1 }
 0x105   :  { %v708_v50 = vpop.f32.mrb[20].mxu0  ;;  %v754_v51 = vpop.f32.mrb[20].mxu1 }
 0x106   :  { %v4823_v53 = vsel %vm1682_vm2, %v708_v50, -1e+30  ;;  %v4827_v54 = vsel %vm1682_vm2, %v754_v51, -1e+30  ;;  %v3976_v56 = vpop.f32.mrb[21].mxu0  ;;  %v3982_v58 = vpop.f32.mrb[21].mxu1 }
 0x107   :  { %v1748_v59 = vsel %vm207_vm0, %v4827_v54, -inf  ;;  %v1745_v60 = vsel %vm207_vm0, %v4823_v53, -inf  ;;  %v711_v61 = vpop.f32.mrb[22].mxu0  ;;  %v757_v62 = vpop.f32.mrb[22].mxu1 }
 0x108   :  { %1749 = vmax.xlane.f32.xlu1 %v1748_v59  ;;  %1746 = vmax.xlane.f32.xlu0 %v1745_v60  ;;  %v3977_v63 = vpop.f32.mrb[23].mxu0  ;;  %v3983_v1 = vpop.f32.mrb[23].mxu1 }
 0x10d   :  { %v800_v2 = vpop.f32.mrb[24].mxu0  ;;  %v846_v3 = vpop.f32.mrb[24].mxu1 }
 0x10e   :  { %v4835_v5 = vsel %vm1682_vm2, %v800_v2, -1e+30  ;;  %v4839_v7 = vsel %vm1682_vm2, %v846_v3, -1e+30  ;;  %v3988_v8 = vpop.f32.mrb[25].mxu0  ;;  %v3994_v9 = vpop.f32.mrb[25].mxu1 }
 0x10f   :  { %v1754_v10 = vsel %vm207_vm0, %v4839_v7, -inf  ;;  %v1751_v11 = vsel %vm207_vm0, %v4835_v5, -inf  ;;  %v803_v12 = vpop.f32.mrb[26].mxu0  ;;  %v849_v13 = vpop.f32.mrb[26].mxu1 }
 0x110   :  { %1755 = vmax.xlane.f32.xlu1 %v1754_v10  ;;  %1752 = vmax.xlane.f32.xlu0 %v1751_v11  ;;  %v3989_v14 = vpop.f32.mrb[27].mxu0  ;;  %v3995_v15 = vpop.f32.mrb[27].mxu1 }
 0x115   :  { %v892_v18 = vpop.f32.mrb[28].mxu0  ;;  %v938_v19 = vpop.f32.mrb[28].mxu1 }
 0x116   :  { %v4847_v20 = vsel %vm1682_vm2, %v892_v18, -1e+30  ;;  %v4851_v21 = vsel %vm1682_vm2, %v938_v19, -1e+30  ;;  %v4000_v22 = vpop.f32.mrb[29].mxu0  ;;  %v4006_v23 = vpop.f32.mrb[29].mxu1 }
 0x117   :  { %v1760_v24 = vsel %vm207_vm0, %v4851_v21, -inf  ;;  %v1757_v25 = vsel %vm207_vm0, %v4847_v20, -inf  ;;  %v895_v26 = vpop.f32.mrb[30].mxu0  ;;  %v941_v27 = vpop.f32.mrb[30].mxu1 }
 0x118   :  { %1761 = vmax.xlane.f32.xlu1 %v1760_v24  ;;  %1758 = vmax.xlane.f32.xlu0 %v1757_v25  ;;  %v4001_v30 = vpop.f32.mrb[31].mxu0  ;;  %v4007_v31 = vpop.f32.mrb[31].mxu1 }
 0x11d   :  { %v984_v32 = vpop.f32.mrb[32].mxu0  ;;  %v1030_v33 = vpop.f32.mrb[32].mxu1 }
 0x11e   :  { %v4859_v34 = vsel %vm1682_vm2, %v984_v32, -1e+30  ;;  %v4863_v35 = vsel %vm1682_vm2, %v1030_v33, -1e+30  ;;  %v4012_v36 = vpop.f32.mrb[33].mxu0  ;;  %v4018_v37 = vpop.f32.mrb[33].mxu1 }
 0x11f   :  { %v1766_v38 = vsel %vm207_vm0, %v4863_v35, -inf  ;;  %v1763_v39 = vsel %vm207_vm0, %v4859_v34, -inf  ;;  %v987_v42 = vpop.f32.mrb[34].mxu0  ;;  %v1033_v43 = vpop.f32.mrb[34].mxu1 }
 0x120   :  { %1767 = vmax.xlane.f32.xlu1 %v1766_v38  ;;  %1764 = vmax.xlane.f32.xlu0 %v1763_v39  ;;  %v4013_v44 = vpop.f32.mrb[35].mxu0  ;;  %v4019_v45 = vpop.f32.mrb[35].mxu1 }
 0x125   :  { %v1076_v46 = vpop.f32.mrb[36].mxu0  ;;  %v1122_v47 = vpop.f32.mrb[36].mxu1 }
 0x126   :  { %v4871_v48 = vsel %vm1682_vm2, %v1076_v46, -1e+30  ;;  %v4875_v49 = vsel %vm1682_vm2, %v1122_v47, -1e+30  ;;  %v4024_v50 = vpop.f32.mrb[37].mxu0  ;;  %v4030_v51 = vpop.f32.mrb[37].mxu1 }
 0x127   :  { %v1772_v56 = vsel %vm207_vm0, %v4875_v49, -inf  ;;  %v1769_v58 = vsel %vm207_vm0, %v4871_v48, -inf  ;;  %v1079_v59 = vpop.f32.mrb[38].mxu0  ;;  %v1125_v60 = vpop.f32.mrb[38].mxu1 }
 0x128   :  { %1773 = vmax.xlane.f32.xlu1 %v1772_v56  ;;  %1770 = vmax.xlane.f32.xlu0 %v1769_v58  ;;  %v4025_v61 = vpop.f32.mrb[39].mxu0  ;;  %v4031_v62 = vpop.f32.mrb[39].mxu1 }
 0x12d   :  { %v1168_v63 = vpop.f32.mrb[40].mxu0  ;;  %v1214_v1 = vpop.f32.mrb[40].mxu1 }
 0x12e   :  { %v4883_v2 = vsel %vm1682_vm2, %v1168_v63, -1e+30  ;;  %v4887_v3 = vsel %vm1682_vm2, %v1214_v1, -1e+30  ;;  %v4036_v8 = vpop.f32.mrb[41].mxu0  ;;  %v4042_v9 = vpop.f32.mrb[41].mxu1 }
 0x12f   :  { %v1778_v10 = vsel %vm207_vm0, %v4887_v3, -inf  ;;  %v1775_v11 = vsel %vm207_vm0, %v4883_v2, -inf  ;;  %v1171_v12 = vpop.f32.mrb[42].mxu0  ;;  %v1217_v13 = vpop.f32.mrb[42].mxu1 }
 0x130   :  { %1779 = vmax.xlane.f32.xlu1 %v1778_v10  ;;  %1776 = vmax.xlane.f32.xlu0 %v1775_v11  ;;  %v4037_v14 = vpop.f32.mrb[43].mxu0  ;;  %v4043_v15 = vpop.f32.mrb[43].mxu1 }
 0x135   :  { %v1260_v18 = vpop.f32.mrb[44].mxu0  ;;  %v1306_v19 = vpop.f32.mrb[44].mxu1 }
 0x136   :  { %v4895_v22 = vsel %vm1682_vm2, %v1260_v18, -1e+30  ;;  %v4899_v23 = vsel %vm1682_vm2, %v1306_v19, -1e+30  ;;  %v4048_v24 = vpop.f32.mrb[45].mxu0  ;;  %v4054_v25 = vpop.f32.mrb[45].mxu1 }
 0x137   :  { %v1784_v26 = vsel %vm207_vm0, %v4899_v23, -inf  ;;  %v1781_v27 = vsel %vm207_vm0, %v4895_v22, -inf  ;;  %v1263_v30 = vpop.f32.mrb[46].mxu0  ;;  %v1309_v31 = vpop.f32.mrb[46].mxu1 }
 0x138   :  { %1785 = vmax.xlane.f32.xlu1 %v1784_v26  ;;  %1782 = vmax.xlane.f32.xlu0 %v1781_v27  ;;  %v4049_v32 = vpop.f32.mrb[47].mxu0  ;;  %v4055_v33 = vpop.f32.mrb[47].mxu1 }
 0x13d   :  { %v1352_v36 = vpop.f32.mrb[48].mxu0  ;;  %v1398_v37 = vpop.f32.mrb[48].mxu1 }
 0x13e   :  { %v4066_v38 = vpop.f32.mrb[49].mxu1  ;;  %v4060_v39 = vpop.f32.mrb[49].mxu0 }
 0x13f   :  { %v1355_v42 = vpop.f32.mrb[50].mxu0  ;;  %v1401_v43 = vpop.f32.mrb[50].mxu1 }
 0x140   :  { %v4061_v44 = vpop.f32.mrb[51].mxu0  ;;  %v4067_v45 = vpop.f32.mrb[51].mxu1 }
 0x145   :  { %v1444_v46 = vpop.f32.mrb[52].mxu0  ;;  %v4905_v47 = vpop.f32.mrb[52].mxu1 }
 0x146   :  { %v4078_v50 = vpop.f32.mrb[53].mxu1  ;;  %v4072_v51 = vpop.f32.mrb[53].mxu0 }
 0x147   :  { %v1447_v56 = vpop.f32.mrb[54].mxu0  ;;  %v1493_v58 = vpop.f32.mrb[54].mxu1 }
 0x148   :  { %v4073_v59 = vpop.f32.mrb[55].mxu0  ;;  %v4079_v60 = vpop.f32.mrb[55].mxu1 }
 0x14d   :  { %v4907_v61 = vpop.f32.mrb[56].mxu0  ;;  %v4909_v62 = vpop.f32.mrb[56].mxu1 }
 0x14e   :  { %v4090_v63 = vpop.f32.mrb[57].mxu1  ;;  %v4084_v1 = vpop.f32.mrb[57].mxu0 }
 0x14f   :  { %v1539_v8 = vpop.f32.mrb[58].mxu0  ;;  %v1585_v9 = vpop.f32.mrb[58].mxu1 }
 0x150   :  { %v4085_v10 = vpop.f32.mrb[59].mxu0  ;;  %v4091_v11 = vpop.f32.mrb[59].mxu1  ;;  %v4945_v8 = vsel %vm1682_vm2, %v1444_v46, -1e+30  ;;  %v4958_v46 = vsel %vm1682_vm2, %v4905_v47, -1e+30 }
 0x155   :  { %v4911_v12 = vpop.f32.mrb[60].mxu0  ;;  %v4913_v13 = vpop.f32.mrb[60].mxu1 }
 0x156   :  { %v4102_v14 = vpop.f32.mrb[61].mxu1  ;;  %v4096_v15 = vpop.f32.mrb[61].mxu0 }
 0x157   :  { %v1631_v18 = vpop.f32.mrb[62].mxu0  ;;  %v1677_v19 = vpop.f32.mrb[62].mxu1  ;;  %v1793_v15 = vsel %vm207_vm0, %v4945_v8, -inf }
 0x158   :  { %v4097_v24 = vpop.f32.mrb[63].mxu0  ;;  %v4103_v25 = vpop.f32.mrb[63].mxu1 }
 0x16d   :  { %v1717_v26 = vpop.xlane.xlu0 %1716 }
 0x16e   :  { %v1811_v27 = vsub.f32 %v4763_v55, %v1717_v26  ;;  %v4923_v55 = vsel %vm1682_vm2, %v1352_v36, -1e+30  ;;  %v4935_v36 = vsel %vm1682_vm2, %v1398_v37, -1e+30 }
 0x170   :  { %v1843_v30 = vmul.f32 1.442695, %v1811_v27 }
 0x171   :  { %v1720_v31 = vpop.xlane.xlu0 %1719 }
 0x172   :  { %4298 = vpow2.f32 %v1843_v30  ;;  %v1812_v32 = vsub.f32 %v4767_v57, %v1720_v31  ;;  %v4969_v30 = vsel %vm1682_vm2, %v4907_v61, -1e+30 }
 0x173   :  { %v1799_v61 = vsel %vm207_vm0, %v4969_v30, -inf }
 0x174   :  { %v1845_v33 = vmul.f32 1.442695, %v1812_v32 }
 0x175   :  { %v1723_v38 = vpop.xlane.xlu1 %1722 }
 0x176   :  { %4300 = vpow2.f32 %v1845_v33  ;;  %v1813_v39 = vsub.f32 %v4775_v4, %v1723_v38  ;;  %v4980_v38 = vsel %vm1682_vm2, %v4909_v62, -1e+30 }
 0x178   :  { %v1847_v42 = vmul.f32 1.442695, %v1813_v39 }
 0x179   :  { %v1726_v43 = vpop.xlane.xlu1 %1725 }
 0x17a   :  { %4302 = vpow2.f32 %v1847_v42  ;;  %v1814_v44 = vsub.f32 %v4779_v6, %v1726_v43  ;;  %v1787_v6 = vsel %vm207_vm0, %v4923_v55, -inf }
 0x17c   :  { %v4919_v45 = vpop.eup %4298  ;;  %v1849_v50 = vmul.f32 1.442695, %v1814_v44 }
 0x17d   :  { %v1732_v51 = vpop.xlane.xlu1 %1731  ;;  %v1729_v56 = vpop.xlane.xlu0 %1728  ;;  %v1907_v57 = vsel %vm207_vm0, %v4919_v45, 0.0 }
 0x17e   :  { %4304 = vpow2.f32 %v1849_v50  ;;  %v1816_v4 = vsub.f32 %v4791_v17, %v1732_v51  ;;  %v1815_v58 = vsub.f32 %v4787_v16, %v1729_v56  ;;  %1908 = vadd.xlane.f32.xlu0 %v1907_v57  ;;  %v1790_v16 = vsel %vm207_vm0, %v4935_v36, -inf }
 0x17f   :  { %v4993_v50 = vsel %vm1682_vm2, %v4911_v12, -1e+30  ;;  %v175_v12 = vld [vmem:[%s5540_s2] sm:$0xf] }
 0x180   :  { %v4931_v59 = vpop.eup %4300  ;;  %v1853_v60 = vmul.f32 1.442695, %v1816_v4  ;;  %v1851_v63 = vmul.f32 1.442695, %v1815_v58  ;;  %v5004_v58 = vsel %vm1682_vm2, %v4913_v13, -1e+30 }
 0x181   :  { %v1910_v1 = vsel %vm207_vm0, %v4931_v59, 0.0  ;;  %v1808_v52 = vsel %vm207_vm0, %v5004_v58, -inf  ;;  %v176_v13 = vld [vmem:[%s5540_s2 + $0x4] sm:$0xf] }
 0x182   :  { %1911 = vadd.xlane.f32.xlu1 %v1910_v1  ;;  %1788 = vmax.xlane.f32.xlu0 %v1787_v6  ;;  %4306 = vpow2.f32 %v1851_v63  ;;  %v2150_v1 = vsel %vm2102_vm3, %v176_v13, 0 }
 0x183   :  { %4308 = vpow2.f32 %v1853_v60  ;;  %4111 = vmatpush3.bf16.msra.mxu1 %v2150_v1 }
 0x184   :  { %v4941_v17 = vpop.eup %4302  ;;  %4122 = vmatprep.subr.bf16.mxu1 %v4426_v0 }
 0x185   :  { %v1738_v9 = vpop.xlane.xlu1 %1737  ;;  %v1735_v10 = vpop.xlane.xlu0 %1734  ;;  %v1913_v37 = vsel %vm207_vm0, %v4941_v17, 0.0 }
 0x186   :  { %v1818_v11 = vsub.f32 %v4803_v29, %v1738_v9  ;;  %v1817_v14 = vsub.f32 %v4799_v28, %v1735_v10  ;;  %1791 = vmax.xlane.f32.xlu1 %v1790_v16  ;;  %1914 = vadd.xlane.f32.xlu0 %v1913_v37  ;;  %v1796_v28 = vsel %vm207_vm0, %v4958_v46, -inf }
 0x188   :  { %v4953_v18 = vpop.eup %4304  ;;  %v1857_v19 = vmul.f32 1.442695, %v1818_v11  ;;  %v1855_v24 = vmul.f32 1.442695, %v1817_v14 }
 0x189   :  { %v1916_v25 = vsel %vm207_vm0, %v4953_v18, 0.0 }
 0x18a   :  { %1917 = vadd.xlane.f32.xlu1 %v1916_v25  ;;  %1794 = vmax.xlane.f32.xlu0 %v1793_v15  ;;  %4310 = vpow2.f32 %v1855_v24 }
 0x18b   :  { %4312 = vpow2.f32 %v1857_v19 }
 0x18c   :  { %v4964_v29 = vpop.eup %4306 }
 0x18d   :  { %v1744_v26 = vpop.xlane.xlu1 %1743  ;;  %v1741_v27 = vpop.xlane.xlu0 %1740  ;;  %v1919_v33 = vsel %vm207_vm0, %v4964_v29, 0.0 }
 0x18e   :  { %v4971_v47 = vpop.eup %4308  ;;  %v1820_v31 = vsub.f32 %v4815_v41, %v1744_v26  ;;  %v1819_v32 = vsub.f32 %v4811_v40, %v1741_v27  ;;  %1797 = vmax.xlane.f32.xlu1 %v1796_v28  ;;  %1920 = vadd.xlane.f32.xlu0 %v1919_v33  ;;  %v1802_v40 = vsel %vm207_vm0, %v4980_v38, -inf }
 0x18f   :  { %v1922_v41 = vsel %vm207_vm0, %v4971_v47, 0.0 }
 0x190   :  { %v1861_v39 = vmul.f32 1.442695, %v1820_v31  ;;  %v1859_v42 = vmul.f32 1.442695, %v1819_v32 }
 0x192   :  { %1923 = vadd.xlane.f32.xlu1 %v1922_v41  ;;  %4314 = vpow2.f32 %v1859_v42  ;;  %1800 = vmax.xlane.f32.xlu0 %v1799_v61 }
 0x193   :  { %4316 = vpow2.f32 %v1861_v39 }
 0x194   :  { %v4988_v43 = vpop.eup %4310 }
 0x195   :  { %v1750_v44 = vpop.xlane.xlu1 %1749  ;;  %v1747_v62 = vpop.xlane.xlu0 %1746  ;;  %v1925_v4 = vsel %vm207_vm0, %v4988_v43, 0.0 }
 0x196   :  { %v4995_v51 = vpop.eup %4312  ;;  %v1822_v56 = vsub.f32 %v4827_v54, %v1750_v44  ;;  %v1821_v57 = vsub.f32 %v4823_v53, %v1747_v62  ;;  %1803 = vmax.xlane.f32.xlu1 %v1802_v40  ;;  %1926 = vadd.xlane.f32.xlu0 %v1925_v4  ;;  %v1805_v53 = vsel %vm207_vm0, %v4993_v50, -inf  ;;  %v2104_v54 = vsel %vm2102_vm3, %v175_v12, 0 }
 0x197   :  { %v1928_v63 = vsel %vm207_vm0, %v4995_v51, 0.0  ;;  %4105 = vmatpush3.bf16.msra.mxu0 %v2104_v54 }
 0x198   :  { %v1865_v6 = vmul.f32 1.442695, %v1822_v56  ;;  %v1863_v60 = vmul.f32 1.442695, %v1821_v57  ;;  %4116 = vmatprep.subr.bf16.mxu0 %v4426_v0 }
 0x19a   :  { %4318 = vpow2.f32 %v1865_v6  ;;  %1929 = vadd.xlane.f32.xlu1 %v1928_v63  ;;  %1806 = vmax.xlane.f32.xlu0 %v1805_v53 }
 0x19b   :  { %4320 = vpow2.f32 %v1863_v60 }
 0x19c   :  { %v5021_v16 = vpop.eup %4314 }
 0x19d   :  { %v1756_v9 = vpop.xlane.xlu1 %1755  ;;  %v1753_v10 = vpop.xlane.xlu0 %1752  ;;  %v1931_v15 = vsel %vm207_vm0, %v5021_v16, 0.0 }
 0x19e   :  { %v5023_v37 = vpop.eup %4316  ;;  %v1824_v11 = vsub.f32 %v4839_v7, %v1756_v9  ;;  %v1823_v14 = vsub.f32 %v4835_v5, %v1753_v10  ;;  %1809 = vmax.xlane.f32.xlu1 %v1808_v52  ;;  %1932 = vadd.xlane.f32.xlu0 %v1931_v15 }
 0x19f   :  { %v1934_v25 = vsel %vm207_vm0, %v5023_v37, 0.0 }
 0x1a0   :  { %v1869_v19 = vmul.f32 1.442695, %v1824_v11  ;;  %v1867_v24 = vmul.f32 1.442695, %v1823_v14 }
 0x1a2   :  { %4322 = vpow2.f32 %v1869_v19  ;;  %1935 = vadd.xlane.f32.xlu1 %v1934_v25 }
 0x1a3   :  { %4324 = vpow2.f32 %v1867_v24 }
 0x1a4   :  { %v5032_v28 = vpop.eup %4318 }
 0x1a5   :  { %v5034_v7 = vpop.eup %4320  ;;  %v1762_v5 = vpop.xlane.xlu1 %1761  ;;  %v1940_v27 = vsel %vm207_vm0, %v5032_v28, 0.0 }
 0x1a6   :  { %v1759_v26 = vpop.xlane.xlu0 %1758  ;;  %v1826_v31 = vsub.f32 %v4851_v21, %v1762_v5  ;;  %1941 = vadd.xlane.f32.xlu1 %v1940_v27  ;;  %v1937_v33 = vsel %vm207_vm0, %v5034_v7, 0.0 }
 0x1a7   :  { %v1825_v32 = vsub.f32 %v4847_v20, %v1759_v26  ;;  %1938 = vadd.xlane.f32.xlu0 %v1937_v33 }
 0x1a8   :  { %v1873_v39 = vmul.f32 1.442695, %v1826_v31 }
 0x1a9   :  { %v1871_v42 = vmul.f32 1.442695, %v1825_v32 }
 0x1aa   :  { %4326 = vpow2.f32 %v1873_v39 }
 0x1ab   :  { %4328 = vpow2.f32 %v1871_v42 }
 0x1ac   :  { %v5042_v61 = vpop.eup %4322 }
 0x1ad   :  { %v5044_v41 = vpop.eup %4324  ;;  %v1768_v40 = vpop.xlane.xlu1 %1767  ;;  %v1946_v21 = vsel %vm207_vm0, %v5042_v61, 0.0 }
 0x1ae   :  { %v1765_v44 = vpop.xlane.xlu0 %1764  ;;  %v1828_v20 = vsub.f32 %v4863_v35, %v1768_v40  ;;  %1947 = vadd.xlane.f32.xlu1 %v1946_v21  ;;  %v1943_v56 = vsel %vm207_vm0, %v5044_v41, 0.0 }
 0x1af   :  { %v1827_v62 = vsub.f32 %v4859_v34, %v1765_v44  ;;  %1944 = vadd.xlane.f32.xlu0 %v1943_v56 }
 0x1b0   :  { %v1877_v57 = vmul.f32 1.442695, %v1828_v20 }
 0x1b1   :  { %v1875_v4 = vmul.f32 1.442695, %v1827_v62 }
 0x1b2   :  { %4330 = vpow2.f32 %v1877_v57 }
 0x1b3   :  { %4332 = vpow2.f32 %v1875_v4 }
 0x1b4   :  { %v5052_v12 = vpop.eup %4326 }
 0x1b5   :  { %v5054_v6 = vpop.eup %4328  ;;  %v1774_v60 = vpop.xlane.xlu1 %1773  ;;  %v1952_v35 = vsel %vm207_vm0, %v5052_v12, 0.0 }
 0x1b6   :  { %v1771_v53 = vpop.xlane.xlu0 %1770  ;;  %v1830_v34 = vsub.f32 %v4875_v49, %v1774_v60  ;;  %1953 = vadd.xlane.f32.xlu1 %v1952_v35  ;;  %v1949_v63 = vsel %vm207_vm0, %v5054_v6, 0.0 }
 0x1b7   :  { %v1829_v54 = vsub.f32 %v4871_v48, %v1771_v53  ;;  %1950 = vadd.xlane.f32.xlu0 %v1949_v63 }
 0x1b8   :  { %v1881_v52 = vmul.f32 1.442695, %v1830_v34 }
 0x1b9   :  { %v1879_v13 = vmul.f32 1.442695, %v1829_v54 }
 0x1ba   :  { %4334 = vpow2.f32 %v1881_v52 }
 0x1bb   :  { %4336 = vpow2.f32 %v1879_v13  ;;  %v177_v13 = vld [vmem:[%s5540_s2 + $0x8] sm:$0xf] }
 0x1bc   :  { %v5062_v1 = vpop.eup %4330 }
 0x1bd   :  { %v5064_v9 = vpop.eup %4332  ;;  %v1780_v10 = vpop.xlane.xlu1 %1779  ;;  %v1958_v49 = vsel %vm207_vm0, %v5062_v1, 0.0 }
 0x1be   :  { %v1777_v11 = vpop.xlane.xlu0 %1776  ;;  %v1832_v48 = vsub.f32 %v4887_v3, %v1780_v10  ;;  %1959 = vadd.xlane.f32.xlu1 %v1958_v49  ;;  %v1955_v15 = vsel %vm207_vm0, %v5064_v9, 0.0 }
 0x1bf   :  { %v1831_v14 = vsub.f32 %v4883_v2, %v1777_v11  ;;  %1956 = vadd.xlane.f32.xlu0 %v1955_v15 }
 0x1c0   :  { %v1885_v19 = vmul.f32 1.442695, %v1832_v48 }
 0x1c1   :  { %v1883_v24 = vmul.f32 1.442695, %v1831_v14  ;;  %v2196_v14 = vsel %vm2102_vm3, %v177_v13, 0 }
 0x1c2   :  { %4338 = vpow2.f32 %v1885_v19  ;;  %v178_v19 = vld [vmem:[%s5540_s2 + $0xc] sm:$0xf] }
 0x1c3   :  { %4340 = vpow2.f32 %v1883_v24 }
 0x1c4   :  { %v5072_v25 = vpop.eup %4334 }
 0x1c5   :  { %v5074_v5 = vpop.eup %4336  ;;  %v1786_v26 = vpop.xlane.xlu1 %1785  ;;  %v1964_v3 = vsel %vm207_vm0, %v5072_v25, 0.0 }
 0x1c6   :  { %v1783_v27 = vpop.xlane.xlu0 %1782  ;;  %v1834_v2 = vsub.f32 %v4899_v23, %v1786_v26  ;;  %1965 = vadd.xlane.f32.xlu1 %v1964_v3  ;;  %v1961_v32 = vsel %vm207_vm0, %v5074_v5, 0.0  ;;  %v2242_v3 = vsel %vm2102_vm3, %v178_v19, 0 }
 0x1c7   :  { %v1833_v31 = vsub.f32 %v4895_v22, %v1783_v27  ;;  %1962 = vadd.xlane.f32.xlu0 %v1961_v32 }
 0x1c8   :  { %v1889_v33 = vmul.f32 1.442695, %v1834_v2 }
 0x1c9   :  { %v1887_v39 = vmul.f32 1.442695, %v1833_v31 }
 0x1ca   :  { %4342 = vpow2.f32 %v1889_v33  ;;  %v179_v33 = vld [vmem:[%s5540_s2 + $0x10] sm:$0xf] }
 0x1cb   :  { %4344 = vpow2.f32 %v1887_v39 }
 0x1cc   :  { %v5082_v42 = vpop.eup %4338 }
 0x1cd   :  { %v5084_v40 = vpop.eup %4340  ;;  %v1970_v44 = vsel %vm207_vm0, %v5082_v42, 0.0 }
 0x1ce   :  { %1971 = vadd.xlane.f32.xlu1 %v1970_v44  ;;  %v1967_v22 = vsel %vm207_vm0, %v5084_v40, 0.0 }
 0x1cf   :  { %1968 = vadd.xlane.f32.xlu0 %v1967_v22 }
 0x1d4   :  { %v5090_v23 = vpop.eup %4342 }
 0x1d5   :  { %v5092_v21 = vpop.eup %4344  ;;  %v1976_v20 = vsel %vm207_vm0, %v5090_v23, 0.0 }
 0x1d6   :  { %1977 = vadd.xlane.f32.xlu1 %v1976_v20  ;;  %v1973_v62 = vsel %vm207_vm0, %v5092_v21, 0.0 }
 0x1d7   :  { %1974 = vadd.xlane.f32.xlu0 %v1973_v62 }
 0x20b   :  { %v1909_v56 = vpop.xlane.xlu0 %1908 }
 0x20c   :  { %4346 = vrcp.f32 %v1909_v56  ;;  %v2288_v56 = vsel %vm2102_vm3, %v179_v33, 0  ;;  %v183_v33 = vld [vmem:[%s5540_s2 + $0x20] sm:$0xf] }
 0x20f   :  { %v1912_v57 = vpop.xlane.xlu1 %1911  ;;  %v1789_v4 = vpop.xlane.xlu0 %1788 }
 0x210   :  { %4348 = vrcp.f32 %v1912_v57  ;;  %v1835_v60 = vsub.f32 %v4923_v55, %v1789_v4 }
 0x212   :  { %v1891_v53 = vmul.f32 1.442695, %v1835_v60 }
 0x213   :  { %v1792_v35 = vpop.xlane.xlu1 %1791  ;;  %v1915_v34 = vpop.xlane.xlu0 %1914 }
 0x214   :  { %4350 = vpow2.f32 %v1891_v53  ;;  %v1836_v54 = vsub.f32 %v4935_v36, %v1792_v35 }
 0x215   :  { %4352 = vrcp.f32 %v1915_v34 }
 0x216   :  { %v4347_v63 = vpop.eup %4346  ;;  %v1893_v52 = vmul.f32 1.442695, %v1836_v54 }
 0x217   :  { %v2035_v10 = vmul.f32 %v4347_v63, %v4919_v45  ;;  %v1918_v11 = vpop.xlane.xlu1 %1917  ;;  %v1795_v49 = vpop.xlane.xlu0 %1794 }
 0x218   :  { %4354 = vpow2.f32 %v1893_v52  ;;  %v1837_v55 = vsub.f32 %v4945_v8, %v1795_v49 }
 0x219   :  { %4356 = vrcp.f32 %v1918_v11  ;;  %v2067_v48 = vpack.c.bf16 %v2035_v10, %v2035_v10  ;;  %v181_v11 = vld [vmem:[%s5540_s2 + $0x18] sm:$0xf] }
 0x21a   :  { %v4349_v15 = vpop.eup %4348  ;;  %v1895_v36 = vmul.f32 1.442695, %v1837_v55 }
 0x21b   :  { %v2036_v24 = vmul.f32 %v4349_v15, %v4931_v59  ;;  %v1798_v26 = vpop.xlane.xlu1 %1797  ;;  %4107 = vmatmul.mubr.msk.bf16.vlgmr.msra.gmra.mrb[64].mxu0 %vm207_vm0, %v2067_v48  ;;  %v1921_v27 = vpop.xlane.xlu0 %1920 }
 0x21c   :  { %4358 = vpow2.f32 %v1895_v36  ;;  %v1838_v45 = vsub.f32 %v4958_v46, %v1798_v26  ;;  %4117 = vmatpush3.bf16.msra.mxu0 %v2196_v14  ;;  %4118 = vmatprep.mubr.msk.bf16.mxu0 %vm4427_vm1, %v4426_v0  ;;  %v2380_v36 = vsel %vm2102_vm3, %v181_v11, 0 }
 0x21d   :  { %4360 = vrcp.f32 %v1921_v27  ;;  %v2068_v8 = vpack.c.bf16 %v2036_v24, %v2036_v24  ;;  %4128 = vmatprep.subr.bf16.mxu0 %v4426_v0 }
 0x21e   :  { %v5116_v2 = vpop.eup %4350  ;;  %v1897_v59 = vmul.f32 1.442695, %v1838_v45 }
 0x21f   :  { %v4353_v31 = vpop.eup %4352  ;;  %4113 = vmatmul.mubr.msk.bf16.vlgmr.msra.gmra.mrb[64].mxu1 %vm207_vm0, %v2068_v8  ;;  %v1924_v32 = vpop.xlane.xlu1 %1923  ;;  %v1979_v46 = vsel %vm207_vm0, %v5116_v2, 0.0 }
 0x220   :  { %v2037_v39 = vmul.f32 %v4353_v31, %v4941_v17  ;;  %4362 = vpow2.f32 %v1897_v59  ;;  %v1801_v44 = vpop.xlane.xlu0 %1800  ;;  %1980 = vadd.xlane.f32.xlu0 %v1979_v46  ;;  %4123 = vmatpush3.bf16.msra.mxu1 %v2242_v3 }
 0x221   :  { %4364 = vrcp.f32 %v1924_v32  ;;  %v1839_v22 = vsub.f32 %v4969_v30, %v1801_v44  ;;  %4124 = vmatprep.mubr.msk.bf16.mxu1 %vm4427_vm1, %v4426_v0  ;;  %4134 = vmatprep.subr.bf16.mxu1 %v4426_v0  ;;  %v180_v30 = vld [vmem:[%s5540_s2 + $0x14] sm:$0xf] }
 0x222   :  { %v5129_v20 = vpop.eup %4354  ;;  %v2069_v62 = vpack.c.bf16 %v2037_v39, %v2037_v39  ;;  %v2334_v13 = vsel %vm2102_vm3, %v180_v30, 0 }
 0x223   :  { %v4357_v57 = vpop.eup %4356  ;;  %v1899_v4 = vmul.f32 1.442695, %v1839_v22  ;;  %v1804_v17 = vpop.xlane.xlu1 %1803  ;;  %v1982_v60 = vsel %vm207_vm0, %v5129_v20, 0.0 }
 0x224   :  { %v2038_v53 = vmul.f32 %v4357_v57, %v4953_v18  ;;  %v1840_v35 = vsub.f32 %v4980_v38, %v1804_v17  ;;  %4119 = vmatmul.mubr.msk.bf16.vlgmr.msra.gmra.mrb[68].mxu0 %vm207_vm0, %v2069_v62  ;;  %v1927_v34 = vpop.xlane.xlu0 %1926  ;;  %1983 = vadd.xlane.f32.xlu1 %v1982_v60 }
 0x225   :  { %4366 = vpow2.f32 %v1899_v4  ;;  %4129 = vmatpush3.bf16.msra.mxu0 %v2288_v56  ;;  %4130 = vmatprep.mubr.msk.bf16.mxu0 %vm4427_vm1, %v4426_v0  ;;  %v2472_v4 = vsel %vm2102_vm3, %v183_v33, 0 }
 0x226   :  { %v5142_v54 = vpop.eup %4358  ;;  %v1901_v63 = vmul.f32 1.442695, %v1840_v35  ;;  %4368 = vrcp.f32 %v1927_v34  ;;  %v2070_v52 = vpack.c.bf16 %v2038_v53, %v2038_v53  ;;  %4140 = vmatprep.subr.bf16.mxu0 %v4426_v0 }
 0x227   :  { %v4361_v18 = vpop.eup %4360  ;;  %v1930_v38 = vpop.xlane.xlu1 %1929  ;;  %v1985_v10 = vsel %vm207_vm0, %v5142_v54, 0.0 }
 0x228   :  { %v2039_v49 = vmul.f32 %v4361_v18, %v4964_v29  ;;  %4370 = vpow2.f32 %v1901_v63  ;;  %4125 = vmatmul.mubr.msk.bf16.vlgmr.msra.gmra.mrb[68].mxu1 %vm207_vm0, %v2070_v52  ;;  %v1807_v55 = vpop.xlane.xlu0 %1806  ;;  %1986 = vadd.xlane.f32.xlu0 %v1985_v10  ;;  %v185_v63 = vld [vmem:[%s5540_s2 + $0x28] sm:$0xf] }
 0x229   :  { %4372 = vrcp.f32 %v1930_v38  ;;  %v1841_v48 = vsub.f32 %v4993_v50, %v1807_v55  ;;  %4135 = vmatpush3.bf16.msra.mxu1 %v2334_v13  ;;  %4136 = vmatprep.mubr.msk.bf16.mxu1 %vm4427_vm1, %v4426_v0  ;;  %v182_v50 = vld [vmem:[%s5540_s2 + $0x1c] sm:$0xf] }
 0x22a   :  { %v5156_v14 = vpop.eup %4362  ;;  %v2071_v15 = vpack.c.bf16 %v2039_v49, %v2039_v49  ;;  %4146 = vmatprep.subr.bf16.mxu1 %v4426_v0  ;;  %v2426_v31 = vsel %vm2102_vm3, %v182_v50, 0  ;;  %v2564_v49 = vsel %vm2102_vm3, %v185_v63, 0 }
 0x22b   :  { %v4365_v29 = vpop.eup %4364  ;;  %v1903_v19 = vmul.f32 1.442695, %v1841_v48  ;;  %v1810_v24 = vpop.xlane.xlu1 %1809  ;;  %v1988_v26 = vsel %vm207_vm0, %v5156_v14, 0.0 }
 0x22c   :  { %v2040_v45 = vmul.f32 %v4365_v29, %v4971_v47  ;;  %v1842_v27 = vsub.f32 %v5004_v58, %v1810_v24  ;;  %4131 = vmatmul.mubr.msk.bf16.vlgmr.msra.gmra.mrb[72].mxu0 %vm207_vm0, %v2071_v15  ;;  %v1933_v8 = vpop.xlane.xlu0 %1932  ;;  %1989 = vadd.xlane.f32.xlu1 %v1988_v26 }
 0x22d   :  { %4374 = vpow2.f32 %v1903_v19  ;;  %4141 = vmatpush3.bf16.msra.mxu0 %v2380_v36  ;;  %4142 = vmatprep.mubr.msk.bf16.mxu0 %vm4427_vm1, %v4426_v0 }
 0x22e   :  { %v1905_v3 = vmul.f32 1.442695, %v1842_v27  ;;  %4376 = vrcp.f32 %v1933_v8  ;;  %v2072_v59 = vpack.c.bf16 %v2040_v45, %v2040_v45  ;;  %4152 = vmatprep.subr.bf16.mxu0 %v4426_v0 }
 0x22f   :  { %v5172_v32 = vpop.eup %4366  ;;  %v1936_v47 = vpop.xlane.xlu1 %1935 }
 0x230   :  { %v4369_v58 = vpop.eup %4368  ;;  %4378 = vpow2.f32 %v1905_v3  ;;  %4137 = vmatmul.mubr.msk.bf16.vlgmr.msra.gmra.mrb[72].mxu1 %vm207_vm0, %v2072_v59  ;;  %v1991_v46 = vsel %vm207_vm0, %v5172_v32, 0.0 }
 0x231   :  { %v2041_v39 = vmul.f32 %v4369_v58, %v4988_v43  ;;  %4380 = vrcp.f32 %v1936_v47  ;;  %1992 = vadd.xlane.f32.xlu0 %v1991_v46  ;;  %4147 = vmatpush3.bf16.msra.mxu1 %v2426_v31  ;;  %v184_v43 = vld [vmem:[%s5540_s2 + $0x24] sm:$0xf]  ;;  %v189_v58 = vld [vmem:[%s5540_s2 + $0x38] sm:$0xf] }
 0x232   :  { %v5181_v44 = vpop.eup %4370  ;;  %4148 = vmatprep.mubr.msk.bf16.mxu1 %vm4427_vm1, %v4426_v0  ;;  %4158 = vmatprep.subr.bf16.mxu1 %v4426_v0  ;;  %v2518_v53 = vsel %vm2102_vm3, %v184_v43, 0 }
 0x233   :  { %v4373_v22 = vpop.eup %4372  ;;  %v1942_v62 = vpop.xlane.xlu1 %1941  ;;  %v2073_v56 = vpack.c.bf16 %v2041_v39, %v2041_v39  ;;  %v1994_v57 = vsel %vm207_vm0, %v5181_v44, 0.0 }
 0x234   :  { %v2042_v17 = vmul.f32 %v4373_v22, %v4995_v51  ;;  %4382 = vrcp.f32 %v1942_v62  ;;  %v1939_v60 = vpop.xlane.xlu0 %1938  ;;  %1995 = vadd.xlane.f32.xlu1 %v1994_v57  ;;  %v2748_v22 = vsel %vm2102_vm3, %v189_v58, 0 }
 0x235   :  { %4143 = vmatmul.mubr.msk.bf16.vlgmr.msra.gmra.mrb[76].mxu0 %vm207_vm0, %v2073_v56  ;;  %4384 = vrcp.f32 %v1939_v60 }
 0x236   :  { %v2074_v30 = vpack.c.bf16 %v2042_v17, %v2042_v17  ;;  %4153 = vmatpush3.bf16.msra.mxu0 %v2472_v4  ;;  %4154 = vmatprep.mubr.msk.bf16.mxu0 %vm4427_vm1, %v4426_v0  ;;  %v191_v17 = vld [vmem:[%s5540_s2 + $0x40] sm:$0xf] }
 0x237   :  { %v5197_v35 = vpop.eup %4374  ;;  %4164 = vmatprep.subr.bf16.mxu0 %v4426_v0 }
 0x238   :  { %v4377_v34 = vpop.eup %4376  ;;  %4149 = vmatmul.mubr.msk.bf16.vlgmr.msra.gmra.mrb[76].mxu1 %vm207_vm0, %v2074_v30  ;;  %v1997_v51 = vsel %vm207_vm0, %v5197_v35, 0.0 }
 0x239   :  { %v2043_v52 = vmul.f32 %v4377_v34, %v5021_v16  ;;  %1998 = vadd.xlane.f32.xlu0 %v1997_v51  ;;  %4159 = vmatpush3.bf16.msra.mxu1 %v2518_v53  ;;  %v186_v16 = vld [vmem:[%s5540_s2 + $0x2c] sm:$0xf]  ;;  %v2840_v34 = vsel %vm2102_vm3, %v191_v17, 0 }
 0x23a   :  { %v5207_v13 = vpop.eup %4378  ;;  %4160 = vmatprep.mubr.msk.bf16.mxu1 %vm4427_vm1, %v4426_v0  ;;  %4170 = vmatprep.subr.bf16.mxu1 %v4426_v0  ;;  %v2610_v29 = vsel %vm2102_vm3, %v186_v16, 0 }
 0x23b   :  { %v4381_v18 = vpop.eup %4380  ;;  %v1948_v38 = vpop.xlane.xlu1 %1947  ;;  %v2075_v10 = vpack.c.bf16 %v2043_v52, %v2043_v52  ;;  %v2000_v11 = vsel %vm207_vm0, %v5207_v13, 0.0 }
 0x23c   :  { %v2044_v55 = vmul.f32 %v4381_v18, %v5023_v37  ;;  %4386 = vrcp.f32 %v1948_v38  ;;  %v1945_v48 = vpop.xlane.xlu0 %1944  ;;  %2001 = vadd.xlane.f32.xlu1 %v2000_v11  ;;  %v187_v37 = vld [vmem:[%s5540_s2 + $0x30] sm:$0xf] }
 0x23d   :  { %4155 = vmatmul.mubr.msk.bf16.vlgmr.msra.gmra.mrb[80].mxu0 %vm207_vm0, %v2075_v10  ;;  %4388 = vrcp.f32 %v1945_v48  ;;  %v2656_v27 = vsel %vm2102_vm3, %v187_v37, 0  ;;  %v193_v10 = vld [vmem:[%s5540_s2 + $0x48] sm:$0xf] }
 0x23e   :  { %v4383_v15 = vpop.eup %4382  ;;  %v2076_v36 = vpack.c.bf16 %v2044_v55, %v2044_v55  ;;  %4165 = vmatpush3.bf16.msra.mxu0 %v2564_v49  ;;  %4166 = vmatprep.mubr.msk.bf16.mxu0 %vm4427_vm1, %v4426_v0  ;;  %v2932_v55 = vsel %vm2102_vm3, %v193_v10, 0 }
 0x23f   :  { %v4385_v19 = vpop.eup %4384  ;;  %4176 = vmatprep.subr.bf16.mxu0 %v4426_v0  ;;  %v2046_v26 = vmul.f32 %v4383_v15, %v5032_v28 }
 0x240   :  { %v2045_v24 = vmul.f32 %v4385_v19, %v5034_v7  ;;  %4161 = vmatmul.mubr.msk.bf16.vlgmr.msra.gmra.mrb[80].mxu1 %vm207_vm0, %v2076_v36  ;;  %v188_v7 = vld [vmem:[%s5540_s2 + $0x34] sm:$0xf] }
 0x241   :  { %4171 = vmatpush3.bf16.msra.mxu1 %v2610_v29  ;;  %4172 = vmatprep.mubr.msk.bf16.mxu1 %vm4427_vm1, %v4426_v0  ;;  %v2078_v59 = vpack.c.bf16 %v2046_v26, %v2046_v26  ;;  %v2702_v28 = vsel %vm2102_vm3, %v188_v7, 0 }
 0x242   :  { %v2077_v50 = vpack.c.bf16 %v2045_v24, %v2045_v24  ;;  %4182 = vmatprep.subr.bf16.mxu1 %v4426_v0  ;;  %v195_v24 = vld [vmem:[%s5540_s2 + $0x50] sm:$0xf] }
 0x243   :  { %v1954_v45 = vpop.xlane.xlu1 %1953 }
 0x244   :  { %4390 = vrcp.f32 %v1954_v45  ;;  %v1951_v8 = vpop.xlane.xlu0 %1950  ;;  %v3024_v45 = vsel %vm2102_vm3, %v195_v24, 0 }
 0x245   :  { %4167 = vmatmul.mubr.msk.bf16.vlgmr.msra.gmra.mrb[84].mxu0 %vm207_vm0, %v2077_v50  ;;  %4392 = vrcp.f32 %v1951_v8 }
 0x246   :  { %v4387_v3 = vpop.eup %4386  ;;  %4177 = vmatpush3.bf16.msra.mxu0 %v2656_v27  ;;  %4178 = vmatprep.mubr.msk.bf16.mxu0 %vm4427_vm1, %v4426_v0 }
 0x247   :  { %v4389_v31 = vpop.eup %4388  ;;  %4188 = vmatprep.subr.bf16.mxu0 %v4426_v0  ;;  %v2048_v46 = vmul.f32 %v4387_v3, %v5042_v61 }
 0x248   :  { %v2047_v47 = vmul.f32 %v4389_v31, %v5044_v41  ;;  %4173 = vmatmul.mubr.msk.bf16.vlgmr.msra.gmra.mrb[84].mxu1 %vm207_vm0, %v2078_v59  ;;  %v190_v41 = vld [vmem:[%s5540_s2 + $0x3c] sm:$0xf] }
 0x249   :  { %4183 = vmatpush3.bf16.msra.mxu1 %v2702_v28  ;;  %4184 = vmatprep.mubr.msk.bf16.mxu1 %vm4427_vm1, %v4426_v0  ;;  %v2080_v57 = vpack.c.bf16 %v2048_v46, %v2048_v46  ;;  %v2794_v61 = vsel %vm2102_vm3, %v190_v41, 0  ;;  %v197_v28 = vld [vmem:[%s5540_s2 + $0x58] sm:$0xf]  ;;  %v199_v41 = vld [vmem:[%s5540_s2 + $0x60] sm:$0xf] }
 0x24a   :  { %v2079_v33 = vpack.c.bf16 %v2047_v47, %v2047_v47  ;;  %4194 = vmatprep.subr.bf16.mxu1 %v4426_v0  ;;  %v3116_v58 = vsel %vm2102_vm3, %v197_v28, 0 }
 0x24b   :  { %v1960_v39 = vpop.xlane.xlu1 %1959 }
 0x24c   :  { %4394 = vrcp.f32 %v1960_v39  ;;  %v1957_v62 = vpop.xlane.xlu0 %1956 }
 0x24d   :  { %4179 = vmatmul.mubr.msk.bf16.vlgmr.msra.gmra.mrb[88].mxu0 %vm207_vm0, %v2079_v33  ;;  %4396 = vrcp.f32 %v1957_v62 }
 0x24e   :  { %v4391_v56 = vpop.eup %4390  ;;  %4189 = vmatpush3.bf16.msra.mxu0 %v2748_v22  ;;  %4190 = vmatprep.mubr.msk.bf16.mxu0 %vm4427_vm1, %v4426_v0 }
 0x24f   :  { %v4393_v4 = vpop.eup %4392  ;;  %4200 = vmatprep.subr.bf16.mxu0 %v4426_v0  ;;  %v2050_v60 = vmul.f32 %v4391_v56, %v5052_v12 }
 0x250   :  { %v2049_v43 = vmul.f32 %v4393_v4, %v5054_v6  ;;  %4185 = vmatmul.mubr.msk.bf16.vlgmr.msra.gmra.mrb[88].mxu1 %vm207_vm0, %v2080_v57  ;;  %v192_v6 = vld [vmem:[%s5540_s2 + $0x44] sm:$0xf]  ;;  %v3208_v57 = vsel %vm2102_vm3, %v199_v41, 0 }
 0x251   :  { %4195 = vmatpush3.bf16.msra.mxu1 %v2794_v61  ;;  %4196 = vmatprep.mubr.msk.bf16.mxu1 %vm4427_vm1, %v4426_v0  ;;  %v2082_v52 = vpack.c.bf16 %v2050_v60, %v2050_v60  ;;  %v2886_v12 = vsel %vm2102_vm3, %v192_v6, 0 }
 0x252   :  { %v2081_v30 = vpack.c.bf16 %v2049_v43, %v2049_v43  ;;  %4206 = vmatprep.subr.bf16.mxu1 %v4426_v0 }
 0x253   :  { %v1966_v53 = vpop.xlane.xlu1 %1965 }
 0x254   :  { %4398 = vrcp.f32 %v1966_v53  ;;  %v1963_v51 = vpop.xlane.xlu0 %1962 }
 0x255   :  { %4191 = vmatmul.mubr.msk.bf16.vlgmr.msra.gmra.mrb[92].mxu0 %vm207_vm0, %v2081_v30  ;;  %4400 = vrcp.f32 %v1963_v51  ;;  %v201_v30 = vld [vmem:[%s5540_s2 + $0x68] sm:$0xf] }
 0x256   :  { %v4395_v63 = vpop.eup %4394  ;;  %4201 = vmatpush3.bf16.msra.mxu0 %v2840_v34  ;;  %4202 = vmatprep.mubr.msk.bf16.mxu0 %vm4427_vm1, %v4426_v0  ;;  %v3300_v51 = vsel %vm2102_vm3, %v201_v30, 0 }
 0x257   :  { %v4397_v18 = vpop.eup %4396  ;;  %4212 = vmatprep.subr.bf16.mxu0 %v4426_v0  ;;  %v2052_v11 = vmul.f32 %v4395_v63, %v5062_v1 }
 0x258   :  { %v2051_v38 = vmul.f32 %v4397_v18, %v5064_v9  ;;  %4197 = vmatmul.mubr.msk.bf16.vlgmr.msra.gmra.mrb[92].mxu1 %vm207_vm0, %v2082_v52  ;;  %v194_v9 = vld [vmem:[%s5540_s2 + $0x4c] sm:$0xf] }
 0x259   :  { %4207 = vmatpush3.bf16.msra.mxu1 %v2886_v12  ;;  %4208 = vmatprep.mubr.msk.bf16.mxu1 %vm4427_vm1, %v4426_v0  ;;  %v2084_v36 = vpack.c.bf16 %v2052_v11, %v2052_v11  ;;  %v2978_v1 = vsel %vm2102_vm3, %v194_v9, 0  ;;  %v202_v52 = vld [vmem:[%s5540_s2 + $0x6c] sm:$0xf]  ;;  %v203_v11 = vld [vmem:[%s5540_s2 + $0x70] sm:$0xf] }
 0x25a   :  { %v2083_v49 = vpack.c.bf16 %v2051_v38, %v2051_v38  ;;  %4218 = vmatprep.subr.bf16.mxu1 %v4426_v0  ;;  %v3346_v38 = vsel %vm2102_vm3, %v202_v52, 0 }
 0x25b   :  { %v1972_v16 = vpop.xlane.xlu1 %1971 }
 0x25c   :  { %4402 = vrcp.f32 %v1972_v16  ;;  %v1969_v48 = vpop.xlane.xlu0 %1968 }
 0x25d   :  { %4203 = vmatmul.mubr.msk.bf16.vlgmr.msra.gmra.mrb[96].mxu0 %vm207_vm0, %v2083_v49  ;;  %4404 = vrcp.f32 %v1969_v48  ;;  %v204_v48 = vld [vmem:[%s5540_s2 + $0x74] sm:$0xf] }
 0x25e   :  { %v4399_v15 = vpop.eup %4398  ;;  %4213 = vmatpush3.bf16.msra.mxu0 %v2932_v55  ;;  %4214 = vmatprep.mubr.msk.bf16.mxu0 %vm4427_vm1, %v4426_v0  ;;  %v3392_v55 = vsel %vm2102_vm3, %v203_v11, 0 }
 0x25f   :  { %v4401_v29 = vpop.eup %4400  ;;  %4224 = vmatprep.subr.bf16.mxu0 %v4426_v0  ;;  %v2054_v37 = vmul.f32 %v4399_v15, %v5072_v25 }
 0x260   :  { %v2053_v19 = vmul.f32 %v4401_v29, %v5074_v5  ;;  %4209 = vmatmul.mubr.msk.bf16.vlgmr.msra.gmra.mrb[96].mxu1 %vm207_vm0, %v2084_v36  ;;  %v196_v5 = vld [vmem:[%s5540_s2 + $0x54] sm:$0xf] }
 0x261   :  { %4219 = vmatpush3.bf16.msra.mxu1 %v2978_v1  ;;  %4220 = vmatprep.mubr.msk.bf16.mxu1 %vm4427_vm1, %v4426_v0  ;;  %v2086_v8 = vpack.c.bf16 %v2054_v37, %v2054_v37  ;;  %v3070_v25 = vsel %vm2102_vm3, %v196_v5, 0  ;;  %v3438_v1 = vsel %vm2102_vm3, %v204_v48, 0 }
 0x262   :  { %v2085_v26 = vpack.c.bf16 %v2053_v19, %v2053_v19  ;;  %4230 = vmatprep.subr.bf16.mxu1 %v4426_v0 }
 0x263   :  { %v1978_v50 = vpop.xlane.xlu1 %1977 }
 0x264   :  { %4406 = vrcp.f32 %v1978_v50  ;;  %v1975_v27 = vpop.xlane.xlu0 %1974 }
 0x265   :  { %4215 = vmatmul.mubr.msk.bf16.vlgmr.msra.gmra.mrb[100].mxu0 %vm207_vm0, %v2085_v26  ;;  %4408 = vrcp.f32 %v1975_v27 }
 0x266   :  { %v4403_v7 = vpop.eup %4402  ;;  %4225 = vmatpush3.bf16.msra.mxu0 %v3024_v45  ;;  %4226 = vmatprep.mubr.msk.bf16.mxu0 %vm4427_vm1, %v4426_v0  ;;  %v206_v45 = vld [vmem:[%s5540_s2 + $0x7c] sm:$0xf] }
 0x267   :  { %v4405_v3 = vpop.eup %4404  ;;  %4236 = vmatprep.subr.bf16.mxu0 %v4426_v0  ;;  %v2056_v31 = vmul.f32 %v4403_v7, %v5082_v42  ;;  %v3530_v27 = vsel %vm2102_vm3, %v206_v45, 0 }
 0x268   :  { %v2055_v59 = vmul.f32 %v4405_v3, %v5084_v40  ;;  %4221 = vmatmul.mubr.msk.bf16.vlgmr.msra.gmra.mrb[100].mxu1 %vm207_vm0, %v2086_v8  ;;  %v198_v40 = vld [vmem:[%s5540_s2 + $0x5c] sm:$0xf] }
 0x269   :  { %4231 = vmatpush3.bf16.msra.mxu1 %v3070_v25  ;;  %4232 = vmatprep.mubr.msk.bf16.mxu1 %vm4427_vm1, %v4426_v0  ;;  %v2088_v33 = vpack.c.bf16 %v2056_v31, %v2056_v31  ;;  %v3162_v39 = vsel %vm2102_vm3, %v198_v40, 0 }
 0x26a   :  { %v2087_v47 = vpack.c.bf16 %v2055_v59, %v2055_v59  ;;  %4242 = vmatprep.subr.bf16.mxu1 %v4426_v0 }
 0x26d   :  { %4227 = vmatmul.mubr.msk.bf16.vlgmr.msra.gmra.mrb[104].mxu0 %vm207_vm0, %v2087_v47 }
 0x26e   :  { %v4407_v46 = vpop.eup %4406  ;;  %4237 = vmatpush3.bf16.msra.mxu0 %v3116_v58  ;;  %4238 = vmatprep.mubr.msk.bf16.mxu0 %vm4427_vm1, %v4426_v0 }
 0x26f   :  { %v4409_v42 = vpop.eup %4408  ;;  %4248 = vmatprep.subr.bf16.mxu0 %v4426_v0  ;;  %v2058_v62 = vmul.f32 %v4407_v46, %v5090_v23 }
 0x270   :  { %v2057_v22 = vmul.f32 %v4409_v42, %v5092_v21  ;;  %4233 = vmatmul.mubr.msk.bf16.vlgmr.msra.gmra.mrb[104].mxu1 %vm207_vm0, %v2088_v33  ;;  %v200_v21 = vld [vmem:[%s5540_s2 + $0x64] sm:$0xf] }
 0x271   :  { %4243 = vmatpush3.bf16.msra.mxu1 %v3162_v39  ;;  %4244 = vmatprep.mubr.msk.bf16.mxu1 %vm4427_vm1, %v4426_v0  ;;  %v2090_v61 = vpack.c.bf16 %v2058_v62, %v2058_v62  ;;  %v3254_v4 = vsel %vm2102_vm3, %v200_v21, 0 }
 0x272   :  { %v2089_v56 = vpack.c.bf16 %v2057_v22, %v2057_v22  ;;  %4254 = vmatprep.subr.bf16.mxu1 %v4426_v0 }
 0x275   :  { %4239 = vmatmul.mubr.msk.bf16.vlgmr.msra.gmra.mrb[108].mxu0 %vm207_vm0, %v2089_v56 }
 0x276   :  { %4249 = vmatpush3.bf16.msra.mxu0 %v3208_v57  ;;  %4250 = vmatprep.mubr.msk.bf16.mxu0 %vm4427_vm1, %v4426_v0 }
 0x277   :  { %4260 = vmatprep.subr.bf16.mxu0 %v4426_v0 }
 0x278   :  { %4245 = vmatmul.mubr.msk.bf16.vlgmr.msra.gmra.mrb[108].mxu1 %vm207_vm0, %v2090_v61 }
 0x279   :  { %4255 = vmatpush3.bf16.msra.mxu1 %v3254_v4  ;;  %4256 = vmatprep.mubr.msk.bf16.mxu1 %vm4427_vm1, %v4426_v0 }
 0x27a   :  { %4266 = vmatprep.subr.bf16.mxu1 %v4426_v0 }
 0x2ad   :  { %v1981_v23 = vpop.xlane.xlu0 %1980 }
 0x2ae   :  { %4410 = vrcp.f32 %v1981_v23 }
 0x2b1   :  { %v1984_v43 = vpop.xlane.xlu1 %1983 }
 0x2b2   :  { %4412 = vrcp.f32 %v1984_v43 }
 0x2b5   :  { %v1987_v17 = vpop.xlane.xlu0 %1986 }
 0x2b6   :  { %4414 = vrcp.f32 %v1987_v17 }
 0x2b8   :  { %v4411_v60 = vpop.eup %4410 }
 0x2b9   :  { %v2059_v53 = vmul.f32 %v4411_v60, %v5116_v2  ;;  %v1990_v34 = vpop.xlane.xlu1 %1989 }
 0x2ba   :  { %4416 = vrcp.f32 %v1990_v34 }
 0x2bb   :  { %v2091_v6 = vpack.c.bf16 %v2059_v53, %v2059_v53 }
 0x2bc   :  { %v4413_v63 = vpop.eup %4412 }
 0x2bd   :  { %v2060_v12 = vmul.f32 %v4413_v63, %v5129_v20  ;;  %4251 = vmatmul.mubr.msk.bf16.vlgmr.msra.gmra.mrb[112].mxu0 %vm207_vm0, %v2091_v6 }
 0x2be   :  { %v1993_v18 = vpop.xlane.xlu0 %1992  ;;  %4261 = vmatpush3.bf16.msra.mxu0 %v3300_v51  ;;  %4262 = vmatprep.mubr.msk.bf16.mxu0 %vm4427_vm1, %v4426_v0 }
 0x2bf   :  { %4418 = vrcp.f32 %v1993_v18  ;;  %v2092_v2 = vpack.c.bf16 %v2060_v12, %v2060_v12  ;;  %4272 = vmatprep.subr.bf16.mxu0 %v4426_v0 }
 0x2c0   :  { %v4415_v10 = vpop.eup %4414 }
 0x2c1   :  { %v2061_v20 = vmul.f32 %v4415_v10, %v5142_v54  ;;  %4257 = vmatmul.mubr.msk.bf16.vlgmr.msra.gmra.mrb[112].mxu1 %vm207_vm0, %v2092_v2  ;;  %v1996_v49 = vpop.xlane.xlu1 %1995 }
 0x2c2   :  { %4420 = vrcp.f32 %v1996_v49  ;;  %4267 = vmatpush3.bf16.msra.mxu1 %v3346_v38  ;;  %4268 = vmatprep.mubr.msk.bf16.mxu1 %vm4427_vm1, %v4426_v0 }
 0x2c3   :  { %v2093_v16 = vpack.c.bf16 %v2061_v20, %v2061_v20  ;;  %4278 = vmatprep.subr.bf16.mxu1 %v4426_v0 }
 0x2c4   :  { %v4417_v9 = vpop.eup %4416 }
 0x2c5   :  { %v2062_v54 = vmul.f32 %v4417_v9, %v5156_v14  ;;  %4263 = vmatmul.mubr.msk.bf16.vlgmr.msra.gmra.mrb[116].mxu0 %vm207_vm0, %v2093_v16  ;;  %v205_v14 = vld [vmem:[%s5540_s2 + $0x78] sm:$0xf] }
 0x2c6   :  { %v1999_v15 = vpop.xlane.xlu0 %1998  ;;  %4273 = vmatpush3.bf16.msra.mxu0 %v3392_v55  ;;  %4274 = vmatprep.mubr.msk.bf16.mxu0 %vm4427_vm1, %v4426_v0  ;;  %v3484_v50 = vsel %vm2102_vm3, %v205_v14, 0 }
 0x2c7   :  { %4422 = vrcp.f32 %v1999_v15  ;;  %v2094_v36 = vpack.c.bf16 %v2062_v54, %v2062_v54  ;;  %4284 = vmatprep.subr.bf16.mxu0 %v4426_v0 }
 0x2c9   :  { %v4419_v29 = vpop.eup %4418  ;;  %4269 = vmatmul.mubr.msk.bf16.vlgmr.msra.gmra.mrb[116].mxu1 %vm207_vm0, %v2094_v36  ;;  %v2002_v19 = vpop.xlane.xlu1 %2001 }
 0x2ca   :  { %v2063_v24 = vmul.f32 %v4419_v29, %v5172_v32  ;;  %4424 = vrcp.f32 %v2002_v19  ;;  %4279 = vmatpush3.bf16.msra.mxu1 %v3438_v1  ;;  %4280 = vmatprep.mubr.msk.bf16.mxu1 %vm4427_vm1, %v4426_v0 }
 0x2cb   :  { %4290 = vmatprep.subr.bf16.mxu1 %v4426_v0 }
 0x2cc   :  { %v4421_v37 = vpop.eup %4420  ;;  %v2095_v26 = vpack.c.bf16 %v2063_v24, %v2063_v24 }
 0x2cd   :  { %v2064_v5 = vmul.f32 %v4421_v37, %v5181_v44 }
 0x2ce   :  { %4275 = vmatmul.mubr.msk.bf16.vlgmr.msra.gmra.mrb[120].mxu0 %vm207_vm0, %v2095_v26 }
 0x2cf   :  { %v2096_v32 = vpack.c.bf16 %v2064_v5, %v2064_v5  ;;  %4285 = vmatpush3.bf16.msra.mxu0 %v3484_v50  ;;  %4286 = vmatprep.mubr.msk.bf16.mxu0 %vm4427_vm1, %v4426_v0 }
 0x2d1   :  { %v4423_v7 = vpop.eup %4422  ;;  %4281 = vmatmul.mubr.msk.bf16.vlgmr.msra.gmra.mrb[120].mxu1 %vm207_vm0, %v2096_v32 }
 0x2d2   :  { %v2065_v8 = vmul.f32 %v4423_v7, %v5197_v35  ;;  %4291 = vmatpush3.bf16.msra.mxu1 %v3530_v27  ;;  %4292 = vmatprep.mubr.msk.bf16.mxu1 %vm4427_vm1, %v4426_v0 }
 0x2d4   :  { %v4425_v25 = vpop.eup %4424  ;;  %v2097_v44 = vpack.c.bf16 %v2065_v8, %v2065_v8 }
 0x2d5   :  { %v2066_v3 = vmul.f32 %v4425_v25, %v5207_v13 }
 0x2d6   :  { %4287 = vmatmul.mubr.msk.bf16.vlgmr.msra.gmra.mrb[124].mxu0 %vm207_vm0, %v2097_v44 }
 0x2d7   :  { %v2098_v59 = vpack.c.bf16 %v2066_v3, %v2066_v3 }
 0x2d9   :  { %4293 = vmatmul.mubr.msk.bf16.vlgmr.msra.gmra.mrb[124].mxu1 %vm207_vm0, %v2098_v59 }
 0x2ee   :  { %v2140_v28 = vpop.f32.mrb[64].mxu0 }
 0x2ef   :  { %v3572_v31 = vpack.c.bf16 %v2140_v28, %v2140_v28  ;;  %v4108_v47 = vpop.f32.mrb[65].mxu0 }
 0x2f0   :  { %v2143_v58 = vpop.f32.mrb[66].mxu0 }
 0x2f1   :  { %3605 = vst.msk [vmem:[%s5541_s3] sm:$0xf] %vm3604_vm4, %v3572_v31  ;;  %v4109_v0 = vpop.f32.mrb[67].mxu0 }
 0x2f2   :  { %v2186_v35 = vpop.f32.mrb[64].mxu1 }
 0x2f3   :  { %v3573_v40 = vpack.c.bf16 %v2186_v35, %v2186_v35  ;;  %v4114_v46 = vpop.f32.mrb[65].mxu1 }
 0x2f4   :  { %v2189_v13 = vpop.f32.mrb[66].mxu1 }
 0x2f5   :  { %3606 = vst.msk [vmem:[%s5541_s3 + $0x4] sm:$0xf] %vm3604_vm4, %v3573_v40  ;;  %v4115_v33 = vpop.f32.mrb[67].mxu1 }
 0x2f7   :  { %v2232_v39 = vpop.f32.mrb[68].mxu0 }
 0x2f8   :  { %v3574_v42 = vpack.c.bf16 %v2232_v39, %v2232_v39  ;;  %v4120_v22 = vpop.f32.mrb[69].mxu0 }
 0x2f9   :  { %v2235_v41 = vpop.f32.mrb[70].mxu0 }
 0x2fa   :  { %3607 = vst.msk [vmem:[%s5541_s3 + $0x8] sm:$0xf] %vm3604_vm4, %v3574_v42  ;;  %v4121_v62 = vpop.f32.mrb[71].mxu0 }
 0x2fb   :  { %v2278_v56 = vpop.f32.mrb[68].mxu1 }
 0x2fc   :  { %v3575_v57 = vpack.c.bf16 %v2278_v56, %v2278_v56  ;;  %v4126_v21 = vpop.f32.mrb[69].mxu1 }
 0x2fd   :  { %v2281_v61 = vpop.f32.mrb[70].mxu1 }
 0x2fe   :  { %3608 = vst.msk [vmem:[%s5541_s3 + $0xc] sm:$0xf] %vm3604_vm4, %v3575_v57  ;;  %v4127_v4 = vpop.f32.mrb[71].mxu1 }
 0x2ff   :  { %v2324_v23 = vpop.f32.mrb[72].mxu0 }
 0x300   :  { %v3576_v43 = vpack.c.bf16 %v2324_v23, %v2324_v23  ;;  %v4132_v17 = vpop.f32.mrb[73].mxu0 }
 0x301   :  { %v2327_v60 = vpop.f32.mrb[74].mxu0 }
 0x302   :  { %3609 = vst.msk [vmem:[%s5541_s3 + $0x10] sm:$0xf] %vm3604_vm4, %v3576_v43  ;;  %v4133_v30 = vpop.f32.mrb[75].mxu0 }
 0x303   :  { %v2370_v53 = vpop.f32.mrb[72].mxu1 }
 0x304   :  { %v3577_v34 = vpack.c.bf16 %v2370_v53, %v2370_v53  ;;  %v4138_v6 = vpop.f32.mrb[73].mxu1 }
 0x305   :  { %v2373_v51 = vpop.f32.mrb[74].mxu1 }
 0x306   :  { %3610 = vst.msk [vmem:[%s5541_s3 + $0x14] sm:$0xf] %vm3604_vm4, %v3577_v34  ;;  %v4139_v63 = vpop.f32.mrb[75].mxu1 }
 0x308   :  { %v2416_v52 = vpop.f32.mrb[76].mxu0 }
 0x309   :  { %v3578_v12 = vpack.c.bf16 %v2416_v52, %v2416_v52  ;;  %v4144_v18 = vpop.f32.mrb[77].mxu0 }
 0x30a   :  { %v2419_v2 = vpop.f32.mrb[78].mxu0 }
 0x30b   :  { %3611 = vst.msk [vmem:[%s5541_s3 + $0x18] sm:$0xf] %vm3604_vm4, %v3578_v12  ;;  %v4145_v38 = vpop.f32.mrb[79].mxu0  ;;  %v2462_v10 = vpop.f32.mrb[76].mxu1 }
 0x30c   :  { %v3579_v11 = vpack.c.bf16 %v2462_v10, %v2462_v10  ;;  %v4150_v20 = vpop.f32.mrb[77].mxu1 }
 0x30d   :  { %v2465_v49 = vpop.f32.mrb[78].mxu1 }
 0x30e   :  { %3612 = vst.msk [vmem:[%s5541_s3 + $0x1c] sm:$0xf] %vm3604_vm4, %v3579_v11  ;;  %v4151_v16 = vpop.f32.mrb[79].mxu1 }
 0x310   :  { %v2508_v55 = vpop.f32.mrb[80].mxu0 }
 0x311   :  { %v3580_v9 = vpack.c.bf16 %v2508_v55, %v2508_v55  ;;  %v4156_v48 = vpop.f32.mrb[81].mxu0 }
 0x312   :  { %v2511_v54 = vpop.f32.mrb[82].mxu0 }
 0x313   :  { %3613 = vst.msk [vmem:[%s5541_s3 + $0x20] sm:$0xf] %vm3604_vm4, %v3580_v9  ;;  %v4157_v15 = vpop.f32.mrb[83].mxu0  ;;  %v2554_v36 = vpop.f32.mrb[80].mxu1 }
 0x314   :  { %v3581_v1 = vpack.c.bf16 %v2554_v36, %v2554_v36  ;;  %v4162_v29 = vpop.f32.mrb[81].mxu1 }
 0x315   :  { %v2557_v19 = vpop.f32.mrb[82].mxu1 }
 0x316   :  { %3614 = vst.msk [vmem:[%s5541_s3 + $0x24] sm:$0xf] %vm3604_vm4, %v3581_v1  ;;  %v4163_v14 = vpop.f32.mrb[83].mxu1 }
 0x318   :  { %v2600_v24 = vpop.f32.mrb[84].mxu0 }
 0x319   :  { %v3582_v37 = vpack.c.bf16 %v2600_v24, %v2600_v24  ;;  %v4168_v26 = vpop.f32.mrb[85].mxu0 }
 0x31a   :  { %v2603_v50 = vpop.f32.mrb[86].mxu0 }
 0x31b   :  { %3615 = vst.msk [vmem:[%s5541_s3 + $0x28] sm:$0xf] %vm3604_vm4, %v3582_v37  ;;  %v4169_v45 = vpop.f32.mrb[87].mxu0  ;;  %v2646_v5 = vpop.f32.mrb[84].mxu1 }
 0x31c   :  { %v3583_v32 = vpack.c.bf16 %v2646_v5, %v2646_v5  ;;  %v4174_v27 = vpop.f32.mrb[85].mxu1 }
 0x31d   :  { %v2649_v7 = vpop.f32.mrb[86].mxu1 }
 0x31e   :  { %3616 = vst.msk [vmem:[%s5541_s3 + $0x2c] sm:$0xf] %vm3604_vm4, %v3583_v32  ;;  %v4175_v8 = vpop.f32.mrb[87].mxu1 }
 0x320   :  { %v2692_v25 = vpop.f32.mrb[88].mxu0 }
 0x321   :  { %v3584_v44 = vpack.c.bf16 %v2692_v25, %v2692_v25  ;;  %v4180_v3 = vpop.f32.mrb[89].mxu0 }
 0x322   :  { %v2695_v59 = vpop.f32.mrb[90].mxu0 }
 0x323   :  { %3617 = vst.msk [vmem:[%s5541_s3 + $0x30] sm:$0xf] %vm3604_vm4, %v3584_v44  ;;  %v4181_v28 = vpop.f32.mrb[91].mxu0  ;;  %v2738_v31 = vpop.f32.mrb[88].mxu1 }
 0x324   :  { %v3585_v47 = vpack.c.bf16 %v2738_v31, %v2738_v31  ;;  %v4186_v58 = vpop.f32.mrb[89].mxu1 }
 0x325   :  { %v2741_v0 = vpop.f32.mrb[90].mxu1 }
 0x326   :  { %3618 = vst.msk [vmem:[%s5541_s3 + $0x34] sm:$0xf] %vm3604_vm4, %v3585_v47  ;;  %v4187_v35 = vpop.f32.mrb[91].mxu1 }
 0x328   :  { %v2784_v40 = vpop.f32.mrb[92].mxu0 }
 0x329   :  { %v3586_v46 = vpack.c.bf16 %v2784_v40, %v2784_v40  ;;  %v4192_v13 = vpop.f32.mrb[93].mxu0 }
 0x32a   :  { %v2787_v33 = vpop.f32.mrb[94].mxu0 }
 0x32b   :  { %3619 = vst.msk [vmem:[%s5541_s3 + $0x38] sm:$0xf] %vm3604_vm4, %v3586_v46  ;;  %v4193_v39 = vpop.f32.mrb[95].mxu0  ;;  %v2830_v42 = vpop.f32.mrb[92].mxu1 }
 0x32c   :  { %v3587_v22 = vpack.c.bf16 %v2830_v42, %v2830_v42  ;;  %v4198_v41 = vpop.f32.mrb[93].mxu1 }
 0x32d   :  { %v2833_v62 = vpop.f32.mrb[94].mxu1 }
 0x32e   :  { %3620 = vst.msk [vmem:[%s5541_s3 + $0x3c] sm:$0xf] %vm3604_vm4, %v3587_v22  ;;  %v4199_v56 = vpop.f32.mrb[95].mxu1 }
 0x330   :  { %v2876_v57 = vpop.f32.mrb[96].mxu0 }
 0x331   :  { %v3588_v21 = vpack.c.bf16 %v2876_v57, %v2876_v57  ;;  %v4204_v61 = vpop.f32.mrb[97].mxu0 }
 0x332   :  { %v2879_v4 = vpop.f32.mrb[98].mxu0 }
 0x333   :  { %3621 = vst.msk [vmem:[%s5541_s3 + $0x40] sm:$0xf] %vm3604_vm4, %v3588_v21  ;;  %v4205_v23 = vpop.f32.mrb[99].mxu0  ;;  %v2922_v43 = vpop.f32.mrb[96].mxu1 }
 0x334   :  { %v3589_v17 = vpack.c.bf16 %v2922_v43, %v2922_v43  ;;  %v4210_v60 = vpop.f32.mrb[97].mxu1 }
 0x335   :  { %v2925_v30 = vpop.f32.mrb[98].mxu1 }
 0x336   :  { %3622 = vst.msk [vmem:[%s5541_s3 + $0x44] sm:$0xf] %vm3604_vm4, %v3589_v17  ;;  %v4211_v53 = vpop.f32.mrb[99].mxu1 }
 0x338   :  { %v2968_v34 = vpop.f32.mrb[100].mxu0 }
 0x339   :  { %v3590_v6 = vpack.c.bf16 %v2968_v34, %v2968_v34  ;;  %v4216_v51 = vpop.f32.mrb[101].mxu0 }
 0x33a   :  { %v2971_v63 = vpop.f32.mrb[102].mxu0 }
 0x33b   :  { %3623 = vst.msk [vmem:[%s5541_s3 + $0x48] sm:$0xf] %vm3604_vm4, %v3590_v6  ;;  %v4217_v52 = vpop.f32.mrb[103].mxu0  ;;  %v3014_v12 = vpop.f32.mrb[100].mxu1 }
 0x33c   :  { %v3591_v18 = vpack.c.bf16 %v3014_v12, %v3014_v12  ;;  %v4222_v2 = vpop.f32.mrb[101].mxu1 }
 0x33d   :  { %v3017_v38 = vpop.f32.mrb[102].mxu1 }
 0x33e   :  { %3624 = vst.msk [vmem:[%s5541_s3 + $0x4c] sm:$0xf] %vm3604_vm4, %v3591_v18  ;;  %v4223_v10 = vpop.f32.mrb[103].mxu1 }
 0x340   :  { %v3060_v11 = vpop.f32.mrb[104].mxu0 }
 0x341   :  { %v3592_v20 = vpack.c.bf16 %v3060_v11, %v3060_v11  ;;  %v4228_v49 = vpop.f32.mrb[105].mxu0 }
 0x342   :  { %v3063_v16 = vpop.f32.mrb[106].mxu0 }
 0x343   :  { %3625 = vst.msk [vmem:[%s5541_s3 + $0x50] sm:$0xf] %vm3604_vm4, %v3592_v20  ;;  %v4229_v55 = vpop.f32.mrb[107].mxu0  ;;  %v3106_v9 = vpop.f32.mrb[104].mxu1 }
 0x344   :  { %v3593_v48 = vpack.c.bf16 %v3106_v9, %v3106_v9  ;;  %v4234_v54 = vpop.f32.mrb[105].mxu1 }
 0x345   :  { %v3109_v15 = vpop.f32.mrb[106].mxu1 }
 0x346   :  { %3626 = vst.msk [vmem:[%s5541_s3 + $0x54] sm:$0xf] %vm3604_vm4, %v3593_v48  ;;  %v4235_v36 = vpop.f32.mrb[107].mxu1 }
 0x348   :  { %v3152_v1 = vpop.f32.mrb[108].mxu0 }
 0x349   :  { %v3594_v29 = vpack.c.bf16 %v3152_v1, %v3152_v1  ;;  %v4240_v19 = vpop.f32.mrb[109].mxu0 }
 0x34a   :  { %v3155_v14 = vpop.f32.mrb[110].mxu0 }
 0x34b   :  { %3627 = vst.msk [vmem:[%s5541_s3 + $0x58] sm:$0xf] %vm3604_vm4, %v3594_v29  ;;  %v4241_v24 = vpop.f32.mrb[111].mxu0  ;;  %v3198_v37 = vpop.f32.mrb[108].mxu1 }
 0x34c   :  { %v3595_v26 = vpack.c.bf16 %v3198_v37, %v3198_v37  ;;  %v4246_v50 = vpop.f32.mrb[109].mxu1 }
 0x34d   :  { %v3201_v45 = vpop.f32.mrb[110].mxu1 }
 0x34e   :  { %3628 = vst.msk [vmem:[%s5541_s3 + $0x5c] sm:$0xf] %vm3604_vm4, %v3595_v26  ;;  %v4247_v5 = vpop.f32.mrb[111].mxu1 }
 0x390   :  { %v3244_v32 = vpop.f32.mrb[112].mxu0 }
 0x391   :  { %v3596_v27 = vpack.c.bf16 %v3244_v32, %v3244_v32  ;;  %v4252_v7 = vpop.f32.mrb[113].mxu0 }
 0x392   :  { %v3247_v8 = vpop.f32.mrb[114].mxu0 }
 0x393   :  { %3629 = vst.msk [vmem:[%s5541_s3 + $0x60] sm:$0xf] %vm3604_vm4, %v3596_v27  ;;  %v4253_v25 = vpop.f32.mrb[115].mxu0 }
 0x394   :  { %v3290_v44 = vpop.f32.mrb[112].mxu1 }
 0x395   :  { %v3597_v3 = vpack.c.bf16 %v3290_v44, %v3290_v44  ;;  %v4258_v59 = vpop.f32.mrb[113].mxu1 }
 0x396   :  { %v3293_v28 = vpop.f32.mrb[114].mxu1 }
 0x397   :  { %3630 = vst.msk [vmem:[%s5541_s3 + $0x64] sm:$0xf] %vm3604_vm4, %v3597_v3  ;;  %v4259_v31 = vpop.f32.mrb[115].mxu1 }
 0x398   :  { %v3336_v47 = vpop.f32.mrb[116].mxu0 }
 0x399   :  { %v3598_v58 = vpack.c.bf16 %v3336_v47, %v3336_v47  ;;  %v4264_v0 = vpop.f32.mrb[117].mxu0 }
 0x39a   :  { %v3339_v35 = vpop.f32.mrb[118].mxu0 }
 0x39b   :  { %3631 = vst.msk [vmem:[%s5541_s3 + $0x68] sm:$0xf] %vm3604_vm4, %v3598_v58  ;;  %v4265_v40 = vpop.f32.mrb[119].mxu0 }
 0x39c   :  { %v3382_v46 = vpop.f32.mrb[116].mxu1 }
 0x39d   :  { %v3599_v13 = vpack.c.bf16 %v3382_v46, %v3382_v46  ;;  %v4270_v33 = vpop.f32.mrb[117].mxu1 }
 0x39e   :  { %v3385_v39 = vpop.f32.mrb[118].mxu1 }
 0x39f   :  { %3632 = vst.msk [vmem:[%s5541_s3 + $0x6c] sm:$0xf] %vm3604_vm4, %v3599_v13  ;;  %v4271_v42 = vpop.f32.mrb[119].mxu1 }
 0x3a1   :  { %v3428_v22 = vpop.f32.mrb[120].mxu0 }
 0x3a2   :  { %v3600_v41 = vpack.c.bf16 %v3428_v22, %v3428_v22  ;;  %v4276_v62 = vpop.f32.mrb[121].mxu0 }
 0x3a3   :  { %v3431_v56 = vpop.f32.mrb[122].mxu0 }
 0x3a4   :  { %3633 = vst.msk [vmem:[%s5541_s3 + $0x70] sm:$0xf] %vm3604_vm4, %v3600_v41  ;;  %v4277_v57 = vpop.f32.mrb[123].mxu0  ;;  %v3474_v21 = vpop.f32.mrb[120].mxu1 }
 0x3a5   :  { %v3601_v61 = vpack.c.bf16 %v3474_v21, %v3474_v21  ;;  %v4282_v4 = vpop.f32.mrb[121].mxu1 }
 0x3a6   :  { %v3477_v23 = vpop.f32.mrb[122].mxu1 }
 0x3a7   :  { %3634 = vst.msk [vmem:[%s5541_s3 + $0x74] sm:$0xf] %vm3604_vm4, %v3601_v61  ;;  %v4283_v43 = vpop.f32.mrb[123].mxu1 }
 0x3a9   :  { %v3520_v17 = vpop.f32.mrb[124].mxu0 }
 0x3aa   :  { %v3602_v60 = vpack.c.bf16 %v3520_v17, %v3520_v17  ;;  %v4288_v30 = vpop.f32.mrb[125].mxu0 }
 0x3ab   :  { %v3523_v53 = vpop.f32.mrb[126].mxu0 }
 0x3ac   :  { %3635 = vst.msk [vmem:[%s5541_s3 + $0x78] sm:$0xf] %vm3604_vm4, %v3602_v60  ;;  %v4289_v34 = vpop.f32.mrb[127].mxu0  ;;  %v3566_v6 = vpop.f32.mrb[124].mxu1 }
 0x3ad   :  { %v3603_v51 = vpack.c.bf16 %v3566_v6, %v3566_v6  ;;  %v4294_v63 = vpop.f32.mrb[125].mxu1 }
 0x3ae   :  { %v3569_v52 = vpop.f32.mrb[126].mxu1 }
 0x3af   :  { %3636 = vst.msk [vmem:[%s5541_s3 + $0x7c] sm:$0xf] %vm3604_vm4, %v3603_v51  ;;  %v4295_v12 = vpop.f32.mrb[127].mxu1 }

// kernel: _lambda_.40
= control target key start
LH: loop header
LB: loop body
LE: loop exit
PB: predicated region body
PF: predicated region fallthrough
CT: control target
= control target key end

     0   :  { %s290_s1 = inlined_call_operand.vmem [shape: bf16[128,128], index: 1, kind: input, shape index: {}]   ;;  %s291_s0 = inlined_call_operand.vmem [shape: bf16[24,128], index: 0, kind: input, shape index: {}]   ;;  %s292_s2 = inlined_call_operand.vmem [shape: f32[1,128], index: 2, kind: input, shape index: {}]   ;;  %s293_s3 = inlined_call_operand.vmem [shape: f32[24,128], index: 3, kind: input, shape index: {}]   ;;  %s294_s4 = inlined_call_operand.vmem [shape: f32[24,128], index: 4, kind: output, shape index: {}]  }
   0x1   :  { %v204_v0 = vld [vmem:[%s290_s1] sm:$0xff]   ;;  %v205_v1 = vld [vmem:[%s290_s1 + $0x8] sm:$0xff]   ;;  %v206_v2 = vld [vmem:[%s290_s1 + $0x10] sm:$0xff]  }
   0x2   :  { %184 = vmatprep.subr.bf16.mxu0 %v204_v0  ;;  %v207_v3 = vld [vmem:[%s290_s1 + $0x18] sm:$0xff]   ;;  %v212_v4 = vld [vmem:[%s291_s0] sm:$0xff]   ;;  %v209_v6 = vld [vmem:[%s290_s1 + $0x28] sm:$0xff]  }
   0x3   :  { %185 = vmatpush3.bf16.msra.mxu0 %v204_v0  ;;  %200 = vmatprep.mubr.bf16.mxu0 %v212_v4  ;;  %v208_v5 = vld [vmem:[%s290_s1 + $0x20] sm:$0xff]   ;;  %v210_v7 = vld [vmem:[%s290_s1 + $0x30] sm:$0xff]   ;;  %v211_v8 = vld [vmem:[%s290_s1 + $0x38] sm:$0xff]  }
   0x4   :  { %186 = vmatprep.subr.bf16.mxu0 %v205_v1  ;;  %v213_v9 = vld [vmem:[%s291_s0 + $0x8] ss:$0 sps:$4 sm:$0xff]   ;;  %v163_v10 = vld [vmem:[%s292_s2] ss:$0 sm:$0xff]  ;;  %v152_v12 = vld [vmem:[%s293_s3 + $0x10] sm:$0xff] }
   0x5   :  { %v150_v15 = vld [vmem:[%s293_s3] sm:$0xff]  ;;  %v151_v20 = vld [vmem:[%s293_s3 + $0x8] sm:$0xff] }
   0x7   :  { %187 = vmatpush3.bf16.msra.mxu0 %v205_v1 }
   0x8   :  { %188 = vmatprep.subr.bf16.mxu0 %v206_v2 }
   0xb   :  { %189 = vmatpush3.bf16.msra.mxu0 %v206_v2 }
   0xc   :  { %190 = vmatprep.subr.bf16.mxu0 %v207_v3 }
   0xf   :  { %191 = vmatpush3.bf16.msra.mxu0 %v207_v3 }
  0x10   :  { %192 = vmatprep.subr.bf16.mxu0 %v208_v5 }
  0x13   :  { %193 = vmatpush3.bf16.msra.mxu0 %v208_v5 }
  0x14   :  { %194 = vmatprep.subr.bf16.mxu0 %v209_v6 }
  0x17   :  { %195 = vmatpush3.bf16.msra.mxu0 %v209_v6 }
  0x18   :  { %196 = vmatprep.subr.bf16.mxu0 %v210_v7 }
  0x1b   :  { %197 = vmatpush3.bf16.msra.mxu0 %v210_v7 }
  0x1c   :  { %198 = vmatprep.subr.bf16.mxu0 %v211_v8 }
  0x1f   :  { %199 = vmatpush3.bf16.msra.mxu0 %v211_v8 }
  0x22   :  { %201 = vmatmul.mubr.bf16.vlgmr.msra.gmra.mrb[0].mxu0 %v213_v9 }
  0xf5   :  { %v202_v11 = vpop.f32.mrb[0].mxu0 }
  0xf6   :  { %v145_v13 = vadd.f32 %v202_v11, %v163_v10  ;;  %v136_v14 = vpop.f32.mrb[1].mxu0 }
  0xf7   :  { %v137_v16 = vadd.f32 %v163_v10, %v136_v14  ;;  %v203_v17 = vpop.f32.mrb[2].mxu0 }
  0xf8   :  { %v155_v18 = vadd.f32 %v152_v12, %v145_v13  ;;  %v139_v19 = vpop.f32.mrb[3].mxu0 }
  0xf9   :  { %v153_v21 = vadd.f32 %v150_v15, %v137_v16  ;;  %v140_v22 = vadd.f32 %v163_v10, %v139_v19 }
  0xfa   :  { %158 = vst [vmem:[%s294_s4 + $0x10] sm:$0xff] %v155_v18 }
  0xfb   :  { %156 = vst [vmem:[%s294_s4] sm:$0xff] %v153_v21  ;;  %v154_v23 = vadd.f32 %v151_v20, %v140_v22 }
  0xfd   :  { %157 = vst [vmem:[%s294_s4 + $0x8] sm:$0xff] %v154_v23 }

// kernel: _lambda_.36
= control target key start
LH: loop header
LB: loop body
LE: loop exit
PB: predicated region body
PF: predicated region fallthrough
CT: control target
= control target key end

     0   :  { %vm111_vm0 = vcmask 64512   ;;  %v2226_v0 = vmov 0.0   ;;  %vm2227_vm1 = vmmov 0   ;;  %vm1062_vm3 = vcmask 1043456   ;;  %s2829_s1 = inlined_call_operand.vmem [shape: bf16[4,4,8,8], index: 1, kind: input, shape index: {}]   ;;  %s2830_s0 = inlined_call_operand.vmem [shape: bf16[4,4,8,8], index: 0, kind: input, shape index: {}]   ;;  %s2831_s2 = inlined_call_operand.vmem [shape: bf16[4,4,8,8], index: 2, kind: input, shape index: {}]   ;;  %s2832_s3 = inlined_call_operand.vmem [shape: bf16[4,4,8,8], index: 3, kind: output, shape index: {}]  }
   0x1   :  { %1968 = vmatprep.subr.bf16.mxu0 %v2226_v0  ;;  %1974 = vmatprep.subr.bf16.mxu1 %v2226_v0  ;;  %v79_v1 = vld [vmem:[%s2829_s1] sm:$0xf]  ;;  %v80_v2 = vld [vmem:[%s2829_s1 + $0x4] sm:$0xf]  ;;  %v1897_v8 = vld [vmem:[%s2830_s0 + $0x8] sm:$0xff]   ;;  %vm1812_vm4 = vcmask 60416  }
   0x2   :  { %v1866_v3 = vld [vmem:[%s2830_s0] sm:$0xff]   ;;  %v116_v4 = vsel %vm111_vm0, %v79_v1, 0  ;;  %v162_v5 = vsel %vm111_vm0, %v80_v2, 0  ;;  %1970 = vmatprep.mubr.msk.bf16.mxu0 %vm2227_vm1, %v2226_v0  ;;  %1976 = vmatprep.mubr.msk.bf16.mxu1 %vm2227_vm1, %v2226_v0  ;;  %v81_v11 = vld [vmem:[%s2829_s1 + $0x8] sm:$0xf]  ;;  %v1871_v15 = vunpack.c.l.bf16 %v1897_v8  ;;  %v1872_v16 = vunpack.c.h.bf16 %v1897_v8  ;;  %v1898_v21 = vld [vmem:[%s2830_s0 + $0x10] sm:$0xff]  }
   0x3   :  { %v1867_v6 = vunpack.c.l.bf16 %v1866_v3  ;;  %v1868_v7 = vunpack.c.h.bf16 %v1866_v3  ;;  %1969 = vmatpush3.bf16.xpose.msra.mxu0 %v116_v4  ;;  %1975 = vmatpush3.bf16.xpose.msra.mxu1 %v162_v5  ;;  %v82_v12 = vld [vmem:[%s2829_s1 + $0xc] sm:$0xf]  ;;  %v208_v17 = vsel %vm111_vm0, %v81_v11, 0  ;;  %v83_v22 = vld [vmem:[%s2829_s1 + $0x10] sm:$0xf]  ;;  %v1875_v26 = vunpack.c.l.bf16 %v1898_v21  ;;  %v1899_v32 = vld [vmem:[%s2830_s0 + $0x18] sm:$0xff]  }
   0x4   :  { %1980 = vmatprep.subr.bf16.mxu0 %v2226_v0  ;;  %1986 = vmatprep.subr.bf16.mxu1 %v2226_v0  ;;  %v254_v18 = vsel %vm111_vm0, %v82_v12, 0  ;;  %v49_v19 = vmul.f32 0.35355338, %v1871_v15  ;;  %v50_v20 = vmul.f32 0.35355338, %v1872_v16  ;;  %v1876_v27 = vunpack.c.h.bf16 %v1898_v21  ;;  %v1900_v43 = vld [vmem:[%s2830_s0 + $0x20] sm:$0xff]  }
   0x5   :  { %v47_v9 = vmul.f32 0.35355338, %v1867_v6  ;;  %v48_v10 = vmul.f32 0.35355338, %v1868_v7  ;;  %v84_v23 = vld [vmem:[%s2829_s1 + $0x14] sm:$0xf]  ;;  %v1879_v37 = vunpack.c.l.bf16 %v1899_v32  ;;  %v1880_v38 = vunpack.c.h.bf16 %v1899_v32 }
   0x6   :  { %v65_v24 = vpack.c.bf16 %v49_v19, %v49_v19  ;;  %v66_v25 = vpack.c.bf16 %v50_v20, %v50_v20  ;;  %v300_v28 = vsel %vm111_vm0, %v83_v22, 0  ;;  %v346_v29 = vsel %vm111_vm0, %v84_v23, 0  ;;  %v85_v33 = vld [vmem:[%s2829_s1 + $0x18] sm:$0xf]  ;;  %v86_v34 = vld [vmem:[%s2829_s1 + $0x1c] sm:$0xf] }
   0x7   :  { %v63_v13 = vpack.c.bf16 %v47_v9, %v47_v9  ;;  %v64_v14 = vpack.c.bf16 %v48_v10, %v48_v10  ;;  %v51_v30 = vmul.f32 0.35355338, %v1875_v26  ;;  %v52_v31 = vmul.f32 0.35355338, %v1876_v27  ;;  %v87_v44 = vld [vmem:[%s2829_s1 + $0x20] sm:$0xf] }
   0x8   :  { %v392_v39 = vsel %vm111_vm0, %v85_v33, 0  ;;  %v438_v40 = vsel %vm111_vm0, %v86_v34, 0  ;;  %v53_v41 = vmul.f32 0.35355338, %v1879_v37  ;;  %v54_v42 = vmul.f32 0.35355338, %v1880_v38 }
   0x9   :  { %v67_v35 = vpack.c.bf16 %v51_v30, %v51_v30  ;;  %v68_v36 = vpack.c.bf16 %v52_v31, %v52_v31  ;;  %v88_v45 = vld [vmem:[%s2829_s1 + $0x24] sm:$0xf]  ;;  %v1883_v48 = vunpack.c.l.bf16 %v1900_v43  ;;  %v1884_v49 = vunpack.c.h.bf16 %v1900_v43  ;;  %v1901_v54 = vld [vmem:[%s2830_s0 + $0x28] sm:$0xff]   ;;  %v1902_v2 = vld [vmem:[%s2830_s0 + $0x30] sm:$0xff]  }
   0xa   :  { %1971 = vmatmul.mubr.msk.bf16.vlgmr.msra.gmra.mrb[0].mxu0 %vm111_vm0, %v63_v13  ;;  %1977 = vmatmul.mubr.msk.bf16.vlgmr.msra.gmra.mrb[0].mxu1 %vm111_vm0, %v64_v14  ;;  %v69_v46 = vpack.c.bf16 %v53_v41, %v53_v41  ;;  %v70_v47 = vpack.c.bf16 %v54_v42, %v54_v42  ;;  %v484_v50 = vsel %vm111_vm0, %v87_v44, 0  ;;  %v530_v51 = vsel %vm111_vm0, %v88_v45, 0  ;;  %v89_v55 = vld [vmem:[%s2829_s1 + $0x28] sm:$0xf]  ;;  %v90_v56 = vld [vmem:[%s2829_s1 + $0x2c] sm:$0xf] }
   0xb   :  { %1981 = vmatpush3.bf16.xpose.msra.mxu0 %v208_v17  ;;  %1987 = vmatpush3.bf16.xpose.msra.mxu1 %v254_v18  ;;  %v55_v52 = vmul.f32 0.35355338, %v1883_v48  ;;  %v56_v53 = vmul.f32 0.35355338, %v1884_v49  ;;  %v1887_v59 = vunpack.c.l.bf16 %v1901_v54  ;;  %v1888_v60 = vunpack.c.h.bf16 %v1901_v54  ;;  %v91_v3 = vld [vmem:[%s2829_s1 + $0x30] sm:$0xf] }
   0xc   :  { %1982 = vmatprep.mubr.msk.bf16.mxu0 %vm2227_vm1, %v2226_v0  ;;  %1988 = vmatprep.mubr.msk.bf16.mxu1 %vm2227_vm1, %v2226_v0  ;;  %v576_v61 = vsel %vm111_vm0, %v89_v55, 0  ;;  %v622_v62 = vsel %vm111_vm0, %v90_v56, 0  ;;  %v92_v4 = vld [vmem:[%s2829_s1 + $0x34] sm:$0xf]  ;;  %v1891_v7 = vunpack.c.l.bf16 %v1902_v2  ;;  %v1892_v8 = vunpack.c.h.bf16 %v1902_v2  ;;  %v1903_v13 = vld [vmem:[%s2830_s0 + $0x38] sm:$0xff]  }
   0xd   :  { %1992 = vmatprep.subr.bf16.mxu0 %v2226_v0  ;;  %1998 = vmatprep.subr.bf16.mxu1 %v2226_v0  ;;  %v71_v57 = vpack.c.bf16 %v55_v52, %v55_v52  ;;  %v72_v58 = vpack.c.bf16 %v56_v53, %v56_v53  ;;  %v57_v63 = vmul.f32 0.35355338, %v1887_v59  ;;  %v58_v1 = vmul.f32 0.35355338, %v1888_v60  ;;  %v93_v14 = vld [vmem:[%s2829_s1 + $0x38] sm:$0xf] }
   0xe   :  { %v668_v9 = vsel %vm111_vm0, %v91_v3, 0  ;;  %v714_v10 = vsel %vm111_vm0, %v92_v4, 0  ;;  %v59_v11 = vmul.f32 0.35355338, %v1891_v7  ;;  %v60_v12 = vmul.f32 0.35355338, %v1892_v8 }
   0xf   :  { %v73_v5 = vpack.c.bf16 %v57_v63, %v57_v63  ;;  %v74_v6 = vpack.c.bf16 %v58_v1, %v58_v1  ;;  %v94_v15 = vld [vmem:[%s2829_s1 + $0x3c] sm:$0xf]  ;;  %v1895_v18 = vunpack.c.l.bf16 %v1903_v13  ;;  %v1896_v19 = vunpack.c.h.bf16 %v1903_v13 }
  0x10   :  { %v75_v16 = vpack.c.bf16 %v59_v11, %v59_v11  ;;  %v76_v17 = vpack.c.bf16 %v60_v12, %v60_v12  ;;  %v760_v20 = vsel %vm111_vm0, %v93_v14, 0  ;;  %v806_v21 = vsel %vm111_vm0, %v94_v15, 0 }
  0x11   :  { %v61_v22 = vmul.f32 0.35355338, %v1895_v18  ;;  %v62_v23 = vmul.f32 0.35355338, %v1896_v19  ;;  %v848_v26 = vlaneseq }
  0x12   :  { %1983 = vmatmul.mubr.msk.bf16.vlgmr.msra.gmra.mrb[4].mxu0 %vm111_vm0, %v65_v24  ;;  %1989 = vmatmul.mubr.msk.bf16.vlgmr.msra.gmra.mrb[4].mxu1 %vm111_vm0, %v66_v25 }
  0x13   :  { %1993 = vmatpush3.bf16.xpose.msra.mxu0 %v300_v28  ;;  %1999 = vmatpush3.bf16.xpose.msra.mxu1 %v346_v29  ;;  %v77_v24 = vpack.c.bf16 %v61_v22, %v61_v22  ;;  %v78_v25 = vpack.c.bf16 %v62_v23, %v62_v23  ;;  %v2406_v27 = vand.u32 127, %v848_v26 }
  0x14   :  { %1994 = vmatprep.mubr.msk.bf16.mxu0 %vm2227_vm1, %v2226_v0  ;;  %2000 = vmatprep.mubr.msk.bf16.mxu1 %vm2227_vm1, %v2226_v0 }
  0x15   :  { %2004 = vmatprep.subr.bf16.mxu0 %v2226_v0  ;;  %2010 = vmatprep.subr.bf16.mxu1 %v2226_v0  ;;  %vm850_vm2 = vcmp.lt.s32.totalorder %v2406_v27, 5 }
  0x1a   :  { %1995 = vmatmul.mubr.msk.bf16.vlgmr.msra.gmra.mrb[8].mxu0 %vm111_vm0, %v67_v35  ;;  %2001 = vmatmul.mubr.msk.bf16.vlgmr.msra.gmra.mrb[8].mxu1 %vm111_vm0, %v68_v36 }
  0x1b   :  { %2005 = vmatpush3.bf16.xpose.msra.mxu0 %v392_v39  ;;  %2011 = vmatpush3.bf16.xpose.msra.mxu1 %v438_v40 }
  0x1c   :  { %2006 = vmatprep.mubr.msk.bf16.mxu0 %vm2227_vm1, %v2226_v0  ;;  %2012 = vmatprep.mubr.msk.bf16.mxu1 %vm2227_vm1, %v2226_v0 }
  0x1d   :  { %2016 = vmatprep.subr.bf16.mxu0 %v2226_v0  ;;  %2022 = vmatprep.subr.bf16.mxu1 %v2226_v0 }
  0x22   :  { %2007 = vmatmul.mubr.msk.bf16.vlgmr.msra.gmra.mrb[12].mxu0 %vm111_vm0, %v69_v46  ;;  %2013 = vmatmul.mubr.msk.bf16.vlgmr.msra.gmra.mrb[12].mxu1 %vm111_vm0, %v70_v47 }
  0x23   :  { %2017 = vmatpush3.bf16.xpose.msra.mxu0 %v484_v50  ;;  %2023 = vmatpush3.bf16.xpose.msra.mxu1 %v530_v51 }
  0x24   :  { %2018 = vmatprep.mubr.msk.bf16.mxu0 %vm2227_vm1, %v2226_v0  ;;  %2024 = vmatprep.mubr.msk.bf16.mxu1 %vm2227_vm1, %v2226_v0 }
  0x25   :  { %2028 = vmatprep.subr.bf16.mxu0 %v2226_v0  ;;  %2034 = vmatprep.subr.bf16.mxu1 %v2226_v0 }
  0x2a   :  { %2019 = vmatmul.mubr.msk.bf16.vlgmr.msra.gmra.mrb[16].mxu0 %vm111_vm0, %v71_v57  ;;  %2025 = vmatmul.mubr.msk.bf16.vlgmr.msra.gmra.mrb[16].mxu1 %vm111_vm0, %v72_v58 }
  0x2b   :  { %2029 = vmatpush3.bf16.xpose.msra.mxu0 %v576_v61  ;;  %2035 = vmatpush3.bf16.xpose.msra.mxu1 %v622_v62 }
  0x2c   :  { %2030 = vmatprep.mubr.msk.bf16.mxu0 %vm2227_vm1, %v2226_v0  ;;  %2036 = vmatprep.mubr.msk.bf16.mxu1 %vm2227_vm1, %v2226_v0 }
  0x2d   :  { %2040 = vmatprep.subr.bf16.mxu0 %v2226_v0  ;;  %2046 = vmatprep.subr.bf16.mxu1 %v2226_v0 }
  0x32   :  { %2031 = vmatmul.mubr.msk.bf16.vlgmr.msra.gmra.mrb[20].mxu0 %vm111_vm0, %v73_v5  ;;  %2037 = vmatmul.mubr.msk.bf16.vlgmr.msra.gmra.mrb[20].mxu1 %vm111_vm0, %v74_v6 }
  0x33   :  { %2041 = vmatpush3.bf16.xpose.msra.mxu0 %v668_v9  ;;  %2047 = vmatpush3.bf16.xpose.msra.mxu1 %v714_v10 }
  0x34   :  { %2042 = vmatprep.mubr.msk.bf16.mxu0 %vm2227_vm1, %v2226_v0  ;;  %2048 = vmatprep.mubr.msk.bf16.mxu1 %vm2227_vm1, %v2226_v0 }
  0x35   :  { %2052 = vmatprep.subr.bf16.mxu0 %v2226_v0  ;;  %2058 = vmatprep.subr.bf16.mxu1 %v2226_v0 }
  0x3a   :  { %2043 = vmatmul.mubr.msk.bf16.vlgmr.msra.gmra.mrb[24].mxu0 %vm111_vm0, %v75_v16  ;;  %2049 = vmatmul.mubr.msk.bf16.vlgmr.msra.gmra.mrb[24].mxu1 %vm111_vm0, %v76_v17 }
  0x3b   :  { %2053 = vmatpush3.bf16.xpose.msra.mxu0 %v760_v20  ;;  %2059 = vmatpush3.bf16.xpose.msra.mxu1 %v806_v21 }
  0x3c   :  { %2054 = vmatprep.mubr.msk.bf16.mxu0 %vm2227_vm1, %v2226_v0  ;;  %2060 = vmatprep.mubr.msk.bf16.mxu1 %vm2227_vm1, %v2226_v0 }
  0x3d   :  { %2064 = vmatprep.subr.bf16.mxu0 %v2226_v0  ;;  %2070 = vmatprep.subr.bf16.mxu1 %v2226_v0 }
  0x42   :  { %2055 = vmatmul.mubr.msk.bf16.vlgmr.msra.gmra.mrb[28].mxu0 %vm111_vm0, %v77_v24  ;;  %2061 = vmatmul.mubr.msk.bf16.vlgmr.msra.gmra.mrb[28].mxu1 %vm111_vm0, %v78_v25 }
  0x43   :  { %2066 = vmatprep.mubr.msk.bf16.mxu0 %vm2227_vm1, %v2226_v0  ;;  %2072 = vmatprep.mubr.msk.bf16.mxu1 %vm2227_vm1, %v2226_v0 }
  0xdd   :  { %v152_v28 = vpop.f32.mrb[0].mxu0  ;;  %v198_v29 = vpop.f32.mrb[0].mxu1 }
  0xde   :  { %v2411_v30 = vsel %vm850_vm2, %v152_v28, -1e+30  ;;  %v1972_v31 = vpop.f32.mrb[1].mxu0  ;;  %v2415_v32 = vsel %vm850_vm2, %v198_v29, -1e+30  ;;  %v1978_v33 = vpop.f32.mrb[1].mxu1 }
  0xdf   :  { %v155_v34 = vpop.f32.mrb[2].mxu0  ;;  %v867_v35 = vsel %vm111_vm0, %v2411_v30, -inf  ;;  %v201_v36 = vpop.f32.mrb[2].mxu1  ;;  %v870_v39 = vsel %vm111_vm0, %v2415_v32, -inf }
  0xe0   :  { %868 = vmax.xlane.f32.xlu0 %v867_v35  ;;  %v1973_v37 = vpop.f32.mrb[3].mxu0  ;;  %v1979_v38 = vpop.f32.mrb[3].mxu1 }
  0xe4   :  { %871 = vmax.xlane.f32.xlu0 %v870_v39 }
  0xe5   :  { %v244_v40 = vpop.f32.mrb[4].mxu0  ;;  %v290_v41 = vpop.f32.mrb[4].mxu1 }
  0xe6   :  { %v2423_v42 = vsel %vm850_vm2, %v244_v40, -1e+30  ;;  %v1984_v43 = vpop.f32.mrb[5].mxu0  ;;  %v2427_v44 = vsel %vm850_vm2, %v290_v41, -1e+30  ;;  %v1990_v45 = vpop.f32.mrb[5].mxu1 }
  0xe7   :  { %v247_v46 = vpop.f32.mrb[6].mxu0  ;;  %v873_v47 = vsel %vm111_vm0, %v2423_v42, -inf  ;;  %v293_v48 = vpop.f32.mrb[6].mxu1  ;;  %v876_v51 = vsel %vm111_vm0, %v2427_v44, -inf }
  0xe8   :  { %874 = vmax.xlane.f32.xlu1 %v873_v47  ;;  %v1985_v49 = vpop.f32.mrb[7].mxu0  ;;  %v1991_v50 = vpop.f32.mrb[7].mxu1 }
  0xec   :  { %877 = vmax.xlane.f32.xlu1 %v876_v51 }
  0xed   :  { %v336_v52 = vpop.f32.mrb[8].mxu0  ;;  %v382_v53 = vpop.f32.mrb[8].mxu1 }
  0xee   :  { %v2435_v54 = vsel %vm850_vm2, %v336_v52, -1e+30  ;;  %v2439_v55 = vsel %vm850_vm2, %v382_v53, -1e+30  ;;  %v2002_v56 = vpop.f32.mrb[9].mxu1  ;;  %v1996_v57 = vpop.f32.mrb[9].mxu0 }
  0xef   :  { %v882_v58 = vsel %vm111_vm0, %v2439_v55, -inf  ;;  %v879_v59 = vsel %vm111_vm0, %v2435_v54, -inf  ;;  %v339_v60 = vpop.f32.mrb[10].mxu0  ;;  %v385_v61 = vpop.f32.mrb[10].mxu1 }
  0xf0   :  { %883 = vmax.xlane.f32.xlu1 %v882_v58  ;;  %880 = vmax.xlane.f32.xlu0 %v879_v59  ;;  %v1997_v62 = vpop.f32.mrb[11].mxu0  ;;  %v2003_v63 = vpop.f32.mrb[11].mxu1 }
  0xf5   :  { %v428_v1 = vpop.f32.mrb[12].mxu0  ;;  %v474_v2 = vpop.f32.mrb[12].mxu1 }
  0xf6   :  { %v2447_v3 = vsel %vm850_vm2, %v428_v1, -1e+30  ;;  %v2451_v4 = vsel %vm850_vm2, %v474_v2, -1e+30  ;;  %v2014_v5 = vpop.f32.mrb[13].mxu1  ;;  %v2008_v6 = vpop.f32.mrb[13].mxu0 }
  0xf7   :  { %v888_v7 = vsel %vm111_vm0, %v2451_v4, -inf  ;;  %v885_v8 = vsel %vm111_vm0, %v2447_v3, -inf  ;;  %v431_v9 = vpop.f32.mrb[14].mxu0  ;;  %v477_v10 = vpop.f32.mrb[14].mxu1 }
  0xf8   :  { %889 = vmax.xlane.f32.xlu1 %v888_v7  ;;  %886 = vmax.xlane.f32.xlu0 %v885_v8  ;;  %v2009_v11 = vpop.f32.mrb[15].mxu0  ;;  %v2015_v12 = vpop.f32.mrb[15].mxu1 }
  0xfd   :  { %v520_v13 = vpop.f32.mrb[16].mxu0  ;;  %v566_v14 = vpop.f32.mrb[16].mxu1 }
  0xfe   :  { %v2459_v15 = vsel %vm850_vm2, %v520_v13, -1e+30  ;;  %v2463_v16 = vsel %vm850_vm2, %v566_v14, -1e+30  ;;  %v2026_v17 = vpop.f32.mrb[17].mxu1  ;;  %v2020_v18 = vpop.f32.mrb[17].mxu0 }
  0xff   :  { %v894_v19 = vsel %vm111_vm0, %v2463_v16, -inf  ;;  %v891_v20 = vsel %vm111_vm0, %v2459_v15, -inf  ;;  %v523_v21 = vpop.f32.mrb[18].mxu0  ;;  %v569_v22 = vpop.f32.mrb[18].mxu1 }
 0x100   :  { %895 = vmax.xlane.f32.xlu1 %v894_v19  ;;  %892 = vmax.xlane.f32.xlu0 %v891_v20  ;;  %v2021_v23 = vpop.f32.mrb[19].mxu0  ;;  %v2027_v24 = vpop.f32.mrb[19].mxu1 }
 0x105   :  { %v612_v25 = vpop.f32.mrb[20].mxu0  ;;  %v658_v26 = vpop.f32.mrb[20].mxu1 }
 0x106   :  { %v2471_v28 = vsel %vm850_vm2, %v612_v25, -1e+30  ;;  %v2475_v29 = vsel %vm850_vm2, %v658_v26, -1e+30  ;;  %v2038_v31 = vpop.f32.mrb[21].mxu1  ;;  %v2032_v33 = vpop.f32.mrb[21].mxu0 }
 0x107   :  { %v900_v34 = vsel %vm111_vm0, %v2475_v29, -inf  ;;  %v897_v35 = vsel %vm111_vm0, %v2471_v28, -inf  ;;  %v615_v36 = vpop.f32.mrb[22].mxu0  ;;  %v661_v37 = vpop.f32.mrb[22].mxu1 }
 0x108   :  { %901 = vmax.xlane.f32.xlu1 %v900_v34  ;;  %898 = vmax.xlane.f32.xlu0 %v897_v35  ;;  %v2033_v38 = vpop.f32.mrb[23].mxu0  ;;  %v2039_v39 = vpop.f32.mrb[23].mxu1 }
 0x10d   :  { %v704_v40 = vpop.f32.mrb[24].mxu0  ;;  %v750_v41 = vpop.f32.mrb[24].mxu1 }
 0x10e   :  { %v2483_v43 = vsel %vm850_vm2, %v704_v40, -1e+30  ;;  %v2487_v45 = vsel %vm850_vm2, %v750_v41, -1e+30  ;;  %v2050_v46 = vpop.f32.mrb[25].mxu1  ;;  %v2044_v47 = vpop.f32.mrb[25].mxu0 }
 0x10f   :  { %v906_v48 = vsel %vm111_vm0, %v2487_v45, -inf  ;;  %v903_v49 = vsel %vm111_vm0, %v2483_v43, -inf  ;;  %v707_v50 = vpop.f32.mrb[26].mxu0  ;;  %v753_v51 = vpop.f32.mrb[26].mxu1 }
 0x110   :  { %907 = vmax.xlane.f32.xlu1 %v906_v48  ;;  %904 = vmax.xlane.f32.xlu0 %v903_v49  ;;  %v2045_v52 = vpop.f32.mrb[27].mxu0  ;;  %v2051_v53 = vpop.f32.mrb[27].mxu1 }
 0x115   :  { %v796_v56 = vpop.f32.mrb[28].mxu0  ;;  %v842_v57 = vpop.f32.mrb[28].mxu1 }
 0x116   :  { %v2495_v58 = vsel %vm850_vm2, %v796_v56, -1e+30  ;;  %v2499_v59 = vsel %vm850_vm2, %v842_v57, -1e+30  ;;  %v2062_v60 = vpop.f32.mrb[29].mxu1  ;;  %v2056_v61 = vpop.f32.mrb[29].mxu0 }
 0x117   :  { %v912_v62 = vsel %vm111_vm0, %v2499_v59, -inf  ;;  %v909_v63 = vsel %vm111_vm0, %v2495_v58, -inf  ;;  %v799_v1 = vpop.f32.mrb[30].mxu0  ;;  %v845_v2 = vpop.f32.mrb[30].mxu1  ;;  %v95_v61 = vld [vmem:[%s2831_s2] sm:$0xf] }
 0x118   :  { %913 = vmax.xlane.f32.xlu1 %v912_v62  ;;  %910 = vmax.xlane.f32.xlu0 %v909_v63  ;;  %v2057_v5 = vpop.f32.mrb[31].mxu0  ;;  %v2063_v6 = vpop.f32.mrb[31].mxu1  ;;  %v1064_v1 = vsel %vm1062_vm3, %v95_v61, 0 }
 0x119   :  { %2065 = vmatpush3.bf16.msra.mxu0 %v1064_v1  ;;  %v109_v1 = vld [vmem:[%s2831_s2 + $0x38] sm:$0xf] }
 0x11a   :  { %2076 = vmatprep.subr.bf16.mxu0 %v2226_v0 }
 0x16d   :  { %v869_v7 = vpop.xlane.xlu0 %868 }
 0x16e   :  { %v915_v8 = vsub.f32 %v2411_v30, %v869_v7 }
 0x170   :  { %v931_v27 = vmul.f32 1.442695, %v915_v8 }
 0x171   :  { %v872_v9 = vpop.xlane.xlu0 %871 }
 0x172   :  { %2162 = vpow2.f32 %v931_v27  ;;  %v916_v10 = vsub.f32 %v2415_v32, %v872_v9 }
 0x174   :  { %v933_v11 = vmul.f32 1.442695, %v916_v10 }
 0x175   :  { %v875_v12 = vpop.xlane.xlu1 %874 }
 0x176   :  { %2164 = vpow2.f32 %v933_v11  ;;  %v917_v13 = vsub.f32 %v2423_v42, %v875_v12  ;;  %v97_v11 = vld [vmem:[%s2831_s2 + $0x8] sm:$0xf] }
 0x178   :  { %v935_v14 = vmul.f32 1.442695, %v917_v13 }
 0x179   :  { %v878_v17 = vpop.xlane.xlu1 %877 }
 0x17a   :  { %2166 = vpow2.f32 %v935_v14  ;;  %v918_v18 = vsub.f32 %v2427_v44, %v878_v17  ;;  %v2573_v14 = vsel %vm1062_vm3, %v97_v11, 0 }
 0x17c   :  { %v2509_v19 = vpop.eup %2162  ;;  %v937_v20 = vmul.f32 1.442695, %v918_v18 }
 0x17d   :  { %v884_v21 = vpop.xlane.xlu1 %883  ;;  %v881_v30 = vpop.xlane.xlu0 %880  ;;  %v963_v22 = vsel %vm111_vm0, %v2509_v19, 0.0 }
 0x17e   :  { %2168 = vpow2.f32 %v937_v20  ;;  %v920_v32 = vsub.f32 %v2439_v55, %v884_v21  ;;  %v919_v23 = vsub.f32 %v2435_v54, %v881_v30  ;;  %964 = vadd.xlane.f32.xlu0 %v963_v22 }
 0x180   :  { %v2515_v42 = vpop.eup %2164  ;;  %v941_v24 = vmul.f32 1.442695, %v920_v32  ;;  %v939_v25 = vmul.f32 1.442695, %v919_v23 }
 0x181   :  { %v966_v44 = vsel %vm111_vm0, %v2515_v42, 0.0 }
 0x182   :  { %2170 = vpow2.f32 %v941_v24  ;;  %967 = vadd.xlane.f32.xlu1 %v966_v44  ;;  %v99_v24 = vld [vmem:[%s2831_s2 + $0x10] sm:$0xf] }
 0x183   :  { %2172 = vpow2.f32 %v939_v25 }
 0x184   :  { %v2519_v26 = vpop.eup %2166 }
 0x185   :  { %v890_v31 = vpop.xlane.xlu1 %889  ;;  %v887_v33 = vpop.xlane.xlu0 %886  ;;  %v969_v55 = vsel %vm111_vm0, %v2519_v26, 0.0 }
 0x186   :  { %v922_v54 = vsub.f32 %v2451_v4, %v890_v31  ;;  %v921_v34 = vsub.f32 %v2447_v3, %v887_v33  ;;  %970 = vadd.xlane.f32.xlu0 %v969_v55  ;;  %v2595_v31 = vsel %vm1062_vm3, %v99_v24, 0 }
 0x188   :  { %v2525_v35 = vpop.eup %2168  ;;  %v945_v36 = vmul.f32 1.442695, %v922_v54  ;;  %v943_v37 = vmul.f32 1.442695, %v921_v34 }
 0x189   :  { %v972_v38 = vsel %vm111_vm0, %v2525_v35, 0.0 }
 0x18a   :  { %2174 = vpow2.f32 %v945_v36  ;;  %973 = vadd.xlane.f32.xlu1 %v972_v38  ;;  %v101_v36 = vld [vmem:[%s2831_s2 + $0x18] sm:$0xf]  ;;  %v102_v38 = vld [vmem:[%s2831_s2 + $0x1c] sm:$0xf] }
 0x18b   :  { %2176 = vpow2.f32 %v943_v37  ;;  %v2615_v37 = vsel %vm1062_vm3, %v101_v36, 0 }
 0x18c   :  { %v2529_v39 = vpop.eup %2170 }
 0x18d   :  { %v2531_v40 = vpop.eup %2172  ;;  %v896_v41 = vpop.xlane.xlu1 %895  ;;  %v978_v3 = vsel %vm111_vm0, %v2529_v39, 0.0 }
 0x18e   :  { %v893_v46 = vpop.xlane.xlu0 %892  ;;  %v924_v4 = vsub.f32 %v2463_v16, %v896_v41  ;;  %979 = vadd.xlane.f32.xlu1 %v978_v3  ;;  %v975_v48 = vsel %vm111_vm0, %v2531_v40, 0.0 }
 0x18f   :  { %v923_v47 = vsub.f32 %v2459_v15, %v893_v46  ;;  %976 = vadd.xlane.f32.xlu0 %v975_v48  ;;  %v2623_v46 = vsel %vm1062_vm3, %v102_v38, 0  ;;  %v103_v48 = vld [vmem:[%s2831_s2 + $0x20] sm:$0xf] }
 0x190   :  { %v949_v49 = vmul.f32 1.442695, %v924_v4 }
 0x191   :  { %v947_v50 = vmul.f32 1.442695, %v923_v47 }
 0x192   :  { %2178 = vpow2.f32 %v949_v49  ;;  %v2635_v49 = vsel %vm1062_vm3, %v103_v48, 0 }
 0x193   :  { %2180 = vpow2.f32 %v947_v50  ;;  %v104_v50 = vld [vmem:[%s2831_s2 + $0x24] sm:$0xf] }
 0x194   :  { %v2539_v51 = vpop.eup %2174 }
 0x195   :  { %v2541_v52 = vpop.eup %2176  ;;  %v902_v53 = vpop.xlane.xlu1 %901  ;;  %v984_v16 = vsel %vm111_vm0, %v2539_v51, 0.0 }
 0x196   :  { %v899_v56 = vpop.xlane.xlu0 %898  ;;  %v926_v15 = vsub.f32 %v2475_v29, %v902_v53  ;;  %985 = vadd.xlane.f32.xlu1 %v984_v16  ;;  %v981_v60 = vsel %vm111_vm0, %v2541_v52, 0.0  ;;  %v2641_v53 = vsel %vm1062_vm3, %v104_v50, 0 }
 0x197   :  { %v925_v57 = vsub.f32 %v2471_v28, %v899_v56  ;;  %982 = vadd.xlane.f32.xlu0 %v981_v60  ;;  %v96_v28 = vld [vmem:[%s2831_s2 + $0x4] sm:$0xf]  ;;  %v105_v56 = vld [vmem:[%s2831_s2 + $0x28] sm:$0xf]  ;;  %v107_v60 = vld [vmem:[%s2831_s2 + $0x30] sm:$0xf] }
 0x198   :  { %v953_v62 = vmul.f32 1.442695, %v926_v15  ;;  %v1110_v2 = vsel %vm1062_vm3, %v96_v28, 0  ;;  %v2647_v16 = vsel %vm1062_vm3, %v105_v56, 0  ;;  %v106_v15 = vld [vmem:[%s2831_s2 + $0x2c] sm:$0xf] }
 0x199   :  { %v951_v63 = vmul.f32 1.442695, %v925_v57  ;;  %2071 = vmatpush3.bf16.msra.mxu1 %v1110_v2  ;;  %v2653_v57 = vsel %vm1062_vm3, %v106_v15, 0  ;;  %v2659_v61 = vsel %vm1062_vm3, %v107_v60, 0  ;;  %v2671_v28 = vsel %vm1062_vm3, %v109_v1, 0 }
 0x19a   :  { %2182 = vpow2.f32 %v953_v62  ;;  %2082 = vmatprep.subr.bf16.mxu1 %v2226_v0  ;;  %v108_v62 = vld [vmem:[%s2831_s2 + $0x34] sm:$0xf]  ;;  %v110_v2 = vld [vmem:[%s2831_s2 + $0x3c] sm:$0xf] }
 0x19b   :  { %2184 = vpow2.f32 %v951_v63  ;;  %v2665_v63 = vsel %vm1062_vm3, %v108_v62, 0 }
 0x19c   :  { %v2557_v29 = vpop.eup %2178 }
 0x19d   :  { %v2560_v5 = vpop.eup %2180  ;;  %v908_v6 = vpop.xlane.xlu1 %907  ;;  %v990_v8 = vsel %vm111_vm0, %v2557_v29, 0.0 }
 0x19e   :  { %v905_v7 = vpop.xlane.xlu0 %904  ;;  %v928_v27 = vsub.f32 %v2487_v45, %v908_v6  ;;  %991 = vadd.xlane.f32.xlu1 %v990_v8  ;;  %v987_v10 = vsel %vm111_vm0, %v2560_v5, 0.0  ;;  %v2677_v6 = vsel %vm1062_vm3, %v110_v2, 0 }
 0x19f   :  { %v927_v9 = vsub.f32 %v2483_v43, %v905_v7  ;;  %988 = vadd.xlane.f32.xlu0 %v987_v10  ;;  %v98_v43 = vld [vmem:[%s2831_s2 + $0xc] sm:$0xf] }
 0x1a0   :  { %v957_v12 = vmul.f32 1.442695, %v928_v27  ;;  %v2581_v17 = vsel %vm1062_vm3, %v98_v43, 0 }
 0x1a1   :  { %v955_v13 = vmul.f32 1.442695, %v927_v9 }
 0x1a2   :  { %2186 = vpow2.f32 %v957_v12 }
 0x1a3   :  { %2188 = vpow2.f32 %v955_v13 }
 0x1a4   :  { %v2578_v45 = vpop.eup %2182 }
 0x1a5   :  { %v2583_v18 = vpop.eup %2184  ;;  %v914_v20 = vpop.xlane.xlu1 %913  ;;  %v996_v30 = vsel %vm111_vm0, %v2578_v45, 0.0 }
 0x1a6   :  { %v911_v21 = vpop.xlane.xlu0 %910  ;;  %v930_v22 = vsub.f32 %v2499_v59, %v914_v20  ;;  %997 = vadd.xlane.f32.xlu1 %v996_v30  ;;  %v993_v23 = vsel %vm111_vm0, %v2583_v18, 0.0 }
 0x1a7   :  { %v929_v32 = vsub.f32 %v2495_v58, %v911_v21  ;;  %994 = vadd.xlane.f32.xlu0 %v993_v23  ;;  %v100_v58 = vld [vmem:[%s2831_s2 + $0x14] sm:$0xf] }
 0x1a8   :  { %v961_v25 = vmul.f32 1.442695, %v930_v22  ;;  %v2603_v33 = vsel %vm1062_vm3, %v100_v58, 0 }
 0x1a9   :  { %v959_v44 = vmul.f32 1.442695, %v929_v32 }
 0x1aa   :  { %2190 = vpow2.f32 %v961_v25 }
 0x1ab   :  { %2192 = vpow2.f32 %v959_v44 }
 0x1ac   :  { %v2600_v59 = vpop.eup %2186 }
 0x1ad   :  { %v2605_v55 = vpop.eup %2188  ;;  %v1002_v54 = vsel %vm111_vm0, %v2600_v59, 0.0 }
 0x1ae   :  { %1003 = vadd.xlane.f32.xlu1 %v1002_v54  ;;  %v999_v34 = vsel %vm111_vm0, %v2605_v55, 0.0 }
 0x1af   :  { %1000 = vadd.xlane.f32.xlu0 %v999_v34 }
 0x1b4   :  { %v2620_v41 = vpop.eup %2190 }
 0x1b5   :  { %v2625_v3 = vpop.eup %2192  ;;  %v1008_v4 = vsel %vm111_vm0, %v2620_v41, 0.0 }
 0x1b6   :  { %1009 = vadd.xlane.f32.xlu1 %v1008_v4  ;;  %v1005_v47 = vsel %vm111_vm0, %v2625_v3, 0.0 }
 0x1b7   :  { %1006 = vadd.xlane.f32.xlu0 %v1005_v47 }
 0x20b   :  { %v965_v7 = vpop.xlane.xlu0 %964 }
 0x20c   :  { %2194 = vrcp.f32 %v965_v7 }
 0x20f   :  { %v968_v8 = vpop.xlane.xlu1 %967 }
 0x210   :  { %2196 = vrcp.f32 %v968_v8 }
 0x213   :  { %v971_v27 = vpop.xlane.xlu0 %970 }
 0x214   :  { %2198 = vrcp.f32 %v971_v27 }
 0x216   :  { %v2195_v9 = vpop.eup %2194 }
 0x217   :  { %v1027_v10 = vmul.f32 %v2195_v9, %v2509_v19  ;;  %v974_v11 = vpop.xlane.xlu1 %973 }
 0x218   :  { %2200 = vrcp.f32 %v974_v11 }
 0x219   :  { %v1043_v12 = vpack.c.bf16 %v1027_v10, %v1027_v10 }
 0x21a   :  { %v2197_v13 = vpop.eup %2196 }
 0x21b   :  { %v1028_v43 = vmul.f32 %v2197_v13, %v2515_v42  ;;  %v980_v20 = vpop.xlane.xlu1 %979  ;;  %2067 = vmatmul.mubr.msk.bf16.vlgmr.msra.gmra.mrb[32].mxu0 %vm111_vm0, %v1043_v12 }
 0x21c   :  { %2202 = vrcp.f32 %v980_v20  ;;  %v977_v21 = vpop.xlane.xlu0 %976  ;;  %2077 = vmatpush3.bf16.msra.mxu0 %v2573_v14  ;;  %2078 = vmatprep.mubr.msk.bf16.mxu0 %vm2227_vm1, %v2226_v0 }
 0x21d   :  { %2204 = vrcp.f32 %v977_v21  ;;  %v1044_v30 = vpack.c.bf16 %v1028_v43, %v1028_v43  ;;  %2088 = vmatprep.subr.bf16.mxu0 %v2226_v0 }
 0x21e   :  { %v2199_v19 = vpop.eup %2198 }
 0x21f   :  { %v1029_v22 = vmul.f32 %v2199_v19, %v2519_v26  ;;  %2073 = vmatmul.mubr.msk.bf16.vlgmr.msra.gmra.mrb[32].mxu1 %vm111_vm0, %v1044_v30 }
 0x220   :  { %2083 = vmatpush3.bf16.msra.mxu1 %v2581_v17  ;;  %2084 = vmatprep.mubr.msk.bf16.mxu1 %vm2227_vm1, %v2226_v0 }
 0x221   :  { %v1045_v42 = vpack.c.bf16 %v1029_v22, %v1029_v22  ;;  %2094 = vmatprep.subr.bf16.mxu1 %v2226_v0 }
 0x222   :  { %v2201_v14 = vpop.eup %2200 }
 0x223   :  { %v1030_v32 = vmul.f32 %v2201_v14, %v2525_v35  ;;  %v986_v23 = vpop.xlane.xlu1 %985  ;;  %2079 = vmatmul.mubr.msk.bf16.vlgmr.msra.gmra.mrb[36].mxu0 %vm111_vm0, %v1045_v42 }
 0x224   :  { %2206 = vrcp.f32 %v986_v23  ;;  %v983_v24 = vpop.xlane.xlu0 %982  ;;  %2089 = vmatpush3.bf16.msra.mxu0 %v2595_v31  ;;  %2090 = vmatprep.mubr.msk.bf16.mxu0 %vm2227_vm1, %v2226_v0 }
 0x225   :  { %2208 = vrcp.f32 %v983_v24  ;;  %v1046_v26 = vpack.c.bf16 %v1030_v32, %v1030_v32  ;;  %2100 = vmatprep.subr.bf16.mxu0 %v2226_v0 }
 0x226   :  { %v2203_v17 = vpop.eup %2202 }
 0x227   :  { %v2205_v25 = vpop.eup %2204  ;;  %2085 = vmatmul.mubr.msk.bf16.vlgmr.msra.gmra.mrb[36].mxu1 %vm111_vm0, %v1046_v26  ;;  %v1032_v44 = vmul.f32 %v2203_v17, %v2529_v39 }
 0x228   :  { %v1031_v35 = vmul.f32 %v2205_v25, %v2531_v40  ;;  %2095 = vmatpush3.bf16.msra.mxu1 %v2603_v33  ;;  %2096 = vmatprep.mubr.msk.bf16.mxu1 %vm2227_vm1, %v2226_v0 }
 0x229   :  { %2106 = vmatprep.subr.bf16.mxu1 %v2226_v0  ;;  %v1048_v34 = vpack.c.bf16 %v1032_v44, %v1032_v44 }
 0x22a   :  { %v1047_v31 = vpack.c.bf16 %v1031_v35, %v1031_v35 }
 0x22b   :  { %v992_v58 = vpop.xlane.xlu1 %991 }
 0x22c   :  { %2210 = vrcp.f32 %v992_v58  ;;  %2091 = vmatmul.mubr.msk.bf16.vlgmr.msra.gmra.mrb[40].mxu0 %vm111_vm0, %v1047_v31  ;;  %v989_v54 = vpop.xlane.xlu0 %988 }
 0x22d   :  { %2212 = vrcp.f32 %v989_v54  ;;  %2101 = vmatpush3.bf16.msra.mxu0 %v2615_v37  ;;  %2102 = vmatprep.mubr.msk.bf16.mxu0 %vm2227_vm1, %v2226_v0 }
 0x22e   :  { %v2207_v40 = vpop.eup %2206  ;;  %2112 = vmatprep.subr.bf16.mxu0 %v2226_v0 }
 0x22f   :  { %v2209_v33 = vpop.eup %2208  ;;  %2097 = vmatmul.mubr.msk.bf16.vlgmr.msra.gmra.mrb[40].mxu1 %vm111_vm0, %v1048_v34  ;;  %v1034_v36 = vmul.f32 %v2207_v40, %v2539_v51 }
 0x230   :  { %v1033_v39 = vmul.f32 %v2209_v33, %v2541_v52  ;;  %2107 = vmatpush3.bf16.msra.mxu1 %v2623_v46  ;;  %2108 = vmatprep.mubr.msk.bf16.mxu1 %vm2227_vm1, %v2226_v0 }
 0x231   :  { %2118 = vmatprep.subr.bf16.mxu1 %v2226_v0  ;;  %v1050_v47 = vpack.c.bf16 %v1034_v36, %v1034_v36 }
 0x232   :  { %v1049_v37 = vpack.c.bf16 %v1033_v39, %v1033_v39 }
 0x233   :  { %v998_v38 = vpop.xlane.xlu1 %997 }
 0x234   :  { %2214 = vrcp.f32 %v998_v38  ;;  %2103 = vmatmul.mubr.msk.bf16.vlgmr.msra.gmra.mrb[44].mxu0 %vm111_vm0, %v1049_v37  ;;  %v995_v4 = vpop.xlane.xlu0 %994 }
 0x235   :  { %2216 = vrcp.f32 %v995_v4  ;;  %2113 = vmatpush3.bf16.msra.mxu0 %v2635_v49  ;;  %2114 = vmatprep.mubr.msk.bf16.mxu0 %vm2227_vm1, %v2226_v0 }
 0x236   :  { %v2211_v52 = vpop.eup %2210  ;;  %2124 = vmatprep.subr.bf16.mxu0 %v2226_v0 }
 0x237   :  { %v2213_v46 = vpop.eup %2212  ;;  %2109 = vmatmul.mubr.msk.bf16.vlgmr.msra.gmra.mrb[44].mxu1 %vm111_vm0, %v1050_v47  ;;  %v1036_v48 = vmul.f32 %v2211_v52, %v2557_v29 }
 0x238   :  { %v1035_v51 = vmul.f32 %v2213_v46, %v2560_v5  ;;  %2119 = vmatpush3.bf16.msra.mxu1 %v2641_v53  ;;  %2120 = vmatprep.mubr.msk.bf16.mxu1 %vm2227_vm1, %v2226_v0 }
 0x239   :  { %2130 = vmatprep.subr.bf16.mxu1 %v2226_v0  ;;  %v1052_v15 = vpack.c.bf16 %v1036_v48, %v1036_v48 }
 0x23a   :  { %v1051_v49 = vpack.c.bf16 %v1035_v51, %v1035_v51 }
 0x23b   :  { %v1004_v50 = vpop.xlane.xlu1 %1003 }
 0x23c   :  { %2218 = vrcp.f32 %v1004_v50  ;;  %2115 = vmatmul.mubr.msk.bf16.vlgmr.msra.gmra.mrb[48].mxu0 %vm111_vm0, %v1051_v49  ;;  %v1001_v56 = vpop.xlane.xlu0 %1000 }
 0x23d   :  { %2220 = vrcp.f32 %v1001_v56  ;;  %2125 = vmatpush3.bf16.msra.mxu0 %v2647_v16  ;;  %2126 = vmatprep.mubr.msk.bf16.mxu0 %vm2227_vm1, %v2226_v0 }
 0x23e   :  { %v2215_v5 = vpop.eup %2214  ;;  %2136 = vmatprep.subr.bf16.mxu0 %v2226_v0 }
 0x23f   :  { %v2217_v53 = vpop.eup %2216  ;;  %2121 = vmatmul.mubr.msk.bf16.vlgmr.msra.gmra.mrb[48].mxu1 %vm111_vm0, %v1052_v15  ;;  %v1038_v60 = vmul.f32 %v2215_v5, %v2578_v45 }
 0x240   :  { %v1037_v29 = vmul.f32 %v2217_v53, %v2583_v18  ;;  %2131 = vmatpush3.bf16.msra.mxu1 %v2653_v57  ;;  %2132 = vmatprep.mubr.msk.bf16.mxu1 %vm2227_vm1, %v2226_v0 }
 0x241   :  { %2142 = vmatprep.subr.bf16.mxu1 %v2226_v0  ;;  %v1054_v2 = vpack.c.bf16 %v1038_v60, %v1038_v60 }
 0x242   :  { %v1053_v16 = vpack.c.bf16 %v1037_v29, %v1037_v29 }
 0x243   :  { %v1010_v62 = vpop.xlane.xlu1 %1009 }
 0x244   :  { %2222 = vrcp.f32 %v1010_v62  ;;  %2127 = vmatmul.mubr.msk.bf16.vlgmr.msra.gmra.mrb[52].mxu0 %vm111_vm0, %v1053_v16  ;;  %v1007_v1 = vpop.xlane.xlu0 %1006 }
 0x245   :  { %2224 = vrcp.f32 %v1007_v1  ;;  %2137 = vmatpush3.bf16.msra.mxu0 %v2659_v61  ;;  %2138 = vmatprep.mubr.msk.bf16.mxu0 %vm2227_vm1, %v2226_v0 }
 0x246   :  { %v2219_v18 = vpop.eup %2218  ;;  %2148 = vmatprep.subr.bf16.mxu0 %v2226_v0 }
 0x247   :  { %v2221_v57 = vpop.eup %2220  ;;  %2133 = vmatmul.mubr.msk.bf16.vlgmr.msra.gmra.mrb[52].mxu1 %vm111_vm0, %v1054_v2  ;;  %v1040_v7 = vmul.f32 %v2219_v18, %v2600_v59 }
 0x248   :  { %v1039_v45 = vmul.f32 %v2221_v57, %v2605_v55  ;;  %2143 = vmatpush3.bf16.msra.mxu1 %v2665_v63  ;;  %2144 = vmatprep.mubr.msk.bf16.mxu1 %vm2227_vm1, %v2226_v0 }
 0x249   :  { %2154 = vmatprep.subr.bf16.mxu1 %v2226_v0  ;;  %v1056_v8 = vpack.c.bf16 %v1040_v7, %v1040_v7 }
 0x24a   :  { %v1055_v61 = vpack.c.bf16 %v1039_v45, %v1039_v45 }
 0x24c   :  { %2139 = vmatmul.mubr.msk.bf16.vlgmr.msra.gmra.mrb[56].mxu0 %vm111_vm0, %v1055_v61 }
 0x24d   :  { %2149 = vmatpush3.bf16.msra.mxu0 %v2671_v28  ;;  %2150 = vmatprep.mubr.msk.bf16.mxu0 %vm2227_vm1, %v2226_v0 }
 0x24e   :  { %v2223_v27 = vpop.eup %2222 }
 0x24f   :  { %v2225_v55 = vpop.eup %2224  ;;  %2145 = vmatmul.mubr.msk.bf16.vlgmr.msra.gmra.mrb[56].mxu1 %vm111_vm0, %v1056_v8  ;;  %v1042_v59 = vmul.f32 %v2223_v27, %v2620_v41 }
 0x250   :  { %v1041_v63 = vmul.f32 %v2225_v55, %v2625_v3  ;;  %2155 = vmatpush3.bf16.msra.mxu1 %v2677_v6  ;;  %2156 = vmatprep.mubr.msk.bf16.mxu1 %vm2227_vm1, %v2226_v0 }
 0x251   :  { %v1058_v28 = vpack.c.bf16 %v1042_v59, %v1042_v59 }
 0x252   :  { %v1057_v9 = vpack.c.bf16 %v1041_v63, %v1041_v63 }
 0x254   :  { %2151 = vmatmul.mubr.msk.bf16.vlgmr.msra.gmra.mrb[60].mxu0 %vm111_vm0, %v1057_v9 }
 0x257   :  { %2157 = vmatmul.mubr.msk.bf16.vlgmr.msra.gmra.mrb[60].mxu1 %vm111_vm0, %v1058_v28 }
 0x2ee   :  { %v1100_v10 = vpop.f32.mrb[32].mxu0 }
 0x2ef   :  { %v1796_v11 = vpack.c.bf16 %v1100_v10, %v1100_v10  ;;  %v2068_v12 = vpop.f32.mrb[33].mxu0 }
 0x2f0   :  { %v1103_v13 = vpop.f32.mrb[34].mxu0 }
 0x2f1   :  { %1813 = vst.msk [vmem:[%s2832_s3] sm:$0xf] %vm1812_vm4, %v1796_v11  ;;  %v2069_v3 = vpop.f32.mrb[35].mxu0 }
 0x2f2   :  { %v1146_v0 = vpop.f32.mrb[32].mxu1 }
 0x2f3   :  { %v1797_v6 = vpack.c.bf16 %v1146_v0, %v1146_v0  ;;  %v2074_v41 = vpop.f32.mrb[33].mxu1 }
 0x2f4   :  { %v1149_v43 = vpop.f32.mrb[34].mxu1 }
 0x2f5   :  { %1814 = vst.msk [vmem:[%s2832_s3 + $0x4] sm:$0xf] %vm1812_vm4, %v1797_v6  ;;  %v2075_v20 = vpop.f32.mrb[35].mxu1 }
 0x2f6   :  { %v1192_v21 = vpop.f32.mrb[36].mxu0 }
 0x2f7   :  { %v1798_v30 = vpack.c.bf16 %v1192_v21, %v1192_v21  ;;  %v2080_v19 = vpop.f32.mrb[37].mxu0 }
 0x2f8   :  { %v1195_v22 = vpop.f32.mrb[38].mxu0 }
 0x2f9   :  { %1815 = vst.msk [vmem:[%s2832_s3 + $0x8] sm:$0xf] %vm1812_vm4, %v1798_v30  ;;  %v2081_v42 = vpop.f32.mrb[39].mxu0 }
 0x2fa   :  { %v1238_v14 = vpop.f32.mrb[36].mxu1 }
 0x2fb   :  { %v1799_v32 = vpack.c.bf16 %v1238_v14, %v1238_v14  ;;  %v2086_v23 = vpop.f32.mrb[37].mxu1 }
 0x2fc   :  { %v1241_v24 = vpop.f32.mrb[38].mxu1 }
 0x2fd   :  { %1816 = vst.msk [vmem:[%s2832_s3 + $0xc] sm:$0xf] %vm1812_vm4, %v1799_v32  ;;  %v2087_v26 = vpop.f32.mrb[39].mxu1 }
 0x2ff   :  { %v1284_v17 = vpop.f32.mrb[40].mxu0 }
 0x300   :  { %v1800_v25 = vpack.c.bf16 %v1284_v17, %v1284_v17  ;;  %v2092_v35 = vpop.f32.mrb[41].mxu0 }
 0x301   :  { %v1287_v44 = vpop.f32.mrb[42].mxu0 }
 0x302   :  { %1817 = vst.msk [vmem:[%s2832_s3 + $0x10] sm:$0xf] %vm1812_vm4, %v1800_v25  ;;  %v2093_v31 = vpop.f32.mrb[43].mxu0  ;;  %v1330_v58 = vpop.f32.mrb[40].mxu1 }
 0x303   :  { %v1801_v54 = vpack.c.bf16 %v1330_v58, %v1330_v58  ;;  %v2098_v34 = vpop.f32.mrb[41].mxu1 }
 0x304   :  { %v1333_v40 = vpop.f32.mrb[42].mxu1 }
 0x305   :  { %1818 = vst.msk [vmem:[%s2832_s3 + $0x14] sm:$0xf] %vm1812_vm4, %v1801_v54  ;;  %v2099_v33 = vpop.f32.mrb[43].mxu1 }
 0x307   :  { %v1376_v39 = vpop.f32.mrb[44].mxu0 }
 0x308   :  { %v1802_v36 = vpack.c.bf16 %v1376_v39, %v1376_v39  ;;  %v2104_v37 = vpop.f32.mrb[45].mxu0 }
 0x309   :  { %v1379_v38 = vpop.f32.mrb[46].mxu0 }
 0x30a   :  { %1819 = vst.msk [vmem:[%s2832_s3 + $0x18] sm:$0xf] %vm1812_vm4, %v1802_v36  ;;  %v2105_v4 = vpop.f32.mrb[47].mxu0  ;;  %v1422_v47 = vpop.f32.mrb[44].mxu1 }
 0x30b   :  { %v1803_v52 = vpack.c.bf16 %v1422_v47, %v1422_v47  ;;  %v2110_v46 = vpop.f32.mrb[45].mxu1 }
 0x30c   :  { %v1425_v51 = vpop.f32.mrb[46].mxu1 }
 0x30d   :  { %1820 = vst.msk [vmem:[%s2832_s3 + $0x1c] sm:$0xf] %vm1812_vm4, %v1803_v52  ;;  %v2111_v48 = vpop.f32.mrb[47].mxu1 }
 0x30f   :  { %v1468_v49 = vpop.f32.mrb[48].mxu0 }
 0x310   :  { %v1804_v50 = vpack.c.bf16 %v1468_v49, %v1468_v49  ;;  %v2116_v56 = vpop.f32.mrb[49].mxu0 }
 0x311   :  { %v1471_v15 = vpop.f32.mrb[50].mxu0 }
 0x312   :  { %1821 = vst.msk [vmem:[%s2832_s3 + $0x20] sm:$0xf] %vm1812_vm4, %v1804_v50  ;;  %v2117_v5 = vpop.f32.mrb[51].mxu0  ;;  %v1514_v53 = vpop.f32.mrb[48].mxu1 }
 0x313   :  { %v1805_v29 = vpack.c.bf16 %v1514_v53, %v1514_v53  ;;  %v2122_v60 = vpop.f32.mrb[49].mxu1 }
 0x314   :  { %v1517_v16 = vpop.f32.mrb[50].mxu1 }
 0x315   :  { %1822 = vst.msk [vmem:[%s2832_s3 + $0x24] sm:$0xf] %vm1812_vm4, %v1805_v29  ;;  %v2123_v62 = vpop.f32.mrb[51].mxu1 }
 0x317   :  { %v1560_v1 = vpop.f32.mrb[52].mxu0 }
 0x318   :  { %v1806_v2 = vpack.c.bf16 %v1560_v1, %v1560_v1  ;;  %v2128_v18 = vpop.f32.mrb[53].mxu0 }
 0x319   :  { %v1563_v57 = vpop.f32.mrb[54].mxu0 }
 0x31a   :  { %1823 = vst.msk [vmem:[%s2832_s3 + $0x28] sm:$0xf] %vm1812_vm4, %v1806_v2  ;;  %v2129_v45 = vpop.f32.mrb[55].mxu0  ;;  %v1606_v7 = vpop.f32.mrb[52].mxu1 }
 0x31b   :  { %v1807_v61 = vpack.c.bf16 %v1606_v7, %v1606_v7  ;;  %v2134_v8 = vpop.f32.mrb[53].mxu1 }
 0x31c   :  { %v1609_v27 = vpop.f32.mrb[54].mxu1 }
 0x31d   :  { %1824 = vst.msk [vmem:[%s2832_s3 + $0x2c] sm:$0xf] %vm1812_vm4, %v1807_v61  ;;  %v2135_v55 = vpop.f32.mrb[55].mxu1 }
 0x31f   :  { %v1652_v63 = vpop.f32.mrb[56].mxu0 }
 0x320   :  { %v1808_v59 = vpack.c.bf16 %v1652_v63, %v1652_v63  ;;  %v2140_v9 = vpop.f32.mrb[57].mxu0 }
 0x321   :  { %v1655_v28 = vpop.f32.mrb[58].mxu0 }
 0x322   :  { %1825 = vst.msk [vmem:[%s2832_s3 + $0x30] sm:$0xf] %vm1812_vm4, %v1808_v59  ;;  %v2141_v10 = vpop.f32.mrb[59].mxu0  ;;  %v1698_v11 = vpop.f32.mrb[56].mxu1 }
 0x323   :  { %v1809_v12 = vpack.c.bf16 %v1698_v11, %v1698_v11  ;;  %v2146_v13 = vpop.f32.mrb[57].mxu1 }
 0x324   :  { %v1701_v3 = vpop.f32.mrb[58].mxu1 }
 0x325   :  { %1826 = vst.msk [vmem:[%s2832_s3 + $0x34] sm:$0xf] %vm1812_vm4, %v1809_v12  ;;  %v2147_v0 = vpop.f32.mrb[59].mxu1 }
 0x327   :  { %v1744_v6 = vpop.f32.mrb[60].mxu0 }
 0x328   :  { %v1810_v41 = vpack.c.bf16 %v1744_v6, %v1744_v6  ;;  %v2152_v43 = vpop.f32.mrb[61].mxu0 }
 0x329   :  { %v1747_v20 = vpop.f32.mrb[62].mxu0 }
 0x32a   :  { %1827 = vst.msk [vmem:[%s2832_s3 + $0x38] sm:$0xf] %vm1812_vm4, %v1810_v41  ;;  %v2153_v21 = vpop.f32.mrb[63].mxu0  ;;  %v1790_v30 = vpop.f32.mrb[60].mxu1 }
 0x32b   :  { %v1811_v19 = vpack.c.bf16 %v1790_v30, %v1790_v30  ;;  %v2158_v22 = vpop.f32.mrb[61].mxu1 }
 0x32c   :  { %v1793_v42 = vpop.f32.mrb[62].mxu1 }
 0x32d   :  { %1828 = vst.msk [vmem:[%s2832_s3 + $0x3c] sm:$0xf] %vm1812_vm4, %v1811_v19  ;;  %v2159_v14 = vpop.f32.mrb[63].mxu1 }

// kernel: _lambda_.54
= control target key start
LH: loop header
LB: loop body
LE: loop exit
PB: predicated region body
PF: predicated region fallthrough
CT: control target
= control target key end

     0   :  { %v180_v0 = vmov 0.0   ;;  %vm181_vm0 = vmmov 0   ;;  %s235_s1 = inlined_call_operand.vmem [shape: bf16[128,128], index: 1, kind: input, shape index: {}]   ;;  %s236_s0 = inlined_call_operand.vmem [shape: bf16[8,128], index: 0, kind: input, shape index: {}]   ;;  %s237_s2 = inlined_call_operand.vmem [shape: f32[1,128], index: 2, kind: input, shape index: {}]   ;;  %s238_s3 = inlined_call_operand.vmem [shape: f32[8,128], index: 3, kind: output, shape index: {}]  }
   0x1   :  { %150 = vmatprep.subr.bf16.mxu0 %v180_v0  ;;  %v172_v1 = vld [vmem:[%s235_s1] sm:$0xff]   ;;  %166 = vmatprep.mubr.msk.bf16.mxu0 %vm181_vm0, %v180_v0  ;;  %v173_v2 = vld [vmem:[%s235_s1 + $0x8] sm:$0xff]   ;;  %v174_v3 = vld [vmem:[%s235_s1 + $0x10] sm:$0xff]  }
   0x2   :  { %151 = vmatpush3.bf16.msra.mxu0 %v172_v1  ;;  %v175_v4 = vld [vmem:[%s235_s1 + $0x18] sm:$0xff]   ;;  %v176_v5 = vld [vmem:[%s235_s1 + $0x20] sm:$0xff]   ;;  %v177_v6 = vld [vmem:[%s235_s1 + $0x28] sm:$0xff]  }
   0x3   :  { %152 = vmatprep.subr.bf16.mxu0 %v180_v0  ;;  %v178_v7 = vld [vmem:[%s235_s1 + $0x30] sm:$0xff]   ;;  %v179_v8 = vld [vmem:[%s235_s1 + $0x38] sm:$0xff]   ;;  %v15_v9 = vld [vmem:[%s236_s0] sm:$0xf] }
   0x4   :  { %v132_v10 = vld [vmem:[%s237_s2] ss:$0 sm:$0xff] }
   0x6   :  { %153 = vmatpush3.bf16.msra.mxu0 %v173_v2 }
   0x7   :  { %154 = vmatprep.subr.bf16.mxu0 %v180_v0 }
   0xa   :  { %155 = vmatpush3.bf16.msra.mxu0 %v174_v3 }
   0xb   :  { %156 = vmatprep.subr.bf16.mxu0 %v180_v0 }
   0xe   :  { %157 = vmatpush3.bf16.msra.mxu0 %v175_v4 }
   0xf   :  { %158 = vmatprep.subr.bf16.mxu0 %v180_v0 }
  0x12   :  { %159 = vmatpush3.bf16.msra.mxu0 %v176_v5 }
  0x13   :  { %160 = vmatprep.subr.bf16.mxu0 %v180_v0 }
  0x16   :  { %161 = vmatpush3.bf16.msra.mxu0 %v177_v6 }
  0x17   :  { %162 = vmatprep.subr.bf16.mxu0 %v180_v0 }
  0x1a   :  { %163 = vmatpush3.bf16.msra.mxu0 %v178_v7 }
  0x1b   :  { %164 = vmatprep.subr.bf16.mxu0 %v180_v0 }
  0x1e   :  { %165 = vmatpush3.bf16.msra.mxu0 %v179_v8 }
  0x21   :  { %167 = vmatmul.mubr.bf16.vlgmr.msra.gmra.mrb[0].mxu0 %v15_v9 }
  0xf4   :  { %v121_v11 = vpop.f32.mrb[0].mxu0 }
  0xf5   :  { %v122_v12 = vadd.f32 %v132_v10, %v121_v11  ;;  %v168_v13 = vpop.f32.mrb[1].mxu0 }
  0xf6   :  { %v124_v14 = vpop.f32.mrb[2].mxu0 }
  0xf7   :  { %127 = vst [vmem:[%s238_s3] sm:$0xff] %v122_v12  ;;  %v169_v15 = vpop.f32.mrb[3].mxu0 }

</bundles_post_ra>
